<compile_context>
chip_gen: v6e
topology: v6e:2x2x1
jax: 0.10.0
libtpu: 0.0.40
codegen_flags: <defaults>
</compile_context>

<pallas_src>
import functools

import jax
import jax.numpy as jnp
from jax.experimental import pallas as pl
from jax.experimental.pallas import tpu as pltpu


def _res_block_kernel(H, W, Cin, Cout, cpg,
                      x_ref, t_ref,
                      w1_ref, b1_ref, w2_ref, b2_ref,
                      wres_ref, bres_ref, wmlp_ref, bmlp_ref,
                      g1_ref, be1_ref, g2_ref, be2_ref, gmask_ref,
                      o_ref, hpad_ref):
    f32 = jnp.float32
    Bt = x_ref.shape[0]
    WCi, WCo = W * Cin, W * Cout
    inv_n = 1.0 / float(H * W * cpg)

    xp = x_ref[...]                                    # (Bt, H+2, (W+2)*Cin)
    gmask = gmask_ref[...]                             # (W*Cout, W*Cout)

    def group_norm(v, gamma, beta):
        # two-pass (centered) variance; per-image, per-group stats via the
        # lane-space group-mask matmul (stays on the MXU, no relayout).
        mean = jnp.dot(jnp.sum(v, axis=1), gmask,
                       preferred_element_type=f32) * inv_n     # (Bt, W*Cout)
        c = v - mean[:, None, :]
        var = jnp.dot(jnp.sum(c * c, axis=1), gmask,
                      preferred_element_type=f32) * inv_n
        return c * jax.lax.rsqrt(var + 1e-5)[:, None, :] * gamma + beta

    # ---- conv_1 (weights pre-standardized + block-diagonalized in wrapper) ----
    taps1 = [xp[:, ki:ki + H, kj * Cin:kj * Cin + WCi]
             for ki in range(3) for kj in range(3)]    # 9 x (Bt, H, W*Cin)
    a1 = jnp.concatenate(taps1, axis=-1).reshape(Bt * H, 9 * WCi)
    h = jnp.dot(a1, w1_ref[...], preferred_element_type=f32) + b1_ref[...]
    h = group_norm(h.reshape(Bt, H, WCo), g1_ref[...], be1_ref[...])

    # ---- time-embedding MLP: SiLU -> Linear -> (scale, shift) ----
    t = t_ref[:, 0, :]                                 # (Bt, T)
    t = t * jax.nn.sigmoid(t)
    ss = jnp.dot(t, wmlp_ref[...], preferred_element_type=f32) + bmlp_ref[...]
    scale = ss[:, :WCo][:, None, :]
    shift = ss[:, WCo:][:, None, :]
    h = h * (scale + 1.0) + shift
    h = h * jax.nn.sigmoid(h)                          # act_1: SiLU

    # ---- conv_2: zero-pad via scratch; only the border is zeroed each step ----
    zc = jnp.zeros((Bt, H, Cout), f32)
    hpad_ref[:, 1:H + 1, :] = jnp.concatenate([zc, h, zc], axis=-1)
    zr = jnp.zeros((Bt, 1, (W + 2) * Cout), f32)
    hpad_ref[:, 0:1, :] = zr
    hpad_ref[:, H + 1:H + 2, :] = zr
    hp = hpad_ref[...]                                 # (Bt, H+2, (W+2)*Cout)

    taps2 = [hp[:, ki:ki + H, kj * Cout:kj * Cout + WCo]
             for ki in range(3) for kj in range(3)]
    a2 = jnp.concatenate(taps2, axis=-1).reshape(Bt * H, 9 * WCo)
    h2 = jnp.dot(a2, w2_ref[...], preferred_element_type=f32) + b2_ref[...]
    h2 = group_norm(h2.reshape(Bt, H, WCo), g2_ref[...], be2_ref[...])
    h2 = jnp.maximum(h2, 0.0)                          # act_2: ReLU

    # ---- 1x1 residual conv (block-diagonal over W on lanes) ----
    xc = xp[:, 1:H + 1, Cin:Cin + WCi].reshape(Bt * H, WCi)
    res = jnp.dot(xc, wres_ref[...], preferred_element_type=f32) + bres_ref[...]

    o_ref[...] = h2 + res.reshape(Bt, H, WCo)


def res_block_forward(x_nchw, time_emb, params, groups=8, batch_tile=None):
    """ResBlock forward. x_nchw: (B, Cin, H, W); time_emb: (B, T).

    `params` uses PyTorch layouts:
      conv1_w (Cout,Cin,3,3) conv1_b (Cout,)   conv2_w (Cout,Cout,3,3) conv2_b (Cout,)
      res_w (Cout,Cin,1,1) res_b (Cout,)       mlp_w (2*Cout,T) mlp_b (2*Cout,)
      norm1_w/norm1_b/norm2_w/norm2_b (Cout,)
    """
    f32 = jnp.float32
    B, Cin, H, W = x_nchw.shape
    Cout = params["conv1_w"].shape[0]
    T = time_emb.shape[-1]
    cpg = Cout // groups
    WCi, WCo = W * Cin, W * Cout

    # images per grid step: amortize per-step overhead for larger batches,
    # but keep >=2 grid steps for the v7x second TensorCore when B is tiny.
    if batch_tile is None:
        batch_tile = 1
        if B > 2:
            for d in range(min(8, B), 0, -1):
                if B % d == 0:
                    batch_tile = d
                    break
    bt = batch_tile
    assert B % bt == 0

    # -------- grid-invariant preprocessing (hoisted out of the kernel) --------
    # conv_1 weight standardization (per out-channel, unbiased=False, f32 eps)
    w1 = params["conv1_w"].astype(f32)
    mu = jnp.mean(w1, axis=(1, 2, 3), keepdims=True)
    var = jnp.mean((w1 - mu) ** 2, axis=(1, 2, 3), keepdims=True)
    w1n = (w1 - mu) * jax.lax.rsqrt(var + 1e-5)

    eyeW = jnp.eye(W, dtype=f32)

    def conv3x3_blockdiag(w):          # (Cout, Cin, 3, 3) -> (9*W*Cin, W*Cout)
        co, ci = w.shape[0], w.shape[1]
        taps = jnp.transpose(w, (2, 3, 1, 0)).reshape(9, ci, co)
        big = jnp.einsum('tic,jJ->tjiJc', taps, eyeW)
        return big.reshape(9 * W * ci, W * co)

    def lane_tile(v):                  # (C,) -> (1, W*C): lane j*C+c -> v[c]
        return jnp.tile(jnp.asarray(v, f32).reshape(1, -1), (1, W))

    w1_big = conv3x3_blockdiag(w1n)
    w2_big = conv3x3_blockdiag(params["conv2_w"].astype(f32))
    wres = params["res_w"].astype(f32).reshape(Cout, Cin).T        # (Cin, Cout)
    wres_big = jnp.einsum('ic,jJ->jiJc', wres, eyeW).reshape(WCi, WCo)

    wm = params["mlp_w"].astype(f32).T                             # (T, 2*Cout)
    wmlp_t = jnp.concatenate([jnp.tile(wm[:, :Cout], (1, W)),
                              jnp.tile(wm[:, Cout:], (1, W))], axis=1)
    bm = params["mlp_b"].astype(f32)
    bmlp_t = jnp.concatenate([lane_tile(bm[:Cout]), lane_tile(bm[Cout:])], axis=1)

    b1_t = lane_tile(params["conv1_b"])
    b2_t = lane_tile(params["conv2_b"])
    bres_t = lane_tile(params["res_b"])
    g1_t = lane_tile(params["norm1_w"])
    be1_t = lane_tile(params["norm1_b"])
    g2_t = lane_tile(params["norm2_w"])
    be2_t = lane_tile(params["norm2_b"])

    ch = jnp.arange(WCo) % Cout
    gid = ch // cpg
    gmask = (gid[:, None] == gid[None, :]).astype(f32)             # (W*Cout, W*Cout)

    # inputs: NHWC, spatially pre-padded, W and C fused onto the lane axis
    x = jnp.transpose(x_nchw, (0, 2, 3, 1)).astype(f32)
    x_pad = jnp.pad(x, ((0, 0), (1, 1), (1, 1), (0, 0))).reshape(B, H + 2, (W + 2) * Cin)
    temb = time_emb.astype(f32).reshape(B, 1, T)

    kernel = functools.partial(_res_block_kernel, H, W, Cin, Cout, cpg)

    def full(shape):
        return pl.BlockSpec(shape, lambda b: (0,) * len(shape))

    out = pl.pallas_call(
        kernel,
        out_shape=jax.ShapeDtypeStruct((B, H, WCo), f32),          # lane-dense output
        grid=(B // bt,),
        in_specs=[
            pl.BlockSpec((bt, H + 2, (W + 2) * Cin), lambda b: (b, 0, 0)),  # x_pad
            pl.BlockSpec((bt, 1, T), lambda b: (b, 0, 0)),                  # time emb
            full((9 * WCi, WCo)),       # conv_1 weight (standardized, block-diag)
            full((1, WCo)),             # conv_1 bias (lane-tiled)
            full((9 * WCo, WCo)),       # conv_2 weight (block-diag)
            full((1, WCo)),             # conv_2 bias
            full((WCi, WCo)),           # 1x1 residual conv (block-diag)
            full((1, WCo)),             # residual bias
            full((T, 2 * WCo)),         # mlp weight (lane-tiled)
            full((1, 2 * WCo)),         # mlp bias
            full((1, WCo)),             # norm_1 gamma
            full((1, WCo)),             # norm_1 beta
            full((1, WCo)),             # norm_2 gamma
            full((1, WCo)),             # norm_2 beta
            full((WCo, WCo)),           # group mask
        ],
        out_specs=pl.BlockSpec((bt, H, WCo), lambda b: (b, 0, 0)),
        scratch_shapes=[pltpu.VMEM((bt, H + 2, (W + 2) * Cout), f32)],
        compiler_params=pltpu.CompilerParams(
            dimension_semantics=("parallel",)),
    )(x_pad, temb, w1_big, b1_t, w2_big, b2_t, wres_big, bres_t,
      wmlp_t, bmlp_t, g1_t, be1_t, g2_t, be2_t, gmask)

    out = out.reshape(B, H, W, Cout)
    return jnp.transpose(out, (0, 3, 1, 2))            # back to NCHW


if __name__ == "__main__":
    B, Cin, Cout, H, W, T, groups = 2, 8, 16, 16, 16, 32, 8

    key = jax.random.PRNGKey(0)
    ks = jax.random.split(key, 10)
    params = {
        "conv1_w": 0.1 * jax.random.normal(ks[0], (Cout, Cin, 3, 3), jnp.float32),
        "conv1_b": 0.1 * jax.random.normal(ks[1], (Cout,), jnp.float32),
        "conv2_w": 0.1 * jax.random.normal(ks[2], (Cout, Cout, 3, 3), jnp.float32),
        "conv2_b": 0.1 * jax.random.normal(ks[3], (Cout,), jnp.float32),
        "res_w":   0.1 * jax.random.normal(ks[4], (Cout, Cin, 1, 1), jnp.float32),
        "res_b":   0.1 * jax.random.normal(ks[5], (Cout,), jnp.float32),
        "mlp_w":   0.1 * jax.random.normal(ks[6], (2 * Cout, T), jnp.float32),
        "mlp_b":   0.1 * jax.random.normal(ks[7], (2 * Cout,), jnp.float32),
        # GroupNorm affine params (PyTorch default init: ones / zeros)
        "norm1_w": jnp.ones((Cout,), jnp.float32),
        "norm1_b": jnp.zeros((Cout,), jnp.float32),
        "norm2_w": jnp.ones((Cout,), jnp.float32),
        "norm2_b": jnp.zeros((Cout,), jnp.float32),
    }

    x = jax.random.normal(ks[8], (B, Cin, H, W), jnp.float32)       # NCHW like PyTorch
    temb = jax.random.normal(ks[9], (B, T), jnp.float32)

    out = res_block_forward(x, temb, params, groups=groups)
    jax.block_until_ready(out)
    assert out.shape == (B, Cout, H, W)
    print("KERNEL_OK")
</pallas_src>

<mosaic_0001>
module attributes {stable_mosaic.version = 11 : i64} {
  func.func @_res_block_kernel(%arg0: i32, %arg1: memref<1x18x144xf32, #tpu.memory_space<vmem>>, %arg2: memref<1x1x32xf32, #tpu.memory_space<vmem>>, %arg3: memref<1152x256xf32, #tpu.memory_space<vmem>>, %arg4: memref<1x256xf32, #tpu.memory_space<vmem>>, %arg5: memref<2304x256xf32, #tpu.memory_space<vmem>>, %arg6: memref<1x256xf32, #tpu.memory_space<vmem>>, %arg7: memref<128x256xf32, #tpu.memory_space<vmem>>, %arg8: memref<1x256xf32, #tpu.memory_space<vmem>>, %arg9: memref<32x512xf32, #tpu.memory_space<vmem>>, %arg10: memref<1x512xf32, #tpu.memory_space<vmem>>, %arg11: memref<1x256xf32, #tpu.memory_space<vmem>>, %arg12: memref<1x256xf32, #tpu.memory_space<vmem>>, %arg13: memref<1x256xf32, #tpu.memory_space<vmem>>, %arg14: memref<1x256xf32, #tpu.memory_space<vmem>>, %arg15: memref<256x256xf32, #tpu.memory_space<vmem>>, %arg16: memref<1x16x256xf32, #tpu.memory_space<vmem>>, %arg17: memref<1x18x288xf32, #tpu.memory_space<vmem>>) attributes {dimension_semantics = [#tpu.dimension_semantics<parallel>], iteration_bounds = array<i64: 2>, scalar_prefetch = 0 : i64, scratch_operands = 1 : i64, tpu.core_type = #tpu.core_type<tc>, window_params = [{transform_indices = @transform_0, window_bounds = array<i64: 1, 18, 144>}, {transform_indices = @transform_1, window_bounds = array<i64: 1, 1, 32>}, {pipeline_mode = #tpu.pipeline_mode<synchronous>, transform_indices = @transform_2, window_bounds = array<i64: 1152, 256>}, {pipeline_mode = #tpu.pipeline_mode<synchronous>, transform_indices = @transform_3, window_bounds = array<i64: 1, 256>}, {pipeline_mode = #tpu.pipeline_mode<synchronous>, transform_indices = @transform_4, window_bounds = array<i64: 2304, 256>}, {pipeline_mode = #tpu.pipeline_mode<synchronous>, transform_indices = @transform_5, window_bounds = array<i64: 1, 256>}, {pipeline_mode = #tpu.pipeline_mode<synchronous>, transform_indices = @transform_6, window_bounds = array<i64: 128, 256>}, {pipeline_mode = #tpu.pipeline_mode<synchronous>, transform_indices = @transform_7, window_bounds = array<i64: 1, 256>}, {pipeline_mode = #tpu.pipeline_mode<synchronous>, transform_indices = @transform_8, window_bounds = array<i64: 32, 512>}, {pipeline_mode = #tpu.pipeline_mode<synchronous>, transform_indices = @transform_9, window_bounds = array<i64: 1, 512>}, {pipeline_mode = #tpu.pipeline_mode<synchronous>, transform_indices = @transform_10, window_bounds = array<i64: 1, 256>}, {pipeline_mode = #tpu.pipeline_mode<synchronous>, transform_indices = @transform_11, window_bounds = array<i64: 1, 256>}, {pipeline_mode = #tpu.pipeline_mode<synchronous>, transform_indices = @transform_12, window_bounds = array<i64: 1, 256>}, {pipeline_mode = #tpu.pipeline_mode<synchronous>, transform_indices = @transform_13, window_bounds = array<i64: 1, 256>}, {pipeline_mode = #tpu.pipeline_mode<synchronous>, transform_indices = @transform_14, window_bounds = array<i64: 256, 256>}, {transform_indices = @transform_15, window_bounds = array<i64: 1, 16, 256>}]} {
    %c0 = arith.constant 0 : index
    %c0_0 = arith.constant 0 : index
    %c0_1 = arith.constant 0 : index
    %0 = vector.load %arg1[%c0, %c0_0, %c0_1] : memref<1x18x144xf32, #tpu.memory_space<vmem>>, vector<1x18x144xf32>
    %c0_2 = arith.constant 0 : index
    %c0_3 = arith.constant 0 : index
    %1 = vector.load %arg15[%c0_2, %c0_3] : memref<256x256xf32, #tpu.memory_space<vmem>>, vector<256x256xf32>
    %2 = vector.extract_strided_slice %0 {offsets = [0, 0, 0], sizes = [1, 16, 128], strides = [1, 1, 1]} : vector<1x18x144xf32> to vector<1x16x128xf32>
    %3 = vector.extract_strided_slice %0 {offsets = [0, 0, 8], sizes = [1, 16, 128], strides = [1, 1, 1]} : vector<1x18x144xf32> to vector<1x16x128xf32>
    %4 = vector.extract_strided_slice %0 {offsets = [0, 0, 16], sizes = [1, 16, 128], strides = [1, 1, 1]} : vector<1x18x144xf32> to vector<1x16x128xf32>
    %5 = vector.extract_strided_slice %0 {offsets = [0, 1, 0], sizes = [1, 16, 128], strides = [1, 1, 1]} : vector<1x18x144xf32> to vector<1x16x128xf32>
    %6 = vector.extract_strided_slice %0 {offsets = [0, 1, 8], sizes = [1, 16, 128], strides = [1, 1, 1]} : vector<1x18x144xf32> to vector<1x16x128xf32>
    %7 = vector.extract_strided_slice %0 {offsets = [0, 1, 16], sizes = [1, 16, 128], strides = [1, 1, 1]} : vector<1x18x144xf32> to vector<1x16x128xf32>
    %8 = vector.extract_strided_slice %0 {offsets = [0, 2, 0], sizes = [1, 16, 128], strides = [1, 1, 1]} : vector<1x18x144xf32> to vector<1x16x128xf32>
    %9 = vector.extract_strided_slice %0 {offsets = [0, 2, 8], sizes = [1, 16, 128], strides = [1, 1, 1]} : vector<1x18x144xf32> to vector<1x16x128xf32>
    %10 = vector.extract_strided_slice %0 {offsets = [0, 2, 16], sizes = [1, 16, 128], strides = [1, 1, 1]} : vector<1x18x144xf32> to vector<1x16x128xf32>
    %11 = tpu.concatenate %2, %3, %4, %5, %6, %7, %8, %9, %10 in 2 : vector<1x16x128xf32>, vector<1x16x128xf32>, vector<1x16x128xf32>, vector<1x16x128xf32>, vector<1x16x128xf32>, vector<1x16x128xf32>, vector<1x16x128xf32>, vector<1x16x128xf32>, vector<1x16x128xf32> -> vector<1x16x1152xf32>
    %12 = vector.shape_cast %11 : vector<1x16x1152xf32> to vector<16x1152xf32>
    %c0_4 = arith.constant 0 : index
    %c0_5 = arith.constant 0 : index
    %13 = vector.load %arg3[%c0_4, %c0_5] : memref<1152x256xf32, #tpu.memory_space<vmem>>, vector<1152x256xf32>
    %cst = arith.constant dense<0.000000e+00> : vector<16x256xf32>
    %14 = tpu.matmul %12, %13, %cst {dimension_numbers = #tpu.dot_dimension_numbers<[1], [0], [0], [1], [0, 0, 1, 1], [], []>} : vector<16x1152xf32>, vector<1152x256xf32>, vector<16x256xf32> -> vector<16x256xf32>
    %c0_6 = arith.constant 0 : index
    %c0_7 = arith.constant 0 : index
    %15 = vector.load %arg4[%c0_6, %c0_7] : memref<1x256xf32, #tpu.memory_space<vmem>>, vector<1x256xf32>
    %16 = vector.broadcast %15 : vector<1x256xf32> to vector<16x256xf32>
    %17 = arith.addf %14, %16 : vector<16x256xf32>
    %18 = vector.shape_cast %17 : vector<16x256xf32> to vector<1x16x256xf32>
    %c0_8 = arith.constant 0 : index
    %c0_9 = arith.constant 0 : index
    %19 = vector.load %arg11[%c0_8, %c0_9] : memref<1x256xf32, #tpu.memory_space<vmem>>, vector<1x256xf32>
    %c0_10 = arith.constant 0 : index
    %c0_11 = arith.constant 0 : index
    %20 = vector.load %arg12[%c0_10, %c0_11] : memref<1x256xf32, #tpu.memory_space<vmem>>, vector<1x256xf32>
    %cst_12 = arith.constant dense<0.000000e+00> : vector<1x256xf32>
    %21 = vector.multi_reduction <add>, %18, %cst_12 [1] : vector<1x16x256xf32> to vector<1x256xf32>
    %cst_13 = arith.constant dense<0.000000e+00> : vector<1x256xf32>
    %22 = tpu.matmul %21, %1, %cst_13 {dimension_numbers = #tpu.dot_dimension_numbers<[1], [0], [0], [1], [0, 0, 1, 1], [], []>} : vector<1x256xf32>, vector<256x256xf32>, vector<1x256xf32> -> vector<1x256xf32>
    %cst_14 = arith.constant 0.001953125 : f32
    %23 = vector.broadcast %cst_14 : f32 to vector<1x256xf32>
    %24 = arith.mulf %22, %23 : vector<1x256xf32>
    %25 = vector.shape_cast %24 : vector<1x256xf32> to vector<1x1x256xf32>
    %26 = vector.broadcast %25 : vector<1x1x256xf32> to vector<1x16x256xf32>
    %27 = arith.subf %18, %26 : vector<1x16x256xf32>
    %28 = arith.mulf %27, %27 : vector<1x16x256xf32>
    %cst_15 = arith.constant dense<0.000000e+00> : vector<1x256xf32>
    %29 = vector.multi_reduction <add>, %28, %cst_15 [1] : vector<1x16x256xf32> to vector<1x256xf32>
    %cst_16 = arith.constant dense<0.000000e+00> : vector<1x256xf32>
    %30 = tpu.matmul %29, %1, %cst_16 {dimension_numbers = #tpu.dot_dimension_numbers<[1], [0], [0], [1], [0, 0, 1, 1], [], []>} : vector<1x256xf32>, vector<256x256xf32>, vector<1x256xf32> -> vector<1x256xf32>
    %cst_17 = arith.constant 0.001953125 : f32
    %31 = vector.broadcast %cst_17 : f32 to vector<1x256xf32>
    %32 = arith.mulf %30, %31 : vector<1x256xf32>
    %cst_18 = arith.constant 9.99999974E-6 : f32
    %33 = vector.broadcast %cst_18 : f32 to vector<1x256xf32>
    %34 = arith.addf %32, %33 : vector<1x256xf32>
    %35 = math.rsqrt %34 : vector<1x256xf32>
    %36 = vector.shape_cast %35 : vector<1x256xf32> to vector<1x1x256xf32>
    %37 = vector.broadcast %36 : vector<1x1x256xf32> to vector<1x16x256xf32>
    %38 = arith.mulf %27, %37 : vector<1x16x256xf32>
    %39 = vector.shape_cast %19 : vector<1x256xf32> to vector<1x1x256xf32>
    %40 = vector.broadcast %39 : vector<1x1x256xf32> to vector<1x16x256xf32>
    %41 = arith.mulf %38, %40 : vector<1x16x256xf32>
    %42 = vector.shape_cast %20 : vector<1x256xf32> to vector<1x1x256xf32>
    %43 = vector.broadcast %42 : vector<1x1x256xf32> to vector<1x16x256xf32>
    %44 = arith.addf %41, %43 : vector<1x16x256xf32>
    %c0_19 = arith.constant 0 : index
    %c0_20 = arith.constant 0 : index
    %c0_21 = arith.constant 0 : index
    %45 = vector.load %arg2[%c0_19, %c0_20, %c0_21] : memref<1x1x32xf32, #tpu.memory_space<vmem>>, vector<1x1x32xf32>
    %46 = vector.shape_cast %45 : vector<1x1x32xf32> to vector<1x32xf32>
    %47 = arith.negf %46 : vector<1x32xf32>
    %48 = math.exp %47 : vector<1x32xf32>
    %cst_22 = arith.constant 1.000000e+00 : f32
    %49 = vector.broadcast %cst_22 : f32 to vector<1x32xf32>
    %50 = arith.addf %49, %48 : vector<1x32xf32>
    %51 = arith.divf %49, %50 : vector<1x32xf32>
    %52 = arith.mulf %46, %51 : vector<1x32xf32>
    %c0_23 = arith.constant 0 : index
    %c0_24 = arith.constant 0 : index
    %53 = vector.load %arg9[%c0_23, %c0_24] : memref<32x512xf32, #tpu.memory_space<vmem>>, vector<32x512xf32>
    %cst_25 = arith.constant dense<0.000000e+00> : vector<1x512xf32>
    %54 = tpu.matmul %52, %53, %cst_25 {dimension_numbers = #tpu.dot_dimension_numbers<[1], [0], [0], [1], [0, 0, 1, 1], [], []>} : vector<1x32xf32>, vector<32x512xf32>, vector<1x512xf32> -> vector<1x512xf32>
    %c0_26 = arith.constant 0 : index
    %c0_27 = arith.constant 0 : index
    %55 = vector.load %arg10[%c0_26, %c0_27] : memref<1x512xf32, #tpu.memory_space<vmem>>, vector<1x512xf32>
    %56 = arith.addf %54, %55 : vector<1x512xf32>
    %57 = vector.extract_strided_slice %56 {offsets = [0, 0], sizes = [1, 256], strides = [1, 1]} : vector<1x512xf32> to vector<1x256xf32>
    %58 = vector.shape_cast %57 : vector<1x256xf32> to vector<1x1x256xf32>
    %59 = vector.extract_strided_slice %56 {offsets = [0, 256], sizes = [1, 256], strides = [1, 1]} : vector<1x512xf32> to vector<1x256xf32>
    %60 = vector.shape_cast %59 : vector<1x256xf32> to vector<1x1x256xf32>
    %cst_28 = arith.constant 1.000000e+00 : f32
    %61 = vector.broadcast %cst_28 : f32 to vector<1x1x256xf32>
    %62 = arith.addf %58, %61 : vector<1x1x256xf32>
    %63 = vector.broadcast %62 : vector<1x1x256xf32> to vector<1x16x256xf32>
    %64 = arith.mulf %44, %63 : vector<1x16x256xf32>
    %65 = vector.broadcast %60 : vector<1x1x256xf32> to vector<1x16x256xf32>
    %66 = arith.addf %64, %65 : vector<1x16x256xf32>
    %67 = arith.negf %66 : vector<1x16x256xf32>
    %68 = math.exp %67 : vector<1x16x256xf32>
    %cst_29 = arith.constant 1.000000e+00 : f32
    %69 = vector.broadcast %cst_29 : f32 to vector<1x16x256xf32>
    %70 = arith.addf %69, %68 : vector<1x16x256xf32>
    %71 = arith.divf %69, %70 : vector<1x16x256xf32>
    %72 = arith.mulf %66, %71 : vector<1x16x256xf32>
    %cst_30 = arith.constant 0.000000e+00 : f32
    %73 = vector.broadcast %cst_30 : f32 to vector<1x16x16xf32>
    %74 = tpu.concatenate %73, %72, %73 in 2 : vector<1x16x16xf32>, vector<1x16x256xf32>, vector<1x16x16xf32> -> vector<1x16x288xf32>
    %c0_31 = arith.constant 0 : index
    %c1 = arith.constant 1 : index
    %c0_32 = arith.constant 0 : index
    %75 = vector.load %arg17[%c0_31, %c1, %c0_32] : memref<1x18x288xf32, #tpu.memory_space<vmem>>, vector<1x16x288xf32>
    tpu.vector_store %arg17[%c0_31, %c1, %c0_32], %74 {strides = array<i32>} : memref<1x18x288xf32, #tpu.memory_space<vmem>>, vector<1x16x288xf32>,
    %cst_33 = arith.constant 0.000000e+00 : f32
    %76 = vector.broadcast %cst_33 : f32 to vector<1x1x288xf32>
    %c0_34 = arith.constant 0 : index
    %c0_35 = arith.constant 0 : index
    %c0_36 = arith.constant 0 : index
    %77 = vector.load %arg17[%c0_34, %c0_35, %c0_36] : memref<1x18x288xf32, #tpu.memory_space<vmem>>, vector<1x1x288xf32>
    tpu.vector_store %arg17[%c0_34, %c0_35, %c0_36], %76 {strides = array<i32>} : memref<1x18x288xf32, #tpu.memory_space<vmem>>, vector<1x1x288xf32>,
    %c0_37 = arith.constant 0 : index
    %c17 = arith.constant 17 : index
    %c0_38 = arith.constant 0 : index
    %78 = vector.load %arg17[%c0_37, %c17, %c0_38] : memref<1x18x288xf32, #tpu.memory_space<vmem>>, vector<1x1x288xf32>
    tpu.vector_store %arg17[%c0_37, %c17, %c0_38], %76 {strides = array<i32>} : memref<1x18x288xf32, #tpu.memory_space<vmem>>, vector<1x1x288xf32>,
    %c0_39 = arith.constant 0 : index
    %c0_40 = arith.constant 0 : index
    %c0_41 = arith.constant 0 : index
    %79 = vector.load %arg17[%c0_39, %c0_40, %c0_41] : memref<1x18x288xf32, #tpu.memory_space<vmem>>, vector<1x18x288xf32>
    %80 = vector.extract_strided_slice %79 {offsets = [0, 0, 0], sizes = [1, 16, 256], strides = [1, 1, 1]} : vector<1x18x288xf32> to vector<1x16x256xf32>
    %81 = vector.extract_strided_slice %79 {offsets = [0, 0, 16], sizes = [1, 16, 256], strides = [1, 1, 1]} : vector<1x18x288xf32> to vector<1x16x256xf32>
    %82 = vector.extract_strided_slice %79 {offsets = [0, 0, 32], sizes = [1, 16, 256], strides = [1, 1, 1]} : vector<1x18x288xf32> to vector<1x16x256xf32>
    %83 = vector.extract_strided_slice %79 {offsets = [0, 1, 0], sizes = [1, 16, 256], strides = [1, 1, 1]} : vector<1x18x288xf32> to vector<1x16x256xf32>
    %84 = vector.extract_strided_slice %79 {offsets = [0, 1, 16], sizes = [1, 16, 256], strides = [1, 1, 1]} : vector<1x18x288xf32> to vector<1x16x256xf32>
    %85 = vector.extract_strided_slice %79 {offsets = [0, 1, 32], sizes = [1, 16, 256], strides = [1, 1, 1]} : vector<1x18x288xf32> to vector<1x16x256xf32>
    %86 = vector.extract_strided_slice %79 {offsets = [0, 2, 0], sizes = [1, 16, 256], strides = [1, 1, 1]} : vector<1x18x288xf32> to vector<1x16x256xf32>
    %87 = vector.extract_strided_slice %79 {offsets = [0, 2, 16], sizes = [1, 16, 256], strides = [1, 1, 1]} : vector<1x18x288xf32> to vector<1x16x256xf32>
    %88 = vector.extract_strided_slice %79 {offsets = [0, 2, 32], sizes = [1, 16, 256], strides = [1, 1, 1]} : vector<1x18x288xf32> to vector<1x16x256xf32>
    %89 = tpu.concatenate %80, %81, %82, %83, %84, %85, %86, %87, %88 in 2 : vector<1x16x256xf32>, vector<1x16x256xf32>, vector<1x16x256xf32>, vector<1x16x256xf32>, vector<1x16x256xf32>, vector<1x16x256xf32>, vector<1x16x256xf32>, vector<1x16x256xf32>, vector<1x16x256xf32> -> vector<1x16x2304xf32>
    %90 = vector.shape_cast %89 : vector<1x16x2304xf32> to vector<16x2304xf32>
    %c0_42 = arith.constant 0 : index
    %c0_43 = arith.constant 0 : index
    %91 = vector.load %arg5[%c0_42, %c0_43] : memref<2304x256xf32, #tpu.memory_space<vmem>>, vector<2304x256xf32>
    %cst_44 = arith.constant dense<0.000000e+00> : vector<16x256xf32>
    %92 = tpu.matmul %90, %91, %cst_44 {dimension_numbers = #tpu.dot_dimension_numbers<[1], [0], [0], [1], [0, 0, 1, 1], [], []>} : vector<16x2304xf32>, vector<2304x256xf32>, vector<16x256xf32> -> vector<16x256xf32>
    %c0_45 = arith.constant 0 : index
    %c0_46 = arith.constant 0 : index
    %93 = vector.load %arg6[%c0_45, %c0_46] : memref<1x256xf32, #tpu.memory_space<vmem>>, vector<1x256xf32>
    %94 = vector.broadcast %93 : vector<1x256xf32> to vector<16x256xf32>
    %95 = arith.addf %92, %94 : vector<16x256xf32>
    %96 = vector.shape_cast %95 : vector<16x256xf32> to vector<1x16x256xf32>
    %c0_47 = arith.constant 0 : index
    %c0_48 = arith.constant 0 : index
    %97 = vector.load %arg13[%c0_47, %c0_48] : memref<1x256xf32, #tpu.memory_space<vmem>>, vector<1x256xf32>
    %c0_49 = arith.constant 0 : index
    %c0_50 = arith.constant 0 : index
    %98 = vector.load %arg14[%c0_49, %c0_50] : memref<1x256xf32, #tpu.memory_space<vmem>>, vector<1x256xf32>
    %cst_51 = arith.constant dense<0.000000e+00> : vector<1x256xf32>
    %99 = vector.multi_reduction <add>, %96, %cst_51 [1] : vector<1x16x256xf32> to vector<1x256xf32>
    %cst_52 = arith.constant dense<0.000000e+00> : vector<1x256xf32>
    %100 = tpu.matmul %99, %1, %cst_52 {dimension_numbers = #tpu.dot_dimension_numbers<[1], [0], [0], [1], [0, 0, 1, 1], [], []>} : vector<1x256xf32>, vector<256x256xf32>, vector<1x256xf32> -> vector<1x256xf32>
    %cst_53 = arith.constant 0.001953125 : f32
    %101 = vector.broadcast %cst_53 : f32 to vector<1x256xf32>
    %102 = arith.mulf %100, %101 : vector<1x256xf32>
    %103 = vector.shape_cast %102 : vector<1x256xf32> to vector<1x1x256xf32>
    %104 = vector.broadcast %103 : vector<1x1x256xf32> to vector<1x16x256xf32>
    %105 = arith.subf %96, %104 : vector<1x16x256xf32>
    %106 = arith.mulf %105, %105 : vector<1x16x256xf32>
    %cst_54 = arith.constant dense<0.000000e+00> : vector<1x256xf32>
    %107 = vector.multi_reduction <add>, %106, %cst_54 [1] : vector<1x16x256xf32> to vector<1x256xf32>
    %cst_55 = arith.constant dense<0.000000e+00> : vector<1x256xf32>
    %108 = tpu.matmul %107, %1, %cst_55 {dimension_numbers = #tpu.dot_dimension_numbers<[1], [0], [0], [1], [0, 0, 1, 1], [], []>} : vector<1x256xf32>, vector<256x256xf32>, vector<1x256xf32> -> vector<1x256xf32>
    %cst_56 = arith.constant 0.001953125 : f32
    %109 = vector.broadcast %cst_56 : f32 to vector<1x256xf32>
    %110 = arith.mulf %108, %109 : vector<1x256xf32>
    %cst_57 = arith.constant 9.99999974E-6 : f32
    %111 = vector.broadcast %cst_57 : f32 to vector<1x256xf32>
    %112 = arith.addf %110, %111 : vector<1x256xf32>
    %113 = math.rsqrt %112 : vector<1x256xf32>
    %114 = vector.shape_cast %113 : vector<1x256xf32> to vector<1x1x256xf32>
    %115 = vector.broadcast %114 : vector<1x1x256xf32> to vector<1x16x256xf32>
    %116 = arith.mulf %105, %115 : vector<1x16x256xf32>
    %117 = vector.shape_cast %97 : vector<1x256xf32> to vector<1x1x256xf32>
    %118 = vector.broadcast %117 : vector<1x1x256xf32> to vector<1x16x256xf32>
    %119 = arith.mulf %116, %118 : vector<1x16x256xf32>
    %120 = vector.shape_cast %98 : vector<1x256xf32> to vector<1x1x256xf32>
    %121 = vector.broadcast %120 : vector<1x1x256xf32> to vector<1x16x256xf32>
    %122 = arith.addf %119, %121 : vector<1x16x256xf32>
    %cst_58 = arith.constant 0.000000e+00 : f32
    %123 = vector.broadcast %cst_58 : f32 to vector<1x16x256xf32>
    %124 = arith.maximumf %122, %123 : vector<1x16x256xf32>
    %125 = vector.extract_strided_slice %0 {offsets = [0, 1, 8], sizes = [1, 16, 128], strides = [1, 1, 1]} : vector<1x18x144xf32> to vector<1x16x128xf32>
    %126 = vector.shape_cast %125 : vector<1x16x128xf32> to vector<16x128xf32>
    %c0_59 = arith.constant 0 : index
    %c0_60 = arith.constant 0 : index
    %127 = vector.load %arg7[%c0_59, %c0_60] : memref<128x256xf32, #tpu.memory_space<vmem>>, vector<128x256xf32>
    %cst_61 = arith.constant dense<0.000000e+00> : vector<16x256xf32>
    %128 = tpu.matmul %126, %127, %cst_61 {dimension_numbers = #tpu.dot_dimension_numbers<[1], [0], [0], [1], [0, 0, 1, 1], [], []>} : vector<16x128xf32>, vector<128x256xf32>, vector<16x256xf32> -> vector<16x256xf32>
    %c0_62 = arith.constant 0 : index
    %c0_63 = arith.constant 0 : index
    %129 = vector.load %arg8[%c0_62, %c0_63] : memref<1x256xf32, #tpu.memory_space<vmem>>, vector<1x256xf32>
    %130 = vector.broadcast %129 : vector<1x256xf32> to vector<16x256xf32>
    %131 = arith.addf %128, %130 : vector<16x256xf32>
    %132 = vector.shape_cast %131 : vector<16x256xf32> to vector<1x16x256xf32>
    %133 = arith.addf %124, %132 : vector<1x16x256xf32>
    %c0_64 = arith.constant 0 : index
    %c0_65 = arith.constant 0 : index
    %c0_66 = arith.constant 0 : index
    %134 = vector.load %arg16[%c0_64, %c0_65, %c0_66] : memref<1x16x256xf32, #tpu.memory_space<vmem>>, vector<1x16x256xf32>
    tpu.vector_store %arg16[%c0_64, %c0_65, %c0_66], %133 {strides = array<i32>} : memref<1x16x256xf32, #tpu.memory_space<vmem>>, vector<1x16x256xf32>,
    return
  }
  func.func @transform_0(%arg0: i32) -> (i32, i32, i32) {
    %c0_i32 = arith.constant 0 : i32
    %c0_i32_0 = arith.constant 0 : i32
    %c0_i32_1 = arith.constant 0 : i32
    return %arg0, %c0_i32, %c0_i32_0 : i32, i32, i32
  }
  func.func @transform_1(%arg0: i32) -> (i32, i32, i32) {
    %c0_i32 = arith.constant 0 : i32
    %c0_i32_0 = arith.constant 0 : i32
    %c0_i32_1 = arith.constant 0 : i32
    return %arg0, %c0_i32, %c0_i32_0 : i32, i32, i32
  }
  func.func @transform_2(%arg0: i32) -> (i32, i32) {
    %c0_i32 = arith.constant 0 : i32
    %c0_i32_0 = arith.constant 0 : i32
    %c0_i32_1 = arith.constant 0 : i32
    return %c0_i32, %c0_i32_0 : i32, i32
  }
  func.func @transform_3(%arg0: i32) -> (i32, i32) {
    %c0_i32 = arith.constant 0 : i32
    %c0_i32_0 = arith.constant 0 : i32
    %c0_i32_1 = arith.constant 0 : i32
    return %c0_i32, %c0_i32_0 : i32, i32
  }
  func.func @transform_4(%arg0: i32) -> (i32, i32) {
    %c0_i32 = arith.constant 0 : i32
    %c0_i32_0 = arith.constant 0 : i32
    %c0_i32_1 = arith.constant 0 : i32
    return %c0_i32, %c0_i32_0 : i32, i32
  }
  func.func @transform_5(%arg0: i32) -> (i32, i32) {
    %c0_i32 = arith.constant 0 : i32
    %c0_i32_0 = arith.constant 0 : i32
    %c0_i32_1 = arith.constant 0 : i32
    return %c0_i32, %c0_i32_0 : i32, i32
  }
  func.func @transform_6(%arg0: i32) -> (i32, i32) {
    %c0_i32 = arith.constant 0 : i32
    %c0_i32_0 = arith.constant 0 : i32
    %c0_i32_1 = arith.constant 0 : i32
    return %c0_i32, %c0_i32_0 : i32, i32
  }
  func.func @transform_7(%arg0: i32) -> (i32, i32) {
    %c0_i32 = arith.constant 0 : i32
    %c0_i32_0 = arith.constant 0 : i32
    %c0_i32_1 = arith.constant 0 : i32
    return %c0_i32, %c0_i32_0 : i32, i32
  }
  func.func @transform_8(%arg0: i32) -> (i32, i32) {
    %c0_i32 = arith.constant 0 : i32
    %c0_i32_0 = arith.constant 0 : i32
    %c0_i32_1 = arith.constant 0 : i32
    return %c0_i32, %c0_i32_0 : i32, i32
  }
  func.func @transform_9(%arg0: i32) -> (i32, i32) {
    %c0_i32 = arith.constant 0 : i32
    %c0_i32_0 = arith.constant 0 : i32
    %c0_i32_1 = arith.constant 0 : i32
    return %c0_i32, %c0_i32_0 : i32, i32
  }
  func.func @transform_10(%arg0: i32) -> (i32, i32) {
    %c0_i32 = arith.constant 0 : i32
    %c0_i32_0 = arith.constant 0 : i32
    %c0_i32_1 = arith.constant 0 : i32
    return %c0_i32, %c0_i32_0 : i32, i32
  }
  func.func @transform_11(%arg0: i32) -> (i32, i32) {
    %c0_i32 = arith.constant 0 : i32
    %c0_i32_0 = arith.constant 0 : i32
    %c0_i32_1 = arith.constant 0 : i32
    return %c0_i32, %c0_i32_0 : i32, i32
  }
  func.func @transform_12(%arg0: i32) -> (i32, i32) {
    %c0_i32 = arith.constant 0 : i32
    %c0_i32_0 = arith.constant 0 : i32
    %c0_i32_1 = arith.constant 0 : i32
    return %c0_i32, %c0_i32_0 : i32, i32
  }
  func.func @transform_13(%arg0: i32) -> (i32, i32) {
    %c0_i32 = arith.constant 0 : i32
    %c0_i32_0 = arith.constant 0 : i32
    %c0_i32_1 = arith.constant 0 : i32
    return %c0_i32, %c0_i32_0 : i32, i32
  }
  func.func @transform_14(%arg0: i32) -> (i32, i32) {
    %c0_i32 = arith.constant 0 : i32
    %c0_i32_0 = arith.constant 0 : i32
    %c0_i32_1 = arith.constant 0 : i32
    return %c0_i32, %c0_i32_0 : i32, i32
  }
  func.func @transform_15(%arg0: i32) -> (i32, i32, i32) {
    %c0_i32 = arith.constant 0 : i32
    %c0_i32_0 = arith.constant 0 : i32
    %c0_i32_1 = arith.constant 0 : i32
    return %arg0, %c0_i32, %c0_i32_0 : i32, i32, i32
  }
}

</mosaic_0001>

<bundles_post_ra>
// kernel: tpu_custom_call.1
= control target key start
LH: loop header
LB: loop body
LE: loop exit
PB: predicated region body
PF: predicated region fallthrough
CT: control target
= control target key end

     0   :  { %s5900_s0 = inlined_call_operand.vmem [shape: f32[2,18,144], index: 0, kind: input, shape index: {}]   ;;  %s5901_s1 = inlined_call_operand.hbm [shape: f32[2,1,32], index: 1, kind: input, shape index: {}]   ;;  %s5902_s2 = inlined_call_operand.hbm [shape: f32[1152,256], index: 2, kind: input, shape index: {}]   ;;  %s5903_s3 = inlined_call_operand.hbm [shape: f32[1,256], index: 3, kind: input, shape index: {}]   ;;  %s5904_s4 = inlined_call_operand.hbm [shape: f32[2304,256], index: 4, kind: input, shape index: {}]   ;;  %s5905_s5 = inlined_call_operand.hbm [shape: f32[1,256], index: 5, kind: input, shape index: {}]   ;;  %s5906_s6 = inlined_call_operand.hbm [shape: f32[128,256], index: 6, kind: input, shape index: {}]   ;;  %s5907_s7 = inlined_call_operand.hbm [shape: f32[1,256], index: 7, kind: input, shape index: {}]   ;;  %s5908_s8 = inlined_call_operand.hbm [shape: f32[32,512], index: 8, kind: input, shape index: {}]   ;;  %s5909_s9 = inlined_call_operand.hbm [shape: f32[1,512], index: 9, kind: input, shape index: {}]   ;;  %s5910_s10 = inlined_call_operand.hbm [shape: f32[1,256], index: 10, kind: input, shape index: {}]   ;;  %s5911_s11 = inlined_call_operand.hbm [shape: f32[1,256], index: 11, kind: input, shape index: {}]   ;;  %s5912_s12 = inlined_call_operand.hbm [shape: f32[1,256], index: 12, kind: input, shape index: {}]   ;;  %s5913_s13 = inlined_call_operand.hbm [shape: f32[1,256], index: 13, kind: input, shape index: {}]   ;;  %s5914_s14 = inlined_call_operand.hbm [shape: f32[256,256], index: 14, kind: input, shape index: {}]   ;;  %s5915_s15 = inlined_call_operand.hbm [shape: f32[2,16,256], index: 15, kind: output, shape index: {}]  }
   0x1   :  { %5923 = sst [smem:[#allocation36_spill]] %s5900_s0 }
   0x2   :  { %5924 = sst [smem:[#allocation37_spill]] %s5902_s2 }
   0x3   :  { %5925 = sst [smem:[#allocation38_spill]] %s5903_s3 }
   0x4   :  { %5926 = sst [smem:[#allocation39_spill]] %s5904_s4 }
   0x5   :  { %5927 = sst [smem:[#allocation40_spill]] %s5905_s5 }
   0x6   :  { %5928 = sst [smem:[#allocation41_spill]] %s5906_s6 }
   0x7   :  { %5929 = sst [smem:[#allocation42_spill]] %s5907_s7 }
   0x8   :  { %5930 = sst [smem:[#allocation43_spill]] %s5908_s8 }
   0x9   :  { %5931 = sst [smem:[#allocation44_spill]] %s5909_s9 }
   0xa   :  { %5932 = sst [smem:[#allocation45_spill]] %s5915_s15 }
   0xb   :  { %20 = vsyncpa [#allocation4], 0 }
   0xc   :  { %22 = vsyncpa [#allocation4 + $0x1], 0 }
   0xd   :  { %23 = vsyncpa [#allocation7], 0 }
   0xe   :  { %24 = vsyncpa [#allocation10], 0 }
   0xf   :  { %25 = vsyncpa [#allocation13], 0 }
  0x10   :  { %26 = vsyncpa [#allocation16], 0 }
  0x11   :  { %27 = vsyncpa [#allocation19], 0 }
  0x12   :  { %28 = vsyncpa [#allocation22], 0 }
  0x13   :  { %29 = vsyncpa [#allocation25], 0 }
  0x14   :  { %30 = vsyncpa [#allocation5], 0 }
  0x15   :  { %32 = vsyncpa [#allocation5 + $0x1], 0  ;;  %s5182_s18 = smov 0   ;;  %s5184_s19 = smov 0  }
  0x16   :  { %s5186_s20 = smov 0   ;;  %s5188_s21 = smov 0  }
  0x17 LB: > { %s5077_s22 = smov [#allocation6]   ;;  %s5203_s24 = sadd.s32 4294967295, %s5075_s21   ;;  %s5075_s21 = sphi %s5188_s21, %s5975_s21   ;;  %s5071_s20 = sphi %s5186_s20, %s5974_s20   ;;  %s5067_s19 = sphi %s5184_s19, %s5973_s19   ;;  %s5063_s18 = sphi %s5182_s18, %s5972_s18  }
  0x18   : > { %s406_s23 = sshll.u32 %s5077_s22, 4  ;;  %p4161_p0 = scmp.ge.s32.totalorder %s5075_s21, 1  ;;  %s407_s23 = int_to_ptr.vmem [resolvable:$true] %s406_s23 }
  0x19   : > { %p5919_p1 = scmp.eq.s32.totalorder %s5203_s24, 0  ;;  %p394_p2 = scmp.lt.s32.totalorder %s5075_s21, 3 }
  0x1a   : > { %s5078_s26 = smov [#allocation9]   ;;  %s5079_s29 = smov [#allocation12]  }
  0x1b   : > { %p5208_p3 = pnand %p4161_p0, %p394_p2  ;;  %s430_s27 = sshll.u32 %s5078_s26, 4  ;;  %s5221_s27 = int_to_ptr.vmem [resolvable:$true] %s430_s27 }
  0x1c   : > { %s454_s30 = sshll.u32 %s5079_s29, 4  ;;  %s4628_s17 = scalar_lea.vmem %s407_s23, 36864  ;;  %s5223_s30 = int_to_ptr.vmem [resolvable:$true] %s454_s30 }
  0x1d   : > { %s5933_s25 = scalar_select %p5208_p3, 1, 0 }
  0x1e   : > { %p4263_p5 = pneg %p5208_p3  ;;  %p4629_p8 = scmp.ne.s32.totalorder %s407_s23, %s4628_s17 }
  0x1f   : > { %p4636_p11 = scmp.lt.s32.totalorder %s407_s23, %s407_s23  ;;  %p4637_p12 = scmp.lt.s32.totalorder %s4628_s17, %s4628_s17 }
  0x20   : > { %p5217_p6 = pnand %p4263_p5, %p5919_p1 }
  0x21   : > { %p4638_p13 = por %p4637_p12, %p4636_p11 }
  0x22   : > { %p5227_p7 = pneg %p5217_p6 }
  0x24   : > { %p4631_p9 = pnand %p4629_p8, %p5227_p7 }
  0x26   : > { %p4632_p10 = pneg %p4631_p9 }
  0x28   : > { %p4639_p0 = pnand %p4638_p13, %p4632_p10 }
  0x2a   : > { %4642 = shalt.err (!%p4639_p0)
}
  0x2b   : > { %s5917_s22 = smov 256   ;;  %s5918_s26 = smov 16  }
  0x2c   : > { %s5936_s2 = sld [smem:[#allocation37_spill]]  ;;  %s4654_s0 = scalar_lea.vmem %s5221_s27, 73728 }
  0x2d   : > { %p4655_p2 = scmp.ne.s32.totalorder %s5221_s27, %s4654_s0  ;;  %p4662_p9 = scmp.lt.s32.totalorder %s5221_s27, %s5221_s27 }
  0x2e   : > { %p4663_p10 = scmp.lt.s32.totalorder %s4654_s0, %s4654_s0 }
  0x2f   : > { %p4657_p5 = pnand %p4655_p2, %p5227_p7 }
  0x30   : > { %p4664_p11 = por %p4663_p10, %p4662_p9 }
  0x31   : > { %p4658_p8 = pneg %p4657_p5 }
  0x32   : > { %4266 = dma.hbm_to_vmem [thread:$0]  (!%p5217_p6), %s5936_s2, 36864, %s407_s23, [#allocation7], %s5917_s22, %s5917_s22, %s5918_s26  }
  0x33   : > { %p4665_p12 = pnand %p4664_p11, %p4658_p8 }
  0x35   : > { %4668 = shalt.err (!%p4665_p12)
}
  0x36   : > { %s5937_s4 = sld [smem:[#allocation39_spill]]  ;;  %s4680_s23 = scalar_lea.vmem %s5223_s30, 4096 }
  0x37   : > { %p4681_p13 = scmp.ne.s32.totalorder %s5223_s30, %s4680_s23  ;;  %p4688_p5 = scmp.lt.s32.totalorder %s5223_s30, %s5223_s30 }
  0x38   : > { %p4689_p8 = scmp.lt.s32.totalorder %s4680_s23, %s4680_s23 }
  0x39   : > { %p4683_p0 = pnand %p4681_p13, %p5227_p7 }
  0x3a   : > { %p4690_p9 = por %p4689_p8, %p4688_p5 }
  0x3b   : > { %p4684_p2 = pneg %p4683_p0 }
  0x3c   : > { %4272 = dma.hbm_to_vmem [thread:$0]  (!%p5217_p6), %s5937_s4, 73728, %s5221_s27, [#allocation10], %s5917_s22, %s5917_s22, %s5918_s26  }
  0x3d   : > { %p4691_p10 = pnand %p4690_p9, %p4684_p2 }
  0x3f   : > { %4694 = shalt.err (!%p4691_p10)
}
  0x40   : > { %s5938_s6 = sld [smem:[#allocation41_spill]]  ;;  %s5082_s27 = smov [#allocation15]  }
  0x41   : > { %s478_s17 = sshll.u32 %s5082_s27, 4  ;;  %s479_s17 = int_to_ptr.vmem [resolvable:$true] %s478_s17 }
  0x42   : > { %s4706_s15 = scalar_lea.vmem %s479_s17, 2048  ;;  %p4714_p0 = scmp.lt.s32.totalorder %s479_s17, %s479_s17 }
  0x43   : > { %p4707_p11 = scmp.ne.s32.totalorder %s479_s17, %s4706_s15  ;;  %p4715_p2 = scmp.lt.s32.totalorder %s4706_s15, %s4706_s15 }
  0x45   : > { %p4709_p12 = pnand %p4707_p11, %p5227_p7  ;;  %p4716_p5 = por %p4715_p2, %p4714_p0 }
  0x46   : > { %4278 = dma.hbm_to_vmem [thread:$0]  (!%p5217_p6), %s5938_s6, 4096, %s5223_s30, [#allocation13], %s5917_s22, %s5917_s22, %s5918_s26  }
  0x47   : > { %p4710_p13 = pneg %p4709_p12 }
  0x49   : > { %p4717_p8 = pnand %p4716_p5, %p4710_p13 }
  0x4b   : > { %4720 = shalt.err (!%p4717_p8)
}
  0x4c   : > { %s5083_s23 = smov 512   ;;  %s5084_s2 = smov 32  }
  0x4d   : > { %s5939_s8 = sld [smem:[#allocation43_spill]]  ;;  %s5085_s29 = smov [#allocation18]  }
  0x4e   : > { %s503_s27 = sshll.u32 %s5085_s29, 4  ;;  %s5086_s22 = smov [#allocation21]   ;;  %s504_s27 = int_to_ptr.vmem [resolvable:$true] %s503_s27 }
  0x4f   : > { %s525_s26 = sshll.u32 %s5086_s22, 4  ;;  %s4732_s4 = scalar_lea.vmem %s504_s27, 32  ;;  %s526_s26 = int_to_ptr.vmem [resolvable:$true] %s525_s26 }
  0x50   : > { %p4733_p9 = scmp.ne.s32.totalorder %s504_s27, %s4732_s4  ;;  %p4740_p12 = scmp.lt.s32.totalorder %s504_s27, %s504_s27 }
  0x51   : > { %p4741_p13 = scmp.lt.s32.totalorder %s4732_s4, %s4732_s4 }
  0x52   : > { %p4735_p10 = pnand %p4733_p9, %p5227_p7 }
  0x53   : > { %4284 = dma.hbm_to_vmem [thread:$0]  (!%p5217_p6), %s5939_s8, 2048, %s479_s17, [#allocation16], %s5083_s23, %s5083_s23, %s5084_s2  }
  0x54   : > { %p4736_p11 = pneg %p4735_p10  ;;  %p4742_p0 = por %p4741_p13, %p4740_p12 }
  0x56   : > { %p4743_p2 = pnand %p4742_p0, %p4736_p11 }
  0x58   : > { %4746 = shalt.err (!%p4743_p2)
}
  0x59   : > { %4290 = dma.hbm_to_vmem [thread:$0]  (!%p5217_p6), %s5910_s10, 32, %s504_s27, [#allocation19]  }
  0x5a   : > { %s4758_s22 = scalar_lea.vmem %s526_s26, 32  ;;  %p4766_p1 = scmp.lt.s32.totalorder %s526_s26, %s526_s26 }
  0x5b   : > { %p4759_p5 = scmp.ne.s32.totalorder %s526_s26, %s4758_s22  ;;  %p4767_p9 = scmp.lt.s32.totalorder %s4758_s22, %s4758_s22 }
  0x5d   : > { %p4761_p8 = pnand %p4759_p5, %p5227_p7  ;;  %p4768_p10 = por %p4767_p9, %p4766_p1 }
  0x5f   : > { %p4762_p4 = pneg %p4761_p8 }
  0x61   : > { %p4769_p3 = pnand %p4768_p10, %p4762_p4 }
  0x63   : > { %4772 = shalt.err (!%p4769_p3)
}
  0x64   : > { %4296 = dma.hbm_to_vmem [thread:$0]  (!%p5217_p6), %s5912_s12, 32, %s526_s26, [#allocation22]  }
  0x65   : > { %s5087_s23 = smov [#allocation8]   ;;  %s5088_s30 = smov [#allocation11]  }
  0x66   : > { %s420_s0 = sshll.u32 %s5087_s23, 4  ;;  %s444_s29 = sshll.u32 %s5088_s30, 4  ;;  %s421_s0 = int_to_ptr.vmem [resolvable:$true] %s420_s0  ;;  %s445_s29 = int_to_ptr.vmem [resolvable:$true] %s444_s29 }
  0x67   : > { %s4784_s27 = scalar_lea.vmem %s421_s0, 32  ;;  %p4792_p4 = scmp.lt.s32.totalorder %s421_s0, %s421_s0 }
  0x68   : > { %p4785_p11 = scmp.ne.s32.totalorder %s421_s0, %s4784_s27  ;;  %p4793_p3 = scmp.lt.s32.totalorder %s4784_s27, %s4784_s27 }
  0x6a   : > { %p4787_p12 = pnand %p4785_p11, %p5227_p7  ;;  %p4794_p13 = por %p4793_p3, %p4792_p4 }
  0x6c   : > { %p4788_p1 = pneg %p4787_p12 }
  0x6e   : > { %p4795_p0 = pnand %p4794_p13, %p4788_p1 }
  0x70   : > { %4798 = shalt.err (!%p4795_p0)
}
  0x71   : > { %s5940_s3 = sld [smem:[#allocation38_spill]]  ;;  %s4810_s2 = scalar_lea.vmem %s445_s29, 32 }
  0x72   : > { %p4811_p2 = scmp.ne.s32.totalorder %s445_s29, %s4810_s2  ;;  %p4818_p9 = scmp.lt.s32.totalorder %s445_s29, %s445_s29 }
  0x73   : > { %p4819_p10 = scmp.lt.s32.totalorder %s4810_s2, %s4810_s2 }
  0x74   : > { %p4813_p5 = pnand %p4811_p2, %p5227_p7 }
  0x75   : > { %p4820_p11 = por %p4819_p10, %p4818_p9 }
  0x76   : > { %p4814_p8 = pneg %p4813_p5 }
  0x77   : > { %4269 = dma.hbm_to_vmem [thread:$0]  (!%p5217_p6), %s5940_s3, 32, %s421_s0, [#allocation7]  }
  0x78   : > { %p4821_p12 = pnand %p4820_p11, %p4814_p8 }
  0x7a   : > { %4824 = shalt.err (!%p4821_p12)
}
  0x7b   : > { %s5941_s5 = sld [smem:[#allocation40_spill]]  ;;  %s5089_s17 = smov [#allocation14]  }
  0x7c   : > { %s468_s23 = sshll.u32 %s5089_s17, 4  ;;  %s5090_s0 = smov [#allocation17]   ;;  %s469_s23 = int_to_ptr.vmem [resolvable:$true] %s468_s23 }
  0x7d   : > { %s492_s30 = sshll.u32 %s5090_s0, 4  ;;  %s4836_s27 = scalar_lea.vmem %s469_s23, 32  ;;  %s493_s30 = int_to_ptr.vmem [resolvable:$true] %s492_s30 }
  0x7e   : > { %p4837_p1 = scmp.ne.s32.totalorder %s469_s23, %s4836_s27  ;;  %p4844_p13 = scmp.lt.s32.totalorder %s469_s23, %s469_s23 }
  0x7f   : > { %p4845_p0 = scmp.lt.s32.totalorder %s4836_s27, %s4836_s27 }
  0x80   : > { %p4839_p4 = pnand %p4837_p1, %p5227_p7 }
  0x81   : > { %4275 = dma.hbm_to_vmem [thread:$0]  (!%p5217_p6), %s5941_s5, 32, %s445_s29, [#allocation10]  }
  0x82   : > { %p4840_p3 = pneg %p4839_p4  ;;  %p4846_p2 = por %p4845_p0, %p4844_p13 }
  0x84   : > { %p4847_p5 = pnand %p4846_p2, %p4840_p3 }
  0x86   : > { %4850 = shalt.err (!%p4847_p5)
}
  0x87   : > { %s5942_s7 = sld [smem:[#allocation42_spill]]  ;;  %s4862_s26 = scalar_lea.vmem %s493_s30, 64 }
  0x88   : > { %p4863_p8 = scmp.ne.s32.totalorder %s493_s30, %s4862_s26  ;;  %p4870_p11 = scmp.lt.s32.totalorder %s493_s30, %s493_s30 }
  0x89   : > { %p4871_p12 = scmp.lt.s32.totalorder %s4862_s26, %s4862_s26 }
  0x8a   : > { %p4865_p9 = pnand %p4863_p8, %p5227_p7 }
  0x8b   : > { %p4872_p1 = por %p4871_p12, %p4870_p11 }
  0x8c   : > { %p4866_p10 = pneg %p4865_p9 }
  0x8d   : > { %4281 = dma.hbm_to_vmem [thread:$0]  (!%p5217_p6), %s5942_s7, 32, %s469_s23, [#allocation13]  }
  0x8e   : > { %p4873_p4 = pnand %p4872_p1, %p4866_p10 }
  0x90   : > { %4876 = shalt.err (!%p4873_p4)
}
  0x91   : > { %s5943_s9 = sld [smem:[#allocation44_spill]]  ;;  %s5091_s4 = smov [#allocation20]  }
  0x92   : > { %s514_s17 = sshll.u32 %s5091_s4, 4  ;;  %s5092_s23 = smov [#allocation23]   ;;  %s515_s17 = int_to_ptr.vmem [resolvable:$true] %s514_s17 }
  0x93   : > { %s536_s0 = sshll.u32 %s5092_s23, 4  ;;  %s4888_s27 = scalar_lea.vmem %s515_s17, 32  ;;  %s537_s0 = int_to_ptr.vmem [resolvable:$true] %s536_s0 }
  0x94   : > { %p4889_p3 = scmp.ne.s32.totalorder %s515_s17, %s4888_s27  ;;  %p4896_p2 = scmp.lt.s32.totalorder %s515_s17, %s515_s17 }
  0x95   : > { %p4897_p5 = scmp.lt.s32.totalorder %s4888_s27, %s4888_s27 }
  0x96   : > { %p4891_p13 = pnand %p4889_p3, %p5227_p7 }
  0x97   : > { %4287 = dma.hbm_to_vmem [thread:$0]  (!%p5217_p6), %s5943_s9, 64, %s493_s30, [#allocation16]  }
  0x98   : > { %p4892_p0 = pneg %p4891_p13  ;;  %p4898_p8 = por %p4897_p5, %p4896_p2 }
  0x9a   : > { %p4899_p9 = pnand %p4898_p8, %p4892_p0 }
  0x9c   : > { %4902 = shalt.err (!%p4899_p9)
}
  0x9d   : > { %4293 = dma.hbm_to_vmem [thread:$0]  (!%p5217_p6), %s5911_s11, 32, %s515_s17, [#allocation19]  }
  0x9e   : > { %s4914_s29 = scalar_lea.vmem %s537_s0, 32  ;;  %p4922_p1 = scmp.lt.s32.totalorder %s537_s0, %s537_s0 }
  0x9f   : > { %p4915_p10 = scmp.ne.s32.totalorder %s537_s0, %s4914_s29  ;;  %p4923_p4 = scmp.lt.s32.totalorder %s4914_s29, %s4914_s29 }
  0xa1   : > { %p4917_p11 = pnand %p4915_p10, %p5227_p7  ;;  %p4924_p3 = por %p4923_p4, %p4922_p1 }
  0xa3   : > { %p4918_p12 = pneg %p4917_p11 }
  0xa5   : > { %p4925_p13 = pnand %p4924_p3, %p4918_p12 }
  0xa7   : > { %4928 = shalt.err (!%p4925_p13)
}
  0xa8   : > { %4299 = dma.hbm_to_vmem [thread:$0]  (!%p5217_p6), %s5913_s13, 32, %s537_s0, [#allocation22]  }
  0xa9   : > { %s5093_s22 = smov [#allocation24]  }
  0xaa   : > { %s546_s4 = sshll.u32 %s5093_s22, 4  ;;  %s547_s4 = int_to_ptr.vmem [resolvable:$true] %s546_s4 }
  0xab   : > { %s4940_s17 = scalar_lea.vmem %s547_s4, 8192  ;;  %p4948_p8 = scmp.lt.s32.totalorder %s547_s4, %s547_s4 }
  0xac   : > { %p4941_p0 = scmp.ne.s32.totalorder %s547_s4, %s4940_s17  ;;  %p4949_p9 = scmp.lt.s32.totalorder %s4940_s17, %s4940_s17 }
  0xae   : > { %p4943_p2 = pnand %p4941_p0, %p5227_p7  ;;  %p4950_p10 = por %p4949_p9, %p4948_p8 }
  0xb0   : > { %p4944_p5 = pneg %p4943_p2 }
  0xb2   : > { %p4951_p11 = pnand %p4950_p10, %p4944_p5 }
  0xb4   : > { %4954 = shalt.err (!%p4951_p11)
}
  0xb5   : > { %s5944_s23 = smov 16   ;;  %s5945_s27 = smov 256  }
  0xb6   : > { %4302 = dma.hbm_to_vmem [thread:$0]  (!%p5217_p6), %s5914_s14, 8192, %s547_s4, [#allocation25], %s5945_s27, %s5945_s27, %s5944_s23  }
  0xb7   : > { %s4160_s28 = sadd.s32 4294967294, %s5075_s21   ;;  %s5346_s16 = sadd.s32 1, %s5075_s21  }
  0xb8   : > { %s71_s30 = sadd.s32 1, %s5071_s20  ;;  %s68_s29 = ssub.s32 %s5075_s21, %s5346_s16 }
  0xb9   : > { %p78_p7 = scmp.ne.s32.totalorder %s5071_s20, %s5067_s19  ;;  %p69_p12 = scmp.eq.s32.totalorder %s68_s29, 0 }
  0xba   : > { %p79_p1 = scmp.eq.s32.totalorder %s5075_s21, 0  ;;  %p84_p4 = scmp.ne.s32.totalorder %s5067_s19, %s5063_s18 }
  0xbb   : > { %p381_p3 = scmp.eq.s32.totalorder %s5203_s24, 1  ;;  %p5946_p0 = scmp.eq.s32.totalorder %s5203_s24, 0 }
  0xbc   : > { %s5358_s26 = scalar_select %p69_p12, %s5071_s20, %s71_s30  }
  0xbd   : > { %p80_p13 = por %p79_p1, %p78_p7  ;;  %p5362_p2 = por %p5946_p0, %p84_p4 }
  0xbe   : > { %p5366_p6 = por %p381_p3, %p78_p7  ;;  %p387_p5 = scmp.eq.s32.totalorder %s4160_s28, 1 }
  0xbf   : > { %s5947_s2 = scalar_select %p5362_p2, 1, 0 }
  0xc0   : > { %s5948_s22 = scalar_select %p5366_p6, 1, 0 }
  0xc1   : > { %p4324_p8 = scmp.lt.s32.totalorder %s5075_s21, 2  ;;  %s568_s4 = sand.u32 1, %s5071_s20  }
  0xc2   : > { %p5372_p9 = por %p387_p5, %p84_p4  ;;  %s4176_s23 = sshll.u32 %s5075_s21, 4 }
  0xc3   : > { %s5380_s0 = scalar_lea.hbm %s5901_s1, %s4176_s23  ;;  %s571_s30 = scalar_lea.vmem [#allocation3], %s568_s4 }
  0xc4   : > { %s5949_s17 = scalar_select %p5372_p9, 1, 0 }
  0xc5   : > { %s578_s29 = sshll.u32 %s571_s30, 4  ;;  %p5382_p10 = pnand %p4324_p8, %p80_p13  ;;  %s579_s29 = int_to_ptr.vmem [resolvable:$true] %s578_s29 }
  0xc6   : > { %s569_s3 = scalar_lea.sflag [#allocation4], %s568_s4  ;;  %s4955_s5 = scalar_lea.hbm %s5380_s0, 16 }
  0xc7   : > { %p4956_p11 = scmp.ne.s32.totalorder %s5380_s0, %s4955_s5  ;;  %p4957_p7 = pneg %p5382_p10 }
  0xc8   : > { %s4960_s15 = scalar_lea.hbm %s5901_s1, 32  ;;  %p4961_p4 = scmp.lt.s32.totalorder %s5380_s0, %s5901_s1 }
  0xc9   : > { %p4958_p12 = pnand %p4957_p7, %p4956_p11  ;;  %p4962_p3 = scmp.lt.s32.totalorder %s4960_s15, %s4955_s5 }
  0xcb   : > { %p4959_p1 = pneg %p4958_p12  ;;  %p4963_p13 = por %p4962_p3, %p4961_p4 }
  0xcd   : > { %p4964_p0 = pnand %p4963_p13, %p4959_p1 }
  0xcf   : > { %4967 = shalt.err (!%p4964_p0)
}
  0xd0   : > { %s4968_s30 = scalar_lea.vmem %s579_s29, 16  ;;  %s5094_s4 = smov [#allocation3]  }
  0xd1   : > { %p4969_p5 = scmp.ne.s32.totalorder %s579_s29, %s4968_s30  ;;  %s4973_s8 = sshll.u32 %s5094_s4, 4  ;;  %s4974_s8 = int_to_ptr.vmem [resolvable:$false] %s4973_s8 }
  0xd2   : > { %s4975_s9 = scalar_lea.vmem %s4974_s8, 32  ;;  %p4976_p11 = scmp.lt.s32.totalorder %s579_s29, %s4974_s8 }
  0xd3   : > { %p4971_p8 = pnand %p4969_p5, %p4957_p7  ;;  %p4977_p12 = scmp.lt.s32.totalorder %s4975_s9, %s4968_s30 }
  0xd5   : > { %p4972_p9 = pneg %p4971_p8  ;;  %p4978_p6 = por %p4977_p12, %p4976_p11 }
  0xd7   : > { %p4979_p2 = pnand %p4978_p6, %p4972_p9 }
  0xd9   : > { %4982 = shalt.err (!%p4979_p2)
}
  0xda   : > { %4306 = dma.hbm_to_vmem [thread:$0]  (!%p5382_p10), %s5380_s0, 16, %s579_s29, %s569_s3  }
  0xdb   : > { %p5951_p1 = scmp.ne.s32.totalorder %s5933_s25, 0 }
  0xdc   : > { %s5403_s5 = sand.u32 (!%p5951_p1), 1, %s5067_s19   ;;  %p5952_p7 = scmp.ne.s32.totalorder (!%p5951_p1), %s5947_s2, 0 }
  0xdd   : > { %587 = sbr.rel (%p5951_p1) target bundleno = 2298 (0x8fa), region = 80  ;;  %s590_s6 = scalar_lea.sflag (!%p5951_p1), [#allocation4], %s5403_s5 }
  0xde   : > { %s592_s7 = scalar_lea.vmem (!%p5951_p1), [#allocation3], %s5403_s5 }
  0xe2   : > { %5026 = dma.done.wait (%p5952_p7), %s590_s6, 16  }
  0xe3   : > { %5028 = vsyncadd (%p5952_p7), %s590_s6, 4294967280  ;;  %p5953_p2 = scmp.eq.s32.totalorder %s5203_s24, 0 }
  0xe5   : > { %5030 = dma.done.wait (%p5953_p2), [#allocation7], 36896   ;;  %p5954_p6 = pmov %p5953_p2 }
  0xe6   : > { %p5955_p9 = pmov %p5953_p2 }
  0xe7   : > { %5032 = vsyncadd (%p5954_p6), [#allocation7], 4294930400 }
  0xe8   : > { %5034 = dma.done.wait (%p5955_p9), [#allocation10], 73760   ;;  %p5956_p10 = pmov %p5953_p2 }
  0xe9   : > { %p5957_p4 = pmov %p5953_p2 }
  0xea   : > { %5036 = vsyncadd (%p5956_p10), [#allocation10], 4294893536 }
  0xeb   : > { %5038 = dma.done.wait (%p5957_p4), [#allocation13], 4128   ;;  %p5958_p3 = pmov %p5953_p2 }
  0xec   : > { %p5959_p13 = pmov %p5953_p2 }
  0xed   : > { %5040 = vsyncadd (%p5958_p3), [#allocation13], 4294963168 }
  0xee   : > { %5042 = dma.done.wait (%p5959_p13), [#allocation16], 2112   ;;  %p5960_p0 = pmov %p5953_p2 }
  0xf0   : > { %5044 = vsyncadd (%p5960_p0), [#allocation16], 4294965184  ;;  %p5961_p5 = pmov %p5960_p0 }
  0xf1   : > { %p5962_p8 = pmov %p5960_p0 }
  0xf2   : > { %5046 = dma.done.wait (%p5961_p5), [#allocation19], 64  }
  0xf3   : > { %5048 = vsyncadd (%p5962_p8), [#allocation19], 4294967232  ;;  %p5963_p11 = pmov %p5960_p0 }
  0xf4   : > { %p5964_p12 = pmov %p5960_p0 }
  0xf5   : > { %5050 = dma.done.wait (%p5963_p11), [#allocation22], 64  }
  0xf6   : > { %5052 = vsyncadd (%p5964_p12), [#allocation22], 4294967232  ;;  %p5965_p1 = pmov %p5960_p0 }
  0xf7   : > { %p5966_p7 = pmov %p5960_p0 }
  0xf8   : > { %5054 = dma.done.wait (%p5965_p1), [#allocation25], 8192  }
  0xf9   : > { %5056 = vsyncadd (%p5966_p7), [#allocation25], 4294959104  ;;  %p695_p2 = scmp.lt.s32.totalorder %s5203_s24, 1  ;;  %s5967_s2 = sld [smem:[#allocation36_spill]]  ;;  %vm801_vm0 = vcmask 1046528   ;;  %v907_v5 = vld [vmem:[#allocation6 + $0xf8] sm:$0xff] }
  0xfa   : > { %v906_v6 = vld [vmem:[#allocation6 + $0xf0] sm:$0xff]  ;;  %1176 = vmatprep.subr.mxu0 %v907_v5  ;;  %v905_v10 = vld [vmem:[#allocation6 + $0xe8] sm:$0xff]  ;;  %v904_v11 = vld [vmem:[#allocation6 + $0xe0] sm:$0xff]  ;;  %s5095_s29 = smov 120   ;;  %s5096_s28 = smov 112   ;;  %vm839_vm1 = vcmask 1045504  }
  0xfb   : > { %s696_s3 = scalar_select %p695_p2, %s5203_s24, 1  ;;  %v971_v12 = vld [vmem:[#allocation6 + $0x2f8] sm:$0xff]  ;;  %1177 = vmatpush1.msra.mxu0 %v906_v6  ;;  %v970_v17 = vld [vmem:[#allocation6 + $0x2f0] sm:$0xff]  ;;  %v969_v21 = vld [vmem:[#allocation6 + $0x2e8] sm:$0xff]  ;;  %vm782_vm3 = vcmask 982016   ;;  %vm795_vm4 = vcmask 916480  }
  0xfc   : > { %v903_v16 = vld [vmem:[#allocation6 + $0xd8] sm:$0xff]  ;;  %1178 = vmatprep.subr.mxu0 %v905_v10  ;;  %v902_v19 = vld [vmem:[#allocation6 + $0xd0] sm:$0xff]  ;;  %1253 = vmatprep.subr.mxu1 %v971_v12  ;;  %v901_v22 = vld [vmem:[#allocation6 + $0xc8] sm:$0xff]  ;;  %vm1845_vm5 = vcmask 261120   ;;  %s5098_s23 = smov 16   ;;  %vm2057_vm6 = vcmask 130048  }
  0xfd   : > { %s4206_s8 = smul.u32 48, %s696_s3  ;;  %1179 = vmatpush1.msra.mxu0 %v904_v11  ;;  %1254 = vmatpush1.msra.mxu1 %v970_v17  ;;  %v968_v23 = vld [vmem:[#allocation6 + $0x2e0] sm:$0xff]  ;;  %v967_v27 = vld [vmem:[#allocation6 + $0x2d8] sm:$0xff]  ;;  %v966_v35 = vld [vmem:[#allocation6 + $0x2d0] sm:$0xff]  ;;  %vm2093_vm7 = vcmask 261121   ;;  %vm2072_vm8 = vcmask 1040384  }
  0xfe   : > { %1180 = vmatprep.subr.mxu0 %v903_v16  ;;  %v900_v26 = vld [vmem:[#allocation6 + $0xc0] sm:$0xff]  ;;  %1255 = vmatprep.subr.mxu1 %v969_v21  ;;  %v899_v30 = vld [vmem:[#allocation6 + $0xb8] sm:$0xff]  ;;  %v898_v38 = vld [vmem:[#allocation6 + $0xb0] sm:$0xff]  ;;  %vm2100_vm9 = vcmask 253952   ;;  %s5099_s27 = smov 96   ;;  %vm2158_vm10 = vcmask 785408  }
  0xff   : > { %s5444_s0 = scalar_lea.vmem %s5967_s2, %s4206_s8  ;;  %1181 = vmatpush1.msra.mxu0 %v902_v19  ;;  %1256 = vmatpush1.msra.mxu1 %v968_v23  ;;  %v965_v39 = vld [vmem:[#allocation6 + $0x2c8] sm:$0xff]  ;;  %v964_v42 = vld [vmem:[#allocation6 + $0x2c0] sm:$0xff]  ;;  %v963_v48 = vld [vmem:[#allocation6 + $0x2b8] sm:$0xff]  ;;  %s4191_s15 = sshll.u32 %s5403_s5, 5 }
 0x100   : > { %v5447_v0 = vld [vmem:[%s5444_s0] sm:$0xff]  ;;  %v5450_v1 = vld [vmem:[%s5444_s0 + $0x8] sm:$0xff]  ;;  %v5453_v2 = vld [vmem:[%s5444_s0 + $0x10] sm:$0xff]  ;;  %1182 = vmatprep.subr.mxu0 %v901_v22  ;;  %1257 = vmatprep.subr.mxu1 %v967_v27  ;;  %s4205_s30 = sshll.u32 %s5203_s24, 9  ;;  %s694_s4 = scalar_lea.vmem [#allocation26], %s4191_s15 }
 0x101   : > { %v4394_v3 = vpack.i.bf16 %v5450_v1, %v5447_v0  ;;  %v5458_v4 = vld [vmem:[%s5444_s0 + $0x18] sm:$0xff]  ;;  %v802_v7 = vrot.slane %v5447_v0, 1  ;;  %v803_v8 = vrot.slane %v5453_v2, 1  ;;  %v810_v13 = vrot.slane %v5450_v1, 1  ;;  %v704_v24 = vld [vmem:[%s5444_s0 + $0x20] sm:$0x3]  ;;  %1183 = vmatpush1.msra.mxu0 %v900_v26  ;;  %1258 = vmatpush1.msra.mxu1 %v966_v35 }
 0x102   : > { %v4404_v9 = vpack.i.bf16 %v5458_v4, %v5453_v2  ;;  %v811_v14 = vrot.slane %v5458_v4, 1  ;;  %v705_v25 = vld [vmem:[%s5444_s0 + $0x28] sm:$0x3]  ;;  %v805_v28 = vrot.slane %v704_v24, 1  ;;  %v840_v31 = vrot.slane %v5447_v0, 2  ;;  %1184 = vmatprep.subr.mxu0 %v899_v30  ;;  %v897_v41 = vld [vmem:[#allocation6 + $0xa8] sm:$0xff]  ;;  %1259 = vmatprep.subr.mxu1 %v965_v39 }
 0x103   : > { %4395 = vrot.lane.b32.xlu0 %v4394_v3, %s5095_s29  ;;  %v5468_v15 = vsel %vm801_vm0, %v802_v7, %v803_v8  ;;  %v813_v29 = vrot.slane %v705_v25, 1  ;;  %v841_v32 = vrot.slane %v5453_v2, 2  ;;  %v847_v33 = vrot.slane %v5450_v1, 2  ;;  %v896_v43 = vld [vmem:[#allocation6 + $0xa0] sm:$0xff]  ;;  %1185 = vmatpush1.msra.mxu0 %v898_v38  ;;  %v895_v49 = vld [vmem:[#allocation6 + $0x98] sm:$0xff]  ;;  %v962_v50 = vld [vmem:[#allocation6 + $0x2b0] sm:$0xff] }
 0x104   : > { %4405 = vrot.lane.b32.xlu1 %v4404_v9, %s5095_s29  ;;  %v812_v18 = vsel %vm801_vm0, %v810_v13, %v811_v14  ;;  %v848_v34 = vrot.slane %v5458_v4, 2  ;;  %v5482_v36 = vsel %vm801_vm0, %v803_v8, %v805_v28  ;;  %v843_v46 = vrot.slane %v704_v24, 2  ;;  %1186 = vmatprep.subr.mxu0 %v897_v41  ;;  %v894_v51 = vld [vmem:[#allocation6 + $0x90] sm:$0xff]  ;;  %v961_v53 = vld [vmem:[#allocation6 + $0x2a8] sm:$0xff]  ;;  %v960_v55 = vld [vmem:[#allocation6 + $0x2a0] sm:$0xff]  ;;  %s3954_s6 = sshll.u32 %s694_s4, 4  ;;  %s5856_s6 = int_to_ptr.vmem [resolvable:$true] %s3954_s6 }
 0x105   : > { %v4409_v20 = vpack.i.bf16 %v812_v18, %v5468_v15  ;;  %v814_v37 = vsel %vm801_vm0, %v811_v14, %v813_v29  ;;  %v5489_v44 = vsel %vm839_vm1, %v840_v31, %v841_v32  ;;  %v850_v47 = vrot.slane %v705_v25, 2  ;;  %1260 = vmatpush1.msra.mxu1 %v964_v42  ;;  %1187 = vmatpush1.msra.mxu0 %v896_v43  ;;  %v893_v54 = vld [vmem:[#allocation6 + $0x88] sm:$0xff]  ;;  %v892_v58 = vld [vmem:[#allocation6 + $0x80] sm:$0xff]  ;;  %v959_v59 = vld [vmem:[#allocation6 + $0x298] sm:$0xff]  ;;  %s5968_s8 = sld [smem:[#allocation45_spill]]  ;;  %s3941_s24 = scalar_lea.sflag [#allocation5], %s5403_s5 }
 0x106   : > { %v4424_v40 = vpack.i.bf16 %v814_v37, %v5482_v36  ;;  %v849_v45 = vsel %vm839_vm1, %v847_v33, %v848_v34  ;;  %1261 = vmatprep.subr.mxu1 %v963_v48  ;;  %1188 = vmatprep.subr.mxu0 %v895_v49  ;;  %v5497_v56 = vsel %vm839_vm1, %v841_v32, %v843_v46  ;;  %v891_v60 = vld [vmem:[#allocation6 + $0x78] sm:$0xff]  ;;  %v958_v61 = vld [vmem:[#allocation6 + $0x290] sm:$0xff]  ;;  %v957_v1 = vld [vmem:[#allocation6 + $0x288] sm:$0xff]  ;;  %s4983_s25 = scalar_lea.vmem %s5856_s6, 512  ;;  %p5969_p9 = scmp.ne.s32.totalorder %s5948_s22, 0 }
 0x107   : > { %4400 = vrot.lane.b32.xlu0 %v4394_v3, %s5096_s28  ;;  %v5494_v52 = vpack.i.bf16 %v849_v45, %v5489_v44  ;;  %v851_v57 = vsel %vm839_vm1, %v848_v34, %v850_v47  ;;  %1262 = vmatpush1.msra.mxu1 %v962_v50  ;;  %v890_v63 = vld [vmem:[#allocation6 + $0x70] sm:$0xff]  ;;  %v889_v2 = vld [vmem:[#allocation6 + $0x68] sm:$0xff]  ;;  %v956_v3 = vld [vmem:[#allocation6 + $0x280] sm:$0xff]  ;;  %p4984_p6 = scmp.ne.s32.totalorder %s5856_s6, %s4983_s25  ;;  %s5100_s2 = smov [#allocation26]  }
 0x108   : > { %4410 = vrot.lane.b32.xlu1 %v4409_v20, %s5096_s28  ;;  %1189 = vmatpush1.msra.mxu0 %v894_v51  ;;  %v5503_v62 = vpack.i.bf16 %v851_v57, %v5497_v56  ;;  %v888_v4 = vld [vmem:[#allocation6 + $0x60] sm:$0xff]  ;;  %v955_v5 = vld [vmem:[#allocation6 + $0x278] sm:$0xff]  ;;  %v954_v7 = vld [vmem:[#allocation6 + $0x270] sm:$0xff] }
 0x109   : > { %1263 = vmatprep.subr.mxu1 %v961_v53  ;;  %1190 = vmatprep.subr.mxu0 %v893_v54  ;;  %v887_v6 = vld [vmem:[#allocation6 + $0x58] sm:$0xff]  ;;  %v886_v8 = vld [vmem:[#allocation6 + $0x50] sm:$0xff]  ;;  %v885_v10 = vld [vmem:[#allocation6 + $0x48] sm:$0xff]  ;;  %p4985_p10 = pnand %p4984_p6, %p5969_p9 }
 0x10a   : > { %1264 = vmatpush1.msra.mxu1 %v960_v55  ;;  %1191 = vmatpush1.msra.mxu0 %v892_v58  ;;  %v952_v11 = vld [vmem:[#allocation6 + $0x260] sm:$0xff]  ;;  %v951_v13 = vld [vmem:[#allocation6 + $0x258] sm:$0xff]  ;;  %v950_v16 = vld [vmem:[#allocation6 + $0x250] sm:$0xff] }
 0x10b   : > { %4415 = vrot.lane.b32.xlu0 %v4409_v20, %s5095_s29  ;;  %1265 = vmatprep.subr.mxu1 %v959_v59  ;;  %v884_v12 = vld [vmem:[#allocation6 + $0x40] sm:$0xff]  ;;  %v883_v14 = vld [vmem:[#allocation6 + $0x38] sm:$0xff]  ;;  %v882_v17 = vld [vmem:[#allocation6 + $0x30] sm:$0xff]  ;;  %s5854_s9 = scalar_lea.hbm %s5968_s8, %s4205_s30  ;;  %p4986_p4 = pneg %p4985_p10 }
 0x10c   : > { %4420 = vrot.lane.b32.xlu1 %v4404_v9, %s5096_s28  ;;  %1192 = vmatprep.subr.mxu0 %v891_v60  ;;  %v953_v9 = vld [vmem:[#allocation6 + $0x268] sm:$0xff]  ;;  %v948_v20 = vld [vmem:[#allocation6 + $0x240] sm:$0xff]  ;;  %v947_v22 = vld [vmem:[#allocation6 + $0x238] sm:$0xff] }
 0x10d   : > { %1266 = vmatpush1.msra.mxu1 %v958_v61  ;;  %1193 = vmatpush1.msra.mxu0 %v890_v63  ;;  %v949_v18 = vld [vmem:[#allocation6 + $0x248] sm:$0xff]  ;;  %v880_v21 = vld [vmem:[#allocation6 + $0x20] sm:$0xff]  ;;  %v879_v23 = vld [vmem:[#allocation6 + $0x18] sm:$0xff] }
 0x10e   : > { %1267 = vmatprep.subr.mxu1 %v957_v1  ;;  %1194 = vmatprep.subr.mxu0 %v889_v2  ;;  %v881_v19 = vld [vmem:[#allocation6 + $0x28] sm:$0xff]  ;;  %v946_v24 = vld [vmem:[#allocation6 + $0x230] sm:$0xff]  ;;  %v944_v28 = vld [vmem:[#allocation6 + $0x220] sm:$0xff] }
 0x10f   : > { %4425 = vrot.lane.b32.xlu0 %v4424_v40, %s5096_s28  ;;  %1268 = vmatpush1.msra.mxu1 %v956_v3  ;;  %v878_v25 = vld [vmem:[#allocation6 + $0x10] sm:$0xff]  ;;  %v945_v26 = vld [vmem:[#allocation6 + $0x228] sm:$0xff]  ;;  %v876_v29 = vld [vmem:[#allocation6] sm:$0xff] }
 0x110   : > { %4430 = vrot.lane.b32.xlu1 %v4424_v40, %s5095_s29  ;;  %1195 = vmatpush1.msra.mxu0 %v888_v4  ;;  %v877_v27 = vld [vmem:[#allocation6 + $0x8] sm:$0xff]  ;;  %v943_v30 = vld [vmem:[#allocation6 + $0x218] sm:$0xff]  ;;  %v942_v32 = vld [vmem:[#allocation6 + $0x210] sm:$0xff] }
 0x111   : > { %1269 = vmatprep.subr.mxu1 %v955_v5  ;;  %1196 = vmatprep.subr.mxu0 %v887_v6  ;;  %v939_v31 = vld [vmem:[#allocation6 + $0x1f8] sm:$0xff]  ;;  %v938_v33 = vld [vmem:[#allocation6 + $0x1f0] sm:$0xff]  ;;  %v941_v34 = vld [vmem:[#allocation6 + $0x208] sm:$0xff] }
 0x112   : > { %1270 = vmatpush1.msra.mxu1 %v954_v7  ;;  %1197 = vmatpush1.msra.mxu0 %v886_v8  ;;  %v937_v35 = vld [vmem:[#allocation6 + $0x1e8] sm:$0xff]  ;;  %v940_v37 = vld [vmem:[#allocation6 + $0x200] sm:$0xff]  ;;  %v1003_v39 = vld [vmem:[#allocation6 + $0x3f8] sm:$0xff] }
 0x113   : > { %4435 = vrot.lane.b32.xlu0 %v5494_v52, %s5095_s29  ;;  %1271 = vmatprep.subr.mxu1 %v953_v9  ;;  %v936_v38 = vld [vmem:[#allocation6 + $0x1e0] sm:$0xff]  ;;  %v935_v40 = vld [vmem:[#allocation6 + $0x1d8] sm:$0xff]  ;;  %v1002_v41 = vld [vmem:[#allocation6 + $0x3f0] sm:$0xff] }
 0x114   : > { %1198 = vmatprep.subr.mxu0 %v885_v10  ;;  %1272 = vmatpush1.msra.mxu1 %v952_v11  ;;  %v934_v42 = vld [vmem:[#allocation6 + $0x1d0] sm:$0xff]  ;;  %v1001_v43 = vld [vmem:[#allocation6 + $0x3e8] sm:$0xff]  ;;  %v1000_v46 = vld [vmem:[#allocation6 + $0x3e0] sm:$0xff] }
 0x115   : > { %1199 = vmatpush1.msra.mxu0 %v884_v12  ;;  %1273 = vmatprep.subr.mxu1 %v951_v13  ;;  %v933_v45 = vld [vmem:[#allocation6 + $0x1c8] sm:$0xff]  ;;  %v932_v47 = vld [vmem:[#allocation6 + $0x1c0] sm:$0xff]  ;;  %v999_v48 = vld [vmem:[#allocation6 + $0x3d8] sm:$0xff] }
 0x116   : > { %1200 = vmatprep.subr.mxu0 %v883_v14  ;;  %1274 = vmatpush1.msra.mxu1 %v950_v16  ;;  %v931_v49 = vld [vmem:[#allocation6 + $0x1b8] sm:$0xff]  ;;  %v998_v50 = vld [vmem:[#allocation6 + $0x3d0] sm:$0xff]  ;;  %v997_v53 = vld [vmem:[#allocation6 + $0x3c8] sm:$0xff] }
 0x117   : > { %4445 = vrot.lane.b32.xlu0 %v5503_v62, %s5095_s29  ;;  %1201 = vmatpush1.msra.mxu0 %v882_v17  ;;  %v930_v51 = vld [vmem:[#allocation6 + $0x1b0] sm:$0xff]  ;;  %v929_v54 = vld [vmem:[#allocation6 + $0x1a8] sm:$0xff]  ;;  %v996_v55 = vld [vmem:[#allocation6 + $0x3c0] sm:$0xff] }
 0x118   : > { %1275 = vmatprep.subr.mxu1 %v949_v18  ;;  %1202 = vmatprep.subr.mxu0 %v881_v19  ;;  %v928_v57 = vld [vmem:[#allocation6 + $0x1a0] sm:$0xff]  ;;  %v995_v58 = vld [vmem:[#allocation6 + $0x3b8] sm:$0xff]  ;;  %v994_v60 = vld [vmem:[#allocation6 + $0x3b0] sm:$0xff] }
 0x119   : > { %1276 = vmatpush1.msra.mxu1 %v948_v20  ;;  %1203 = vmatpush1.msra.mxu0 %v880_v21  ;;  %v927_v59 = vld [vmem:[#allocation6 + $0x198] sm:$0xff]  ;;  %v926_v61 = vld [vmem:[#allocation6 + $0x190] sm:$0xff]  ;;  %v993_v63 = vld [vmem:[#allocation6 + $0x3a8] sm:$0xff] }
 0x11a   : > { %1277 = vmatprep.subr.mxu1 %v947_v22  ;;  %1204 = vmatprep.subr.mxu0 %v879_v23  ;;  %v925_v1 = vld [vmem:[#allocation6 + $0x188] sm:$0xff]  ;;  %v992_v2 = vld [vmem:[#allocation6 + $0x3a0] sm:$0xff]  ;;  %v991_v4 = vld [vmem:[#allocation6 + $0x398] sm:$0xff] }
 0x11b   : > { %1278 = vmatpush1.msra.mxu1 %v946_v24  ;;  %1205 = vmatpush1.msra.mxu0 %v878_v25  ;;  %v924_v3 = vld [vmem:[#allocation6 + $0x180] sm:$0xff]  ;;  %v923_v5 = vld [vmem:[#allocation6 + $0x178] sm:$0xff]  ;;  %v990_v6 = vld [vmem:[#allocation6 + $0x390] sm:$0xff] }
 0x11c   : > { %1279 = vmatprep.subr.mxu1 %v945_v26  ;;  %1206 = vmatprep.subr.mxu0 %v877_v27  ;;  %v922_v7 = vld [vmem:[#allocation6 + $0x170] sm:$0xff]  ;;  %v921_v8 = vld [vmem:[#allocation6 + $0x168] sm:$0xff]  ;;  %v988_v9 = vld [vmem:[#allocation6 + $0x380] sm:$0xff] }
 0x11d   : > { %1280 = vmatpush1.msra.mxu1 %v944_v28  ;;  %1207 = vmatpush1.msra.mxu0 %v876_v29  ;;  %v920_v10 = vld [vmem:[#allocation6 + $0x160] sm:$0xff]  ;;  %v987_v11 = vld [vmem:[#allocation6 + $0x378] sm:$0xff]  ;;  %v986_v13 = vld [vmem:[#allocation6 + $0x370] sm:$0xff] }
 0x11e   : > { %1281 = vmatprep.subr.mxu1 %v943_v30  ;;  %1208 = vmatprep.subr.mxu0 %v939_v31  ;;  %v919_v12 = vld [vmem:[#allocation6 + $0x158] sm:$0xff]  ;;  %v918_v14 = vld [vmem:[#allocation6 + $0x150] sm:$0xff]  ;;  %v985_v16 = vld [vmem:[#allocation6 + $0x368] sm:$0xff] }
 0x11f   : > { %1282 = vmatpush1.msra.mxu1 %v942_v32  ;;  %1209 = vmatpush2.msra.mxu0 %v938_v33  ;;  %v984_v17 = vld [vmem:[#allocation6 + $0x360] sm:$0xff]  ;;  %v983_v19 = vld [vmem:[#allocation6 + $0x358] sm:$0xff]  ;;  %v982_v21 = vld [vmem:[#allocation6 + $0x350] sm:$0xff] }
 0x120   : > { %1283 = vmatprep.subr.mxu1 %v941_v34  ;;  %1210 = vmatprep.subr.mxu0 %v937_v35  ;;  %v916_v18 = vld [vmem:[#allocation6 + $0x140] sm:$0xff]  ;;  %v915_v20 = vld [vmem:[#allocation6 + $0x138] sm:$0xff]  ;;  %v914_v22 = vld [vmem:[#allocation6 + $0x130] sm:$0xff] }
 0x121   : > { %1284 = vmatpush1.msra.mxu1 %v940_v37  ;;  %1211 = vmatpush2.msra.mxu0 %v936_v38  ;;  %v981_v23 = vld [vmem:[#allocation6 + $0x348] sm:$0xff]  ;;  %v980_v25 = vld [vmem:[#allocation6 + $0x340] sm:$0xff]  ;;  %v979_v27 = vld [vmem:[#allocation6 + $0x338] sm:$0xff] }
 0x122   : > { %1285 = vmatprep.subr.mxu1 %v1003_v39  ;;  %1212 = vmatprep.subr.mxu0 %v935_v40  ;;  %v913_v24 = vld [vmem:[#allocation6 + $0x128] sm:$0xff]  ;;  %v912_v26 = vld [vmem:[#allocation6 + $0x120] sm:$0xff]  ;;  %v911_v28 = vld [vmem:[#allocation6 + $0x118] sm:$0xff] }
 0x123   : > { %1286 = vmatpush2.msra.mxu1 %v1002_v41  ;;  %1213 = vmatpush2.msra.mxu0 %v934_v42  ;;  %v978_v29 = vld [vmem:[#allocation6 + $0x330] sm:$0xff]  ;;  %v977_v31 = vld [vmem:[#allocation6 + $0x328] sm:$0xff]  ;;  %v976_v33 = vld [vmem:[#allocation6 + $0x320] sm:$0xff]  ;;  %v1166_v42 = vlaneseq }
 0x124   : > { %1287 = vmatprep.subr.mxu1 %v1001_v43  ;;  %1214 = vmatprep.subr.mxu0 %v933_v45  ;;  %v910_v30 = vld [vmem:[#allocation6 + $0x110] sm:$0xff]  ;;  %v909_v32 = vld [vmem:[#allocation6 + $0x108] sm:$0xff]  ;;  %v908_v34 = vld [vmem:[#allocation6 + $0x100] sm:$0xff]  ;;  %v5097_v43 = vmov 0.0  }
 0x125   : > { %1288 = vmatpush2.msra.mxu1 %v1000_v46  ;;  %1215 = vmatpush2.msra.mxu0 %v932_v47  ;;  %v975_v35 = vld [vmem:[#allocation6 + $0x318] sm:$0xff]  ;;  %v974_v37 = vld [vmem:[#allocation6 + $0x310] sm:$0xff]  ;;  %v973_v39 = vld [vmem:[#allocation6 + $0x308] sm:$0xff]  ;;  %vm2104_vm2 = vcmp.lt.s32.totalorder %v1166_v42, 288 }
 0x126   : > { %1289 = vmatprep.subr.mxu1 %v999_v48  ;;  %1216 = vmatprep.subr.mxu0 %v931_v49  ;;  %v1035_v38 = vld [vmem:[#allocation6 + $0x4f8] sm:$0xff]  ;;  %v972_v40 = vld [vmem:[#allocation6 + $0x300] sm:$0xff]  ;;  %2106 = vst.msk [vmem:[#allocation2] ss:$8 sm:$0x7] %vm2104_vm2, %v5097_v43 }
 0x127   : > { %1290 = vmatpush2.msra.mxu1 %v998_v50  ;;  %1217 = vmatpush2.msra.mxu0 %v930_v51  ;;  %v1099_v41 = vld [vmem:[#allocation6 + $0x6f8] sm:$0xff]  ;;  %2109 = vst.msk [vmem:[#allocation2 + $0x31] ss:$8 sm:$0x7] %vm2104_vm2, %v5097_v43 }
 0x128   : > { %1291 = vmatprep.subr.mxu1 %v997_v53  ;;  %1218 = vmatprep.subr.mxu0 %v929_v54  ;;  %v1033_v54 = vld [vmem:[#allocation6 + $0x4e8] sm:$0xff] }
 0x129   : > { %1292 = vmatpush2.msra.mxu1 %v996_v55  ;;  %4440 = vrot.lane.b32.xlu1 %v5494_v52, %s5096_s28  ;;  %v989_v52 = vld [vmem:[#allocation6 + $0x388] sm:$0xff] }
 0x12a   : > { %1219 = vmatpush2.msra.mxu0 %v928_v57  ;;  %1293 = vmatprep.subr.mxu1 %v995_v58 }
 0x12b   : > { %1220 = vmatprep.subr.mxu0 %v927_v59  ;;  %1294 = vmatpush2.msra.mxu1 %v994_v60  ;;  %v1032_v59 = vld [vmem:[#allocation6 + $0x4e0] sm:$0xff]  ;;  %v1031_v60 = vld [vmem:[#allocation6 + $0x4d8] sm:$0xff] }
 0x12c   : > { %1221 = vmatpush2.msra.mxu0 %v926_v61  ;;  %1295 = vmatprep.subr.mxu1 %v993_v63  ;;  %v1098_v61 = vld [vmem:[#allocation6 + $0x6f0] sm:$0xff] }
 0x12d   : > { %1222 = vmatprep.subr.mxu0 %v925_v1  ;;  %1296 = vmatpush2.msra.mxu1 %v992_v2  ;;  %v1030_v1 = vld [vmem:[#allocation6 + $0x4d0] sm:$0xff]  ;;  %v1097_v2 = vld [vmem:[#allocation6 + $0x6e8] sm:$0xff] }
 0x12e   : > { %4450 = vrot.lane.b32.xlu1 %v5503_v62, %s5096_s28  ;;  %1223 = vmatpush2.msra.mxu0 %v924_v3  ;;  %v917_v62 = vld [vmem:[#allocation6 + $0x148] sm:$0xff] }
 0x12f   : > { %1297 = vmatprep.subr.mxu1 %v991_v4  ;;  %1224 = vmatprep.subr.mxu0 %v923_v5  ;;  %v1029_v3 = vld [vmem:[#allocation6 + $0x4c8] sm:$0xff]  ;;  %v1096_v4 = vld [vmem:[#allocation6 + $0x6e0] sm:$0xff] }
 0x130   : > { %1298 = vmatpush2.msra.mxu1 %v990_v6  ;;  %1225 = vmatpush2.msra.mxu0 %v922_v7  ;;  %v1028_v5 = vld [vmem:[#allocation6 + $0x4c0] sm:$0xff]  ;;  %v1095_v6 = vld [vmem:[#allocation6 + $0x6d8] sm:$0xff]  ;;  %v1094_v7 = vld [vmem:[#allocation6 + $0x6d0] sm:$0xff] }
 0x131   : > { %1299 = vmatprep.subr.mxu1 %v989_v52  ;;  %1226 = vmatprep.subr.mxu0 %v921_v8  ;;  %v1026_v52 = vld [vmem:[#allocation6 + $0x4b0] sm:$0xff]  ;;  %v1093_v8 = vld [vmem:[#allocation6 + $0x6c8] sm:$0xff] }
 0x132   : > { %1300 = vmatpush2.msra.mxu1 %v988_v9  ;;  %1227 = vmatpush2.msra.mxu0 %v920_v10  ;;  %v1025_v9 = vld [vmem:[#allocation6 + $0x4a8] sm:$0xff]  ;;  %v1092_v10 = vld [vmem:[#allocation6 + $0x6c0] sm:$0xff] }
 0x133   : > { %1301 = vmatprep.subr.mxu1 %v987_v11  ;;  %1228 = vmatprep.subr.mxu0 %v919_v12  ;;  %v1024_v11 = vld [vmem:[#allocation6 + $0x4a0] sm:$0xff]  ;;  %v1091_v12 = vld [vmem:[#allocation6 + $0x6b8] sm:$0xff] }
 0x134   : > { %1302 = vmatpush2.msra.mxu1 %v986_v13  ;;  %1229 = vmatpush2.msra.mxu0 %v918_v14  ;;  %v1023_v13 = vld [vmem:[#allocation6 + $0x498] sm:$0xff]  ;;  %v1090_v14 = vld [vmem:[#allocation6 + $0x6b0] sm:$0xff] }
 0x135   : > { %1303 = vmatprep.subr.mxu1 %v985_v16  ;;  %1230 = vmatprep.subr.mxu0 %v917_v62  ;;  %v1022_v16 = vld [vmem:[#allocation6 + $0x490] sm:$0xff]  ;;  %v1089_v62 = vld [vmem:[#allocation6 + $0x6a8] sm:$0xff] }
 0x136   : > { %1304 = vmatpush2.msra.mxu1 %v984_v17  ;;  %1231 = vmatpush2.msra.mxu0 %v916_v18  ;;  %v1021_v17 = vld [vmem:[#allocation6 + $0x488] sm:$0xff]  ;;  %v1088_v18 = vld [vmem:[#allocation6 + $0x6a0] sm:$0xff] }
 0x137   : > { %1305 = vmatprep.subr.mxu1 %v983_v19  ;;  %1232 = vmatprep.subr.mxu0 %v915_v20  ;;  %v1020_v19 = vld [vmem:[#allocation6 + $0x480] sm:$0xff]  ;;  %v1087_v20 = vld [vmem:[#allocation6 + $0x698] sm:$0xff] }
 0x138   : > { %1306 = vmatpush2.msra.mxu1 %v982_v21  ;;  %1233 = vmatpush2.msra.mxu0 %v914_v22  ;;  %v1019_v21 = vld [vmem:[#allocation6 + $0x478] sm:$0xff]  ;;  %v1086_v22 = vld [vmem:[#allocation6 + $0x690] sm:$0xff] }
 0x139   : > { %1307 = vmatprep.subr.mxu1 %v981_v23  ;;  %1234 = vmatprep.subr.mxu0 %v913_v24  ;;  %v1018_v23 = vld [vmem:[#allocation6 + $0x470] sm:$0xff]  ;;  %v1085_v24 = vld [vmem:[#allocation6 + $0x688] sm:$0xff] }
 0x13a   : > { %1308 = vmatpush2.msra.mxu1 %v980_v25  ;;  %1235 = vmatpush2.msra.mxu0 %v912_v26  ;;  %v1017_v25 = vld [vmem:[#allocation6 + $0x468] sm:$0xff]  ;;  %v1084_v26 = vld [vmem:[#allocation6 + $0x680] sm:$0xff] }
 0x13b   : > { %1309 = vmatprep.subr.mxu1 %v979_v27  ;;  %1236 = vmatprep.subr.mxu0 %v911_v28  ;;  %v1016_v27 = vld [vmem:[#allocation6 + $0x460] sm:$0xff]  ;;  %v1083_v28 = vld [vmem:[#allocation6 + $0x678] sm:$0xff] }
 0x13c   : > { %1310 = vmatpush2.msra.mxu1 %v978_v29  ;;  %1237 = vmatpush2.msra.mxu0 %v910_v30  ;;  %v1015_v29 = vld [vmem:[#allocation6 + $0x458] sm:$0xff]  ;;  %v1082_v30 = vld [vmem:[#allocation6 + $0x670] sm:$0xff] }
 0x13d   : > { %1311 = vmatprep.subr.mxu1 %v977_v31  ;;  %1238 = vmatprep.subr.mxu0 %v909_v32  ;;  %v1014_v31 = vld [vmem:[#allocation6 + $0x450] sm:$0xff]  ;;  %v1081_v32 = vld [vmem:[#allocation6 + $0x668] sm:$0xff] }
 0x13e   : > { %1312 = vmatpush2.msra.mxu1 %v976_v33  ;;  %1239 = vmatpush2.msra.mxu0 %v908_v34  ;;  %v1013_v33 = vld [vmem:[#allocation6 + $0x448] sm:$0xff]  ;;  %v1080_v34 = vld [vmem:[#allocation6 + $0x660] sm:$0xff] }
 0x13f   : > { %1313 = vmatprep.subr.mxu1 %v975_v35  ;;  %1330 = vmatprep.subr.mxu0 %v1035_v38  ;;  %v1012_v35 = vld [vmem:[#allocation6 + $0x440] sm:$0xff]  ;;  %v1011_v38 = vld [vmem:[#allocation6 + $0x438] sm:$0xff] }
 0x140   : > { %1314 = vmatpush2.msra.mxu1 %v974_v37  ;;  %1317 = vmatprep.mubr.f32.mxu1 %v5468_v15  ;;  %v1034_v15 = vld [vmem:[#allocation6 + $0x4f0] sm:$0xff]  ;;  %v1079_v37 = vld [vmem:[#allocation6 + $0x658] sm:$0xff] }
 0x141   : > { %1315 = vmatprep.subr.mxu1 %v973_v39  ;;  %v1078_v39 = vld [vmem:[#allocation6 + $0x650] sm:$0xff] }
 0x142   : > { %1316 = vmatpush2.msra.mxu1 %v972_v40  ;;  %v1010_v40 = vld [vmem:[#allocation6 + $0x430] sm:$0xff] }
 0x143   : > { %1407 = vmatprep.subr.mxu1 %v1099_v41  ;;  %v1077_v41 = vld [vmem:[#allocation6 + $0x648] sm:$0xff] }
 0x175   : > { %v4396_v45 = vpop.permute.xlu0 %4395 }
 0x176   : > { %v4398_v46 = vunpack.i.h.bf16 %v4396_v45  ;;  %v4397_v47 = vunpack.i.l.bf16 %v4396_v45  ;;  %v4406_v48 = vpop.permute.xlu1 %4405  ;;  %v1009_v45 = vld [vmem:[#allocation6 + $0x428] sm:$0xff] }
 0x177   : > { %v4408_v49 = vunpack.i.h.bf16 %v4406_v48  ;;  %v4407_v50 = vunpack.i.l.bf16 %v4406_v48  ;;  %v1075_v48 = vld [vmem:[#allocation6 + $0x638] sm:$0xff] }
 0x178   : > { %v783_v51 = vsel %vm782_vm3, %v4397_v47, %v4398_v46  ;;  %v1076_v46 = vld [vmem:[#allocation6 + $0x640] sm:$0xff] }
 0x179   : > { %v4401_v53 = vpop.permute.xlu0 %4400  ;;  %1240 = vmatprep.mubr.f32.mxu0 %v783_v51  ;;  %v784_v55 = vsel %vm782_vm3, %v4407_v50, %v4408_v49  ;;  %v1008_v47 = vld [vmem:[#allocation6 + $0x420] sm:$0xff]  ;;  %v1007_v49 = vld [vmem:[#allocation6 + $0x418] sm:$0xff]  ;;  %v1074_v50 = vld [vmem:[#allocation6 + $0x630] sm:$0xff] }
 0x17a   : > { %v4403_v57 = vunpack.i.h.bf16 %v4401_v53  ;;  %v4402_v58 = vunpack.i.l.bf16 %v4401_v53  ;;  %1241 = vmatmul.mubr.f32.vlgmr.msra.gmra.mxu0 %v5447_v0  ;;  %v1027_v0 = vld [vmem:[#allocation6 + $0x4b8] sm:$0xff]  ;;  %v1006_v51 = vld [vmem:[#allocation6 + $0x410] sm:$0xff]  ;;  %v1005_v53 = vld [vmem:[#allocation6 + $0x408] sm:$0xff] }
 0x17b   : > { %1331 = vmatpush1.msra.mxu0 %v1034_v15  ;;  %1246 = vmatprep.mubr.f32.mxu0 %v784_v55  ;;  %v1073_v15 = vld [vmem:[#allocation6 + $0x628] sm:$0xff]  ;;  %v1004_v55 = vld [vmem:[#allocation6 + $0x400] sm:$0xff] }
 0x17c   : > { %1332 = vmatprep.subr.mxu0 %v1033_v54  ;;  %v796_v63 = vsel %vm795_vm4, %v4402_v58, %v4403_v57  ;;  %v1072_v54 = vld [vmem:[#allocation6 + $0x620] sm:$0xff]  ;;  %v1071_v57 = vld [vmem:[#allocation6 + $0x618] sm:$0xff] }
 0x17d   : > { %1333 = vmatpush1.msra.mxu0 %v1032_v59  ;;  %1318 = vmatmul.mubr.f32.vlgmr.msra.gmra.mxu1 %v796_v63  ;;  %v1067_v58 = vld [vmem:[#allocation6 + $0x5f8] sm:$0xff]  ;;  %v1070_v59 = vld [vmem:[#allocation6 + $0x610] sm:$0xff]  ;;  %v1065_v63 = vld [vmem:[#allocation6 + $0x5e8] sm:$0xff] }
 0x17e   : > { %1334 = vmatprep.subr.mxu0 %v1031_v60  ;;  %1408 = vmatpush1.msra.mxu1 %v1098_v61  ;;  %v1066_v60 = vld [vmem:[#allocation6 + $0x5f0] sm:$0xff]  ;;  %v1069_v61 = vld [vmem:[#allocation6 + $0x608] sm:$0xff] }
 0x17f   : > { %1335 = vmatpush1.msra.mxu0 %v1030_v1  ;;  %1409 = vmatprep.subr.mxu1 %v1097_v2  ;;  %v1068_v1 = vld [vmem:[#allocation6 + $0x600] sm:$0xff] }
 0x180   : > { %1336 = vmatprep.subr.mxu0 %v1029_v3  ;;  %1410 = vmatpush1.msra.mxu1 %v1096_v4  ;;  %v1064_v2 = vld [vmem:[#allocation6 + $0x5e0] sm:$0xff]  ;;  %v1131_v3 = vld [vmem:[#allocation6 + $0x7f8] sm:$0xff] }
 0x181   : > { %1337 = vmatpush1.msra.mxu0 %v1028_v5  ;;  %1411 = vmatprep.subr.mxu1 %v1095_v6  ;;  %v1063_v4 = vld [vmem:[#allocation6 + $0x5d8] sm:$0xff]  ;;  %v1130_v5 = vld [vmem:[#allocation6 + $0x7f0] sm:$0xff] }
 0x182   : > { %1338 = vmatprep.subr.mxu0 %v1027_v0  ;;  %1412 = vmatpush1.msra.mxu1 %v1094_v7  ;;  %v1062_v6 = vld [vmem:[#allocation6 + $0x5d0] sm:$0xff]  ;;  %v1129_v0 = vld [vmem:[#allocation6 + $0x7e8] sm:$0xff] }
 0x183   : > { %1339 = vmatpush1.msra.mxu0 %v1026_v52  ;;  %1413 = vmatprep.subr.mxu1 %v1093_v8  ;;  %v1061_v7 = vld [vmem:[#allocation6 + $0x5c8] sm:$0xff]  ;;  %v1128_v52 = vld [vmem:[#allocation6 + $0x7e0] sm:$0xff] }
 0x184   : > { %1340 = vmatprep.subr.mxu0 %v1025_v9  ;;  %1414 = vmatpush1.msra.mxu1 %v1092_v10  ;;  %v1060_v8 = vld [vmem:[#allocation6 + $0x5c0] sm:$0xff]  ;;  %v1127_v9 = vld [vmem:[#allocation6 + $0x7d8] sm:$0xff] }
 0x185   : > { %1341 = vmatpush1.msra.mxu0 %v1024_v11  ;;  %1415 = vmatprep.subr.mxu1 %v1091_v12  ;;  %v1059_v10 = vld [vmem:[#allocation6 + $0x5b8] sm:$0xff]  ;;  %v1126_v11 = vld [vmem:[#allocation6 + $0x7d0] sm:$0xff] }
 0x186   : > { %1342 = vmatprep.subr.mxu0 %v1023_v13  ;;  %1416 = vmatpush1.msra.mxu1 %v1090_v14  ;;  %v1058_v12 = vld [vmem:[#allocation6 + $0x5b0] sm:$0xff]  ;;  %v1125_v13 = vld [vmem:[#allocation6 + $0x7c8] sm:$0xff] }
 0x187   : > { %1343 = vmatpush1.msra.mxu0 %v1022_v16  ;;  %1417 = vmatprep.subr.mxu1 %v1089_v62  ;;  %v1057_v14 = vld [vmem:[#allocation6 + $0x5a8] sm:$0xff]  ;;  %v1124_v16 = vld [vmem:[#allocation6 + $0x7c0] sm:$0xff] }
 0x188   : > { %1344 = vmatprep.subr.mxu0 %v1021_v17  ;;  %1418 = vmatpush1.msra.mxu1 %v1088_v18  ;;  %v1056_v62 = vld [vmem:[#allocation6 + $0x5a0] sm:$0xff]  ;;  %v1123_v17 = vld [vmem:[#allocation6 + $0x7b8] sm:$0xff] }
 0x189   : > { %1345 = vmatpush1.msra.mxu0 %v1020_v19  ;;  %1419 = vmatprep.subr.mxu1 %v1087_v20  ;;  %v1055_v18 = vld [vmem:[#allocation6 + $0x598] sm:$0xff]  ;;  %v1122_v19 = vld [vmem:[#allocation6 + $0x7b0] sm:$0xff] }
 0x18a   : > { %1346 = vmatprep.subr.mxu0 %v1019_v21  ;;  %1420 = vmatpush1.msra.mxu1 %v1086_v22  ;;  %v1054_v20 = vld [vmem:[#allocation6 + $0x590] sm:$0xff]  ;;  %v1121_v21 = vld [vmem:[#allocation6 + $0x7a8] sm:$0xff] }
 0x18b   : > { %1347 = vmatpush1.msra.mxu0 %v1018_v23  ;;  %1421 = vmatprep.subr.mxu1 %v1085_v24  ;;  %v1053_v22 = vld [vmem:[#allocation6 + $0x588] sm:$0xff]  ;;  %v1120_v23 = vld [vmem:[#allocation6 + $0x7a0] sm:$0xff]  ;;  %v5520_v24 = vpop.permute.xlu0 %4415 }
 0x18c   : > { %1348 = vmatprep.subr.mxu0 %v1017_v25  ;;  %1422 = vmatpush1.msra.mxu1 %v1084_v26  ;;  %v1052_v25 = vld [vmem:[#allocation6 + $0x580] sm:$0xff]  ;;  %v1119_v26 = vld [vmem:[#allocation6 + $0x798] sm:$0xff] }
 0x18d   : > { %1349 = vmatpush1.msra.mxu0 %v1016_v27  ;;  %1423 = vmatprep.subr.mxu1 %v1083_v28  ;;  %v1051_v27 = vld [vmem:[#allocation6 + $0x578] sm:$0xff]  ;;  %v1118_v28 = vld [vmem:[#allocation6 + $0x790] sm:$0xff] }
 0x18e   : > { %1350 = vmatprep.subr.mxu0 %v1015_v29  ;;  %1424 = vmatpush1.msra.mxu1 %v1082_v30  ;;  %v1050_v29 = vld [vmem:[#allocation6 + $0x570] sm:$0xff]  ;;  %v1117_v30 = vld [vmem:[#allocation6 + $0x788] sm:$0xff] }
 0x18f   : > { %1351 = vmatpush1.msra.mxu0 %v1014_v31  ;;  %1425 = vmatprep.subr.mxu1 %v1081_v32  ;;  %v5522_v31 = vpop.permute.xlu1 %4410  ;;  %v1049_v32 = vld [vmem:[#allocation6 + $0x568] sm:$0xff] }
 0x190   : > { %1352 = vmatprep.subr.mxu0 %v1013_v33  ;;  %1426 = vmatpush1.msra.mxu1 %v1080_v34  ;;  %v1116_v33 = vld [vmem:[#allocation6 + $0x780] sm:$0xff] }
 0x191   : > { %1353 = vmatpush1.msra.mxu0 %v1012_v35  ;;  %1427 = vmatprep.subr.mxu1 %v1079_v37  ;;  %v1048_v34 = vld [vmem:[#allocation6 + $0x560] sm:$0xff]  ;;  %v1115_v35 = vld [vmem:[#allocation6 + $0x778] sm:$0xff] }
 0x192   : > { %1354 = vmatprep.subr.mxu0 %v1011_v38  ;;  %1428 = vmatpush1.msra.mxu1 %v1078_v39  ;;  %v1047_v37 = vld [vmem:[#allocation6 + $0x558] sm:$0xff]  ;;  %v1114_v38 = vld [vmem:[#allocation6 + $0x770] sm:$0xff]  ;;  %v5524_v39 = vpop.permute.xlu0 %4425 }
 0x193   : > { %1355 = vmatpush1.msra.mxu0 %v1010_v40  ;;  %1429 = vmatprep.subr.mxu1 %v1077_v41  ;;  %v1046_v40 = vld [vmem:[#allocation6 + $0x550] sm:$0xff]  ;;  %v1113_v41 = vld [vmem:[#allocation6 + $0x768] sm:$0xff] }
 0x194   : > { %1356 = vmatprep.subr.mxu0 %v1009_v45  ;;  %1430 = vmatpush1.msra.mxu1 %v1076_v46  ;;  %v1045_v45 = vld [vmem:[#allocation6 + $0x548] sm:$0xff]  ;;  %v1112_v46 = vld [vmem:[#allocation6 + $0x760] sm:$0xff] }
 0x195   : > { %1357 = vmatpush1.msra.mxu0 %v1008_v47  ;;  %1431 = vmatprep.subr.mxu1 %v1075_v48  ;;  %v1044_v47 = vld [vmem:[#allocation6 + $0x540] sm:$0xff]  ;;  %v1111_v48 = vld [vmem:[#allocation6 + $0x758] sm:$0xff] }
 0x196   : > { %1358 = vmatprep.subr.mxu0 %v1007_v49  ;;  %1432 = vmatpush1.msra.mxu1 %v1074_v50  ;;  %v4421_v49 = vpop.permute.xlu1 %4420  ;;  %v1043_v50 = vld [vmem:[#allocation6 + $0x538] sm:$0xff] }
 0x197   : > { %1359 = vmatpush1.msra.mxu0 %v1006_v51  ;;  %1433 = vmatprep.subr.mxu1 %v1073_v15  ;;  %v1110_v51 = vld [vmem:[#allocation6 + $0x750] sm:$0xff] }
 0x198   : > { %1360 = vmatprep.subr.mxu0 %v1005_v53  ;;  %1434 = vmatpush1.msra.mxu1 %v1072_v54  ;;  %v1042_v15 = vld [vmem:[#allocation6 + $0x530] sm:$0xff]  ;;  %v1109_v53 = vld [vmem:[#allocation6 + $0x748] sm:$0xff]  ;;  %v4423_v54 = vunpack.i.h.bf16 %v4421_v49 }
 0x199   : > { %1361 = vmatpush1.msra.mxu0 %v1004_v55  ;;  %1435 = vmatprep.subr.mxu1 %v1071_v57  ;;  %v4422_v55 = vunpack.i.l.bf16 %v4421_v49  ;;  %v1041_v57 = vld [vmem:[#allocation6 + $0x528] sm:$0xff]  ;;  %v1150_v49 = vld [vmem:[#allocation6 + $0x890] sm:$0xff] }
 0x19a   : > { %1362 = vmatprep.subr.mxu0 %v1067_v58  ;;  %1436 = vmatpush1.msra.mxu1 %v1070_v59  ;;  %v1108_v58 = vld [vmem:[#allocation6 + $0x740] sm:$0xff]  ;;  %v4436_v59 = vpop.permute.xlu0 %4435 }
 0x19b   : > { %1363 = vmatpush2.msra.mxu0 %v1066_v60  ;;  %1437 = vmatprep.subr.mxu1 %v1069_v61  ;;  %v1107_v60 = vld [vmem:[#allocation6 + $0x738] sm:$0xff]  ;;  %v1040_v61 = vld [vmem:[#allocation6 + $0x520] sm:$0xff] }
 0x19c   : > { %1364 = vmatprep.subr.mxu0 %v1065_v63  ;;  %1438 = vmatpush1.msra.mxu1 %v1068_v1  ;;  %v4413_v63 = vunpack.i.h.bf16 %v5522_v31  ;;  %v4412_v1 = vunpack.i.l.bf16 %v5522_v31  ;;  %v1160_v31 = vld [vmem:[#allocation6 + $0x8e0] sm:$0xff] }
 0x19d   : > { %1365 = vmatpush2.msra.mxu0 %v1064_v2  ;;  %1439 = vmatprep.subr.mxu1 %v1131_v3  ;;  %v1039_v2 = vld [vmem:[#allocation6 + $0x518] sm:$0xff]  ;;  %v1106_v3 = vld [vmem:[#allocation6 + $0x730] sm:$0xff] }
 0x19e   : > { %1366 = vmatprep.subr.mxu0 %v1063_v4  ;;  %1440 = vmatpush2.msra.mxu1 %v1130_v5  ;;  %v4418_v4 = vunpack.i.h.bf16 %v5520_v24  ;;  %v4417_v5 = vunpack.i.l.bf16 %v5520_v24 }
 0x19f   : > { %1367 = vmatpush2.msra.mxu0 %v1062_v6  ;;  %1441 = vmatprep.subr.mxu1 %v1129_v0  ;;  %v4552_v6 = vld [vmem:[%s5444_s0 + $0x10] sm:$0xff]  ;;  %v797_v0 = vsel %vm795_vm4, %v4422_v55, %v4423_v54  ;;  %v1143_v55 = vld [vmem:[#allocation6 + $0x858] sm:$0xff]  ;;  %s4987_s0 = sshll.u32 %s5100_s2, 4  ;;  %s4988_s0 = int_to_ptr.vmem [resolvable:$false] %s4987_s0 }
 0x1a0   : > { %1368 = vmatprep.subr.mxu0 %v1061_v7  ;;  %1442 = vmatpush2.msra.mxu1 %v1128_v52  ;;  %v1038_v7 = vld [vmem:[#allocation6 + $0x510] sm:$0xff]  ;;  %v1105_v52 = vld [vmem:[#allocation6 + $0x728] sm:$0xff]  ;;  %v1144_v54 = vld [vmem:[#allocation6 + $0x860] sm:$0xff]  ;;  %s4989_s29 = scalar_lea.vmem %s4988_s0, 1024  ;;  %p4990_p3 = scmp.lt.s32.totalorder %s5856_s6, %s4988_s0 }
 0x1a1   : > { %1369 = vmatpush2.msra.mxu0 %v1060_v8  ;;  %1443 = vmatprep.subr.mxu1 %v1127_v9  ;;  %v1037_v8 = vld [vmem:[#allocation6 + $0x508] sm:$0xff]  ;;  %v4438_v9 = vunpack.i.h.bf16 %v4436_v59  ;;  %p4991_p13 = scmp.lt.s32.totalorder %s4989_s29, %s4983_s25 }
 0x1a2   : > { %1370 = vmatprep.subr.mxu0 %v1059_v10  ;;  %1444 = vmatpush2.msra.mxu1 %v1126_v11  ;;  %v4437_v10 = vunpack.i.l.bf16 %v4436_v59  ;;  %v1104_v11 = vld [vmem:[#allocation6 + $0x720] sm:$0xff] }
 0x1a3   : > { %1371 = vmatpush2.msra.mxu0 %v1058_v12  ;;  %1445 = vmatprep.subr.mxu1 %v1125_v13  ;;  %v1036_v12 = vld [vmem:[#allocation6 + $0x500] sm:$0xff]  ;;  %v4446_v13 = vpop.permute.xlu0 %4445  ;;  %p4992_p0 = por %p4991_p13, %p4990_p3 }
 0x1a4   : > { %1372 = vmatprep.subr.mxu0 %v1057_v14  ;;  %1446 = vmatpush2.msra.mxu1 %v1124_v16  ;;  %v835_v14 = vsel %vm795_vm4, %v4412_v1, %v4413_v63  ;;  %v1103_v16 = vld [vmem:[#allocation6 + $0x718] sm:$0xff]  ;;  %v1140_v59 = vld [vmem:[#allocation6 + $0x840] sm:$0xff]  ;;  %v1138_v63 = vld [vmem:[#allocation6 + $0x830] sm:$0xff] }
 0x1a5   : > { %1373 = vmatpush2.msra.mxu0 %v1056_v62  ;;  %1447 = vmatprep.subr.mxu1 %v1123_v17  ;;  %v4431_v62 = vpop.permute.xlu1 %4430  ;;  %v4428_v17 = vunpack.i.h.bf16 %v5524_v39  ;;  %v1137_v1 = vld [vmem:[#allocation6 + $0x828] sm:$0xff]  ;;  %p4993_p5 = pnand %p4992_p0, %p4986_p4 }
 0x1a6   : > { %1374 = vmatprep.subr.mxu0 %v1055_v18  ;;  %1448 = vmatpush2.msra.mxu1 %v1122_v19  ;;  %v4427_v18 = vunpack.i.l.bf16 %v5524_v39  ;;  %v5537_v19 = vsel %vm782_vm3, %v4417_v5, %v4418_v4  ;;  %v4433_v24 = vunpack.i.h.bf16 %v4431_v62  ;;  %v5548_v39 = vld [vmem:[#allocation24 + $0xf8] sm:$0xff]  ;;  %v1135_v5 = vld [vmem:[#allocation6 + $0x818] sm:$0xff] }
 0x1a7   : > { %1375 = vmatpush2.msra.mxu0 %v1054_v20  ;;  %1449 = vmatprep.subr.mxu1 %v1121_v21  ;;  %v1102_v20 = vld [vmem:[#allocation6 + $0x710] sm:$0xff] }
 0x1a8   : > { %1376 = vmatprep.subr.mxu0 %v1053_v22  ;;  %1450 = vmatpush2.msra.mxu1 %v1120_v23  ;;  %v1162_v21 = vld [vmem:[#allocation6 + $0x8f0] sm:$0xff]  ;;  %v4448_v22 = vunpack.i.h.bf16 %v4446_v13  ;;  %v4447_v23 = vunpack.i.l.bf16 %v4446_v13 }
 0x1a9   : > { %1377 = vmatpush2.msra.mxu0 %v1052_v25  ;;  %1451 = vmatprep.subr.mxu1 %v1119_v26  ;;  %v4432_v25 = vunpack.i.l.bf16 %v4431_v62  ;;  %v1101_v26 = vld [vmem:[#allocation6 + $0x708] sm:$0xff]  ;;  %v730_v62 = vld [vmem:[#allocation24 + $0xc0] sm:$0xff] }
 0x1aa   : > { %1378 = vmatprep.subr.mxu0 %v1051_v27  ;;  %1452 = vmatpush2.msra.mxu1 %v1118_v28  ;;  %v860_v27 = vsel %vm782_vm3, %v4437_v10, %v4438_v9  ;;  %v1100_v28 = vld [vmem:[#allocation6 + $0x700] sm:$0xff]  ;;  %v733_v13 = vld [vmem:[#allocation24 + $0xd8] sm:$0xff] }
 0x1ab   : > { %1379 = vmatpush2.msra.mxu0 %v1050_v29  ;;  %1453 = vmatprep.subr.mxu1 %v1117_v30  ;;  %v1161_v29 = vld [vmem:[#allocation6 + $0x8e8] sm:$0xff]  ;;  %v836_v30 = vsel %vm795_vm4, %v4427_v18, %v4428_v17 }
 0x1ac   : > { %1380 = vmatprep.subr.mxu0 %v1049_v32  ;;  %1454 = vmatpush2.msra.mxu1 %v1116_v33  ;;  %v861_v32 = vsel %vm782_vm3, %v4447_v23, %v4448_v22  ;;  %v5544_v33 = vsel %vm782_vm3, %v4432_v25, %v4433_v24  ;;  %v729_v17 = vld [vmem:[#allocation24 + $0xb8] sm:$0xff]  ;;  %v728_v18 = vld [vmem:[#allocation24 + $0xb0] sm:$0xff]  ;;  %v723_v23 = vld [vmem:[#allocation24 + $0x88] sm:$0xff] }
 0x1ad   : > { %1381 = vmatpush2.msra.mxu0 %v1048_v34  ;;  %1455 = vmatprep.subr.mxu1 %v1115_v35  ;;  %v1159_v34 = vld [vmem:[#allocation6 + $0x8d8] sm:$0xff]  ;;  %v1158_v35 = vld [vmem:[#allocation6 + $0x8d0] sm:$0xff]  ;;  %v724_v22 = vld [vmem:[#allocation24 + $0x90] sm:$0xff] }
 0x1ae   : > { %1382 = vmatprep.subr.mxu0 %v1047_v37  ;;  %1456 = vmatpush2.msra.mxu1 %v1114_v38  ;;  %v1157_v37 = vld [vmem:[#allocation6 + $0x8c8] sm:$0xff]  ;;  %v1156_v38 = vld [vmem:[#allocation6 + $0x8c0] sm:$0xff]  ;;  %v722_v24 = vld [vmem:[#allocation24 + $0x80] sm:$0xff] }
 0x1af   : > { %1383 = vmatpush2.msra.mxu0 %v1046_v40  ;;  %1457 = vmatprep.subr.mxu1 %v1113_v41  ;;  %v1155_v40 = vld [vmem:[#allocation6 + $0x8b8] sm:$0xff]  ;;  %v5551_v41 = vld [vmem:[#allocation24 + $0xf0] sm:$0xff]  ;;  %v721_v25 = vld [vmem:[#allocation24 + $0x78] sm:$0xff] }
 0x1b0   : > { %1384 = vmatprep.subr.mxu0 %v1045_v45  ;;  %1458 = vmatpush2.msra.mxu1 %v1112_v46  ;;  %v5554_v45 = vld [vmem:[#allocation24 + $0xe8] sm:$0xff]  ;;  %v1153_v46 = vld [vmem:[#allocation6 + $0x8a8] sm:$0xff] }
 0x1b1   : > { %1385 = vmatpush2.msra.mxu0 %v1044_v47  ;;  %1459 = vmatprep.subr.mxu1 %v1111_v48  ;;  %v1152_v47 = vld [vmem:[#allocation6 + $0x8a0] sm:$0xff]  ;;  %v1151_v48 = vld [vmem:[#allocation6 + $0x898] sm:$0xff] }
 0x1b2   : > { %1386 = vmatprep.subr.mxu0 %v1043_v50  ;;  %1460 = vmatpush2.msra.mxu1 %v1110_v51  ;;  %v1149_v50 = vld [vmem:[#allocation6 + $0x888] sm:$0xff]  ;;  %v1147_v51 = vld [vmem:[#allocation6 + $0x878] sm:$0xff] }
 0x1b3   : > { %1387 = vmatpush2.msra.mxu0 %v1042_v15  ;;  %1461 = vmatprep.subr.mxu1 %v1109_v53  ;;  %v1146_v15 = vld [vmem:[#allocation6 + $0x870] sm:$0xff]  ;;  %v1145_v53 = vld [vmem:[#allocation6 + $0x868] sm:$0xff] }
 0x1b4   : > { %1388 = vmatprep.subr.mxu0 %v1041_v57  ;;  %1462 = vmatpush2.msra.mxu1 %v1108_v58  ;;  %v1142_v57 = vld [vmem:[#allocation6 + $0x850] sm:$0xff]  ;;  %v1141_v58 = vld [vmem:[#allocation6 + $0x848] sm:$0xff] }
 0x1b5   : > { %1247 = vmatmul.mubr.f32.gmra.mxu0 %v4552_v6  ;;  %1463 = vmatprep.subr.mxu1 %v1107_v60  ;;  %v4441_v60 = vpop.permute.xlu1 %4440  ;;  %v1134_v6 = vld [vmem:[#allocation6 + $0x810] sm:$0xff] }
 0x1b6   : > { %1389 = vmatpush2.msra.mxu0 %v1040_v61  ;;  %1323 = vmatprep.mubr.f32.mxu1 %v5482_v36  ;;  %v1163_v36 = vld [vmem:[#allocation6 + $0x8f8] sm:$0xff]  ;;  %v4442_v4 = vunpack.i.l.bf16 %v4441_v60 }
 0x1b7   : > { %1390 = vmatprep.subr.mxu0 %v1039_v2  ;;  %1464 = vmatpush2.msra.mxu1 %v1106_v3  ;;  %v1139_v61 = vld [vmem:[#allocation6 + $0x838] sm:$0xff]  ;;  %v1136_v2 = vld [vmem:[#allocation6 + $0x820] sm:$0xff]  ;;  %v4443_v3 = vunpack.i.h.bf16 %v4441_v60 }
 0x1b8   : > { %1324 = vmatmul.mubr.f32.gmra.mxu1 %v797_v0  ;;  %1391 = vmatpush2.msra.mxu0 %v1038_v7  ;;  %v1133_v7 = vld [vmem:[#allocation6 + $0x808] sm:$0xff]  ;;  %v754_v60 = vld [vmem:[#allocation24 + $0x180] sm:$0xff] }
 0x1b9   : > { %1465 = vmatprep.subr.mxu1 %v1105_v52  ;;  %1392 = vmatprep.subr.mxu0 %v1037_v8  ;;  %v4451_v0 = vpop.permute.xlu1 %4450  ;;  %v1132_v52 = vld [vmem:[#allocation6 + $0x800] sm:$0xff]  ;;  %v872_v10 = vsel %vm795_vm4, %v4442_v4, %v4443_v3  ;;  %v749_v3 = vld [vmem:[#allocation24 + $0x158] sm:$0xff] }
 0x1ba   : > { %1466 = vmatpush2.msra.mxu1 %v1104_v11  ;;  %1393 = vmatpush2.msra.mxu0 %v1036_v12  ;;  %v4453_v8 = vunpack.i.h.bf16 %v4451_v0  ;;  %v4452_v9 = vunpack.i.l.bf16 %v4451_v0  ;;  %v734_v12 = vld [vmem:[#allocation24 + $0xe0] sm:$0xff]  ;;  %v748_v4 = vld [vmem:[#allocation24 + $0x150] sm:$0xff]  ;;  %v745_v0 = vld [vmem:[#allocation24 + $0x138] sm:$0xff] }
 0x1bb   : > { %1394 = vmatprep.mubr.f32.mxu0 %v835_v14  ;;  %1467 = vmatprep.subr.mxu1 %v1103_v16  ;;  %v732_v14 = vld [vmem:[#allocation24 + $0xd0] sm:$0xff]  ;;  %v731_v16 = vld [vmem:[#allocation24 + $0xc8] sm:$0xff] }
 0x1bc   : > { %1484 = vmatprep.subr.mxu0 %v1163_v36  ;;  %1395 = vmatmul.mubr.f32.vlgmr.msra.gmra.mxu0 %v5537_v19  ;;  %v873_v11 = vsel %vm795_vm4, %v4452_v9, %v4453_v8  ;;  %v727_v36 = vld [vmem:[#allocation24 + $0xa8] sm:$0xff]  ;;  %v742_v8 = vld [vmem:[#allocation24 + $0x120] sm:$0xff]  ;;  %v741_v9 = vld [vmem:[#allocation24 + $0x118] sm:$0xff] }
 0x1bd   : > { %1468 = vmatpush2.msra.mxu1 %v1102_v20  ;;  %1485 = vmatpush1.msra.mxu0 %v1162_v21  ;;  %v726_v20 = vld [vmem:[#allocation24 + $0xa0] sm:$0xff]  ;;  %v725_v21 = vld [vmem:[#allocation24 + $0x98] sm:$0xff] }
 0x1be   : > { %1469 = vmatprep.subr.mxu1 %v1101_v26  ;;  %1471 = vmatprep.mubr.f32.mxu1 %v860_v27  ;;  %v720_v26 = vld [vmem:[#allocation24 + $0x70] sm:$0xff]  ;;  %v719_v27 = vld [vmem:[#allocation24 + $0x68] sm:$0xff] }
 0x1bf   : > { %1470 = vmatpush2.msra.mxu1 %v1100_v28  ;;  %1486 = vmatprep.subr.mxu0 %v1161_v29  ;;  %v718_v28 = vld [vmem:[#allocation24 + $0x60] sm:$0xff]  ;;  %v717_v29 = vld [vmem:[#allocation24 + $0x58] sm:$0xff] }
 0x1c0   : > { %1400 = vmatprep.mubr.f32.mxu0 %v836_v30  ;;  %1472 = vmatmul.mubr.f32.vlgmr.msra.gmra.mxu1 %v5489_v44  ;;  %v1154_v44 = vld [vmem:[#allocation6 + $0x8b0] sm:$0xff]  ;;  %v716_v30 = vld [vmem:[#allocation24 + $0x50] sm:$0xff] }
 0x1c1   : > { %1487 = vmatpush1.msra.mxu0 %v1160_v31  ;;  %1477 = vmatprep.mubr.f32.mxu1 %v861_v32  ;;  %v715_v31 = vld [vmem:[#allocation24 + $0x48] sm:$0xff]  ;;  %v714_v32 = vld [vmem:[#allocation24 + $0x40] sm:$0xff] }
 0x1c2   : > { %1401 = vmatmul.mubr.f32.gmra.mxu0 %v5544_v33  ;;  %1488 = vmatprep.subr.mxu0 %v1159_v34  ;;  %v713_v34 = vld [vmem:[#allocation24 + $0x38] sm:$0xff] }
 0x1c3   : > { %1489 = vmatpush1.msra.mxu0 %v1158_v35  ;;  %1548 = vmatprep.mubr.f32.mxu0 %v5097_v43  ;;  %v712_v35 = vld [vmem:[#allocation24 + $0x30] sm:$0xff] }
 0x1c4   : > { %1490 = vmatprep.subr.mxu0 %v1157_v37  ;;  %1478 = vmatmul.mubr.f32.gmra.mxu1 %v5497_v56  ;;  %v1148_v56 = vld [vmem:[#allocation6 + $0x880] sm:$0xff] }
 0x1c5   : > { %1491 = vmatpush1.msra.mxu0 %v1156_v38  ;;  %1577 = vmatprep.subr.mxu1 %v5548_v39  ;;  %v711_v37 = vld [vmem:[#allocation24 + $0x28] sm:$0xff]  ;;  %v710_v38 = vld [vmem:[#allocation24 + $0x20] sm:$0xff] }
 0x1c6   : > { %1492 = vmatprep.subr.mxu0 %v1155_v40  ;;  %1578 = vmatpush1.msra.mxu1 %v5551_v41  ;;  %v708_v40 = vld [vmem:[#allocation24 + $0x10] sm:$0xff] }
 0x1c7   : > { %1493 = vmatpush1.msra.mxu0 %v1154_v44  ;;  %1579 = vmatprep.subr.mxu1 %v5554_v45  ;;  %v706_v44 = vld [vmem:[#allocation24] sm:$0xff] }
 0x1c8   : > { %1494 = vmatprep.subr.mxu0 %v1153_v46  ;;  %1580 = vmatpush1.msra.mxu1 %v734_v12  ;;  %v768_v46 = vld [vmem:[#allocation24 + $0x1f0] sm:$0xff] }
 0x1c9   : > { %1495 = vmatpush1.msra.mxu0 %v1152_v47  ;;  %1581 = vmatprep.subr.mxu1 %v733_v13  ;;  %v767_v47 = vld [vmem:[#allocation24 + $0x1e8] sm:$0xff] }
 0x1ca   : > { %1496 = vmatprep.subr.mxu0 %v1151_v48  ;;  %1582 = vmatpush1.msra.mxu1 %v732_v14  ;;  %v766_v48 = vld [vmem:[#allocation24 + $0x1e0] sm:$0xff] }
 0x1cb   : > { %1497 = vmatpush1.msra.mxu0 %v1150_v49  ;;  %1583 = vmatprep.subr.mxu1 %v731_v16  ;;  %v765_v49 = vld [vmem:[#allocation24 + $0x1d8] sm:$0xff] }
 0x1cc   : > { %1498 = vmatprep.subr.mxu0 %v1149_v50  ;;  %1584 = vmatpush1.msra.mxu1 %v730_v62  ;;  %v764_v50 = vld [vmem:[#allocation24 + $0x1d0] sm:$0xff] }
 0x1cd   : > { %1499 = vmatpush1.msra.mxu0 %v1148_v56  ;;  %1585 = vmatprep.subr.mxu1 %v729_v17  ;;  %v763_v56 = vld [vmem:[#allocation24 + $0x1c8] sm:$0xff] }
 0x1ce   : > { %1500 = vmatprep.subr.mxu0 %v1147_v51  ;;  %1586 = vmatpush1.msra.mxu1 %v728_v18  ;;  %v762_v51 = vld [vmem:[#allocation24 + $0x1c0] sm:$0xff] }
 0x1cf   : > { %1501 = vmatpush1.msra.mxu0 %v1146_v15  ;;  %1587 = vmatprep.subr.mxu1 %v727_v36  ;;  %v761_v15 = vld [vmem:[#allocation24 + $0x1b8] sm:$0xff] }
 0x1d0   : > { %1502 = vmatprep.subr.mxu0 %v1145_v53  ;;  %1588 = vmatpush1.msra.mxu1 %v726_v20  ;;  %v760_v53 = vld [vmem:[#allocation24 + $0x1b0] sm:$0xff] }
 0x1d1   : > { %1503 = vmatpush1.msra.mxu0 %v1144_v54  ;;  %1589 = vmatprep.subr.mxu1 %v725_v21  ;;  %v759_v54 = vld [vmem:[#allocation24 + $0x1a8] sm:$0xff] }
 0x1d2   : > { %1504 = vmatprep.subr.mxu0 %v1143_v55  ;;  %1590 = vmatpush1.msra.mxu1 %v724_v22  ;;  %v758_v55 = vld [vmem:[#allocation24 + $0x1a0] sm:$0xff] }
 0x1d3   : > { %1505 = vmatpush1.msra.mxu0 %v1142_v57  ;;  %1591 = vmatprep.subr.mxu1 %v723_v23  ;;  %v757_v57 = vld [vmem:[#allocation24 + $0x198] sm:$0xff] }
 0x1d4   : > { %1506 = vmatprep.subr.mxu0 %v1141_v58  ;;  %1592 = vmatpush1.msra.mxu1 %v722_v24  ;;  %v756_v58 = vld [vmem:[#allocation24 + $0x190] sm:$0xff] }
 0x1d5   : > { %1507 = vmatpush1.msra.mxu0 %v1140_v59  ;;  %1593 = vmatprep.subr.mxu1 %v721_v25  ;;  %v755_v59 = vld [vmem:[#allocation24 + $0x188] sm:$0xff] }
 0x1d6   : > { %1508 = vmatprep.subr.mxu0 %v1139_v61  ;;  %1594 = vmatpush1.msra.mxu1 %v720_v26  ;;  %v753_v61 = vld [vmem:[#allocation24 + $0x178] sm:$0xff] }
 0x1d7   : > { %1509 = vmatpush1.msra.mxu0 %v1138_v63  ;;  %1595 = vmatprep.subr.mxu1 %v719_v27  ;;  %v752_v63 = vld [vmem:[#allocation24 + $0x170] sm:$0xff] }
 0x1d8   : > { %1510 = vmatprep.subr.mxu0 %v1137_v1  ;;  %1596 = vmatpush1.msra.mxu1 %v718_v28  ;;  %v751_v1 = vld [vmem:[#allocation24 + $0x168] sm:$0xff] }
 0x1d9   : > { %1511 = vmatpush1.msra.mxu0 %v1136_v2  ;;  %1597 = vmatprep.subr.mxu1 %v717_v29  ;;  %v750_v2 = vld [vmem:[#allocation24 + $0x160] sm:$0xff] }
 0x1da   : > { %1512 = vmatprep.subr.mxu0 %v1135_v5  ;;  %1598 = vmatpush1.msra.mxu1 %v716_v30  ;;  %v747_v5 = vld [vmem:[#allocation24 + $0x148] sm:$0xff] }
 0x1db   : > { %1513 = vmatpush1.msra.mxu0 %v1134_v6  ;;  %1599 = vmatprep.subr.mxu1 %v715_v31  ;;  %v746_v6 = vld [vmem:[#allocation24 + $0x140] sm:$0xff] }
 0x1dc   : > { %1514 = vmatprep.subr.mxu0 %v1133_v7  ;;  %1600 = vmatpush1.msra.mxu1 %v714_v32  ;;  %v744_v7 = vld [vmem:[#allocation24 + $0x130] sm:$0xff] }
 0x1dd   : > { %1515 = vmatpush1.msra.mxu0 %v1132_v52  ;;  %1601 = vmatprep.subr.mxu1 %v713_v34  ;;  %v743_v52 = vld [vmem:[#allocation24 + $0x128] sm:$0xff] }
 0x1de   : > { %1549 = vmatmul.mubr.f32.vlgmr.msra.gmra.mxu0 %v872_v10  ;;  %1680 = vmatprep.subr.mxu0 %v5548_v39  ;;  %v709_v39 = vld [vmem:[#allocation24 + $0x18] sm:$0xff]  ;;  %v740_v10 = vld [vmem:[#allocation24 + $0x110] sm:$0xff] }
 0x1df   : > { %1554 = vmatprep.mubr.f32.mxu0 %v5097_v43  ;;  %1681 = vmatpush1.msra.mxu0 %v5551_v41  ;;  %v707_v41 = vld [vmem:[#allocation24 + $0x8] sm:$0xff] }
 0x1e0   : > { %1682 = vmatprep.subr.mxu0 %v5554_v45  ;;  %1602 = vmatpush1.msra.mxu1 %v712_v35  ;;  %v769_v45 = vld [vmem:[#allocation24 + $0x1f8] sm:$0xff] }
 0x1e1   : > { %1683 = vmatpush1.msra.mxu0 %v734_v12  ;;  %1603 = vmatprep.subr.mxu1 %v711_v37  ;;  %v738_v12 = vld [vmem:[#allocation24 + $0x100] sm:$0xff] }
 0x1e2   : > { %1555 = vmatmul.mubr.f32.gmra.mxu0 %v873_v11  ;;  %1684 = vmatprep.subr.mxu0 %v733_v13  ;;  %v739_v11 = vld [vmem:[#allocation24 + $0x108] sm:$0xff] }
 0x1e3   : > { %1685 = vmatpush1.msra.mxu0 %v732_v14  ;;  %1604 = vmatpush1.msra.mxu1 %v710_v38 }
 0x1e4   : > { %1686 = vmatprep.subr.mxu0 %v731_v16  ;;  %1605 = vmatprep.subr.mxu1 %v709_v39 }
 0x1e5   : > { %1687 = vmatpush1.msra.mxu0 %v730_v62  ;;  %1606 = vmatpush1.msra.mxu1 %v708_v40 }
 0x1e6   : > { %1688 = vmatprep.subr.mxu0 %v729_v17  ;;  %1607 = vmatprep.subr.mxu1 %v707_v41  ;;  %v5566_v17 = vshrl.u32 %v1166_v42, 7 }
 0x1e7   : > { %1689 = vmatpush1.msra.mxu0 %v728_v18  ;;  %1608 = vmatpush1.msra.mxu1 %v706_v44 }
 0x1e8   : > { %1690 = vmatprep.subr.mxu0 %v727_v36  ;;  %1609 = vmatprep.subr.mxu1 %v769_v45 }
 0x1e9   : > { %1691 = vmatpush1.msra.mxu0 %v726_v20  ;;  %1610 = vmatpush2.msra.mxu1 %v768_v46 }
 0x1ea   : > { %1692 = vmatprep.subr.mxu0 %v725_v21  ;;  %1611 = vmatprep.subr.mxu1 %v767_v47  ;;  %v5569_v21 = vsub.s32 0, %v5566_v17 }
 0x1eb   : > { %1693 = vmatpush1.msra.mxu0 %v724_v22  ;;  %1612 = vmatpush2.msra.mxu1 %v766_v48  ;;  %v1164_v22 = vld [vmem:[#allocation8] sm:$0x3] }
 0x1ec   : > { %1694 = vmatprep.subr.mxu0 %v723_v23  ;;  %1613 = vmatprep.subr.mxu1 %v765_v49 }
 0x1ed   : > { %1695 = vmatpush1.msra.mxu0 %v722_v24  ;;  %1614 = vmatpush2.msra.mxu1 %v764_v50  ;;  %v5572_v24 = vsub.s32 1, %v5566_v17 }
 0x1ee   : > { %1696 = vmatprep.subr.mxu0 %v721_v25  ;;  %1615 = vmatprep.subr.mxu1 %v763_v56 }
 0x1ef   : > { %1697 = vmatpush1.msra.mxu0 %v720_v26  ;;  %1616 = vmatpush2.msra.mxu1 %v762_v51  ;;  %v1169_v26 = vrot.slane %v1164_v22, %v5569_v21 }
 0x1f0   : > { %1698 = vmatprep.subr.mxu0 %v719_v27  ;;  %1617 = vmatprep.subr.mxu1 %v761_v15 }
 0x1f1   : > { %1699 = vmatpush1.msra.mxu0 %v718_v28  ;;  %1618 = vmatpush2.msra.mxu1 %v760_v53 }
 0x1f2   : > { %1700 = vmatprep.subr.mxu0 %v717_v29  ;;  %1619 = vmatprep.subr.mxu1 %v759_v54  ;;  %v1173_v29 = vrot.slane %v1164_v22, %v5572_v24  ;;  %v1817_v22 = vld [vmem:[#allocation15 + $0x50] sm:$0xff] }
 0x1f3   : > { %1701 = vmatpush1.msra.mxu0 %v716_v30  ;;  %1620 = vmatpush2.msra.mxu1 %v758_v55 }
 0x1f4   : > { %1702 = vmatprep.subr.mxu0 %v715_v31  ;;  %1621 = vmatprep.subr.mxu1 %v757_v57 }
 0x1f5   : > { %1703 = vmatpush1.msra.mxu0 %v714_v32  ;;  %1622 = vmatpush2.msra.mxu1 %v756_v58 }
 0x1f6   : > { %1704 = vmatprep.subr.mxu0 %v713_v34  ;;  %1623 = vmatprep.subr.mxu1 %v755_v59 }
 0x1f7   : > { %1705 = vmatpush1.msra.mxu0 %v712_v35  ;;  %1624 = vmatpush2.msra.mxu1 %v754_v60 }
 0x1f8   : > { %1706 = vmatprep.subr.mxu0 %v711_v37  ;;  %1625 = vmatprep.subr.mxu1 %v753_v61 }
 0x1f9   : > { %1707 = vmatpush1.msra.mxu0 %v710_v38  ;;  %1626 = vmatpush2.msra.mxu1 %v752_v63 }
 0x1fa   : > { %1708 = vmatprep.subr.mxu0 %v709_v39  ;;  %1627 = vmatprep.subr.mxu1 %v751_v1 }
 0x1fb   : > { %1709 = vmatpush1.msra.mxu0 %v708_v40  ;;  %1628 = vmatpush2.msra.mxu1 %v750_v2 }
 0x1fc   : > { %1710 = vmatprep.subr.mxu0 %v707_v41  ;;  %1629 = vmatprep.subr.mxu1 %v749_v3 }
 0x1fd   : > { %1711 = vmatpush1.msra.mxu0 %v706_v44  ;;  %1630 = vmatpush2.msra.mxu1 %v748_v4 }
 0x1fe   : > { %1712 = vmatprep.subr.mxu0 %v769_v45  ;;  %1631 = vmatprep.subr.mxu1 %v747_v5 }
 0x1ff   : > { %1713 = vmatpush2.msra.mxu0 %v768_v46  ;;  %1632 = vmatpush2.msra.mxu1 %v746_v6 }
 0x200   : > { %1714 = vmatprep.subr.mxu0 %v767_v47  ;;  %1633 = vmatprep.subr.mxu1 %v745_v0 }
 0x201   : > { %1715 = vmatpush2.msra.mxu0 %v766_v48  ;;  %1634 = vmatpush2.msra.mxu1 %v744_v7 }
 0x202   : > { %1716 = vmatprep.subr.mxu0 %v765_v49  ;;  %1635 = vmatprep.subr.mxu1 %v743_v52 }
 0x203   : > { %1717 = vmatpush2.msra.mxu0 %v764_v50  ;;  %1636 = vmatpush2.msra.mxu1 %v742_v8 }
 0x204   : > { %1718 = vmatprep.subr.mxu0 %v763_v56  ;;  %1637 = vmatprep.subr.mxu1 %v741_v9 }
 0x205   : > { %1719 = vmatpush2.msra.mxu0 %v762_v51  ;;  %1638 = vmatpush2.msra.mxu1 %v740_v10 }
 0x206   : > { %1720 = vmatprep.subr.mxu0 %v761_v15  ;;  %1639 = vmatprep.subr.mxu1 %v739_v11 }
 0x207   : > { %1721 = vmatpush2.msra.mxu0 %v760_v53  ;;  %1640 = vmatpush2.msra.mxu1 %v738_v12 }
 0x208   : > { %1722 = vmatprep.subr.mxu0 %v759_v54 }
 0x209   : > { %1723 = vmatpush2.msra.mxu0 %v758_v55 }
 0x20a   : > { %1724 = vmatprep.subr.mxu0 %v757_v57 }
 0x20b   : > { %1725 = vmatpush2.msra.mxu0 %v756_v58 }
 0x20c   : > { %1726 = vmatprep.subr.mxu0 %v755_v59 }
 0x20d   : > { %1727 = vmatpush2.msra.mxu0 %v754_v60 }
 0x20e   : > { %1728 = vmatprep.subr.mxu0 %v753_v61 }
 0x20f   : > { %1729 = vmatpush2.msra.mxu0 %v752_v63 }
 0x210   : > { %1730 = vmatprep.subr.mxu0 %v751_v1 }
 0x211   : > { %1731 = vmatpush2.msra.mxu0 %v750_v2 }
 0x212   : > { %1732 = vmatprep.subr.mxu0 %v749_v3 }
 0x213   : > { %1733 = vmatpush2.msra.mxu0 %v748_v4 }
 0x214   : > { %1734 = vmatprep.subr.mxu0 %v747_v5 }
 0x215   : > { %1735 = vmatpush2.msra.mxu0 %v746_v6 }
 0x216   : > { %1736 = vmatprep.subr.mxu0 %v745_v0 }
 0x217   : > { %1737 = vmatpush2.msra.mxu0 %v744_v7 }
 0x218   : > { %1738 = vmatprep.subr.mxu0 %v743_v52 }
 0x219   : > { %1739 = vmatpush2.msra.mxu0 %v742_v8 }
 0x21a   : > { %1740 = vmatprep.subr.mxu0 %v741_v9 }
 0x21b   : > { %1741 = vmatpush2.msra.mxu0 %v740_v10 }
 0x21c   : > { %1742 = vmatprep.subr.mxu0 %v739_v11 }
 0x21d   : > { %1743 = vmatpush2.msra.mxu0 %v738_v12  ;;  %v1799_v12 = vld [vmem:[%s592_s7] sm:$0x1] }
 0x23a   : > { %v1242_v13 = vpop.f32.mrf.mxu0 }
 0x23b   : > { %v1243_v42 = vadd.f32 %v1242_v13, %v1169_v26  ;;  %v4193_v13 = vmul.f32 -1.442695, %v1799_v12 }
 0x23c   : > { %v1244_v14 = vpop.f32.mrf.mxu0 }
 0x23d   : > { %v1319_v16 = vpop.f32.mrf.mxu1  ;;  %v1245_v34 = vadd.f32 %v1244_v14, %v1173_v29  ;;  %4524 = vpow2.f32 %v4193_v13  ;;  %v2310_v13 = vld [vmem:[#allocation9 + $0xb0] sm:$0xff] }
 0x23e   : > { %v1320_v37 = vadd.f32 %v1319_v16, %v1243_v42  ;;  %v1820_v16 = vld [vmem:[#allocation15 + $0x68] sm:$0xff] }
 0x23f   : > { %v1321_v18 = vpop.f32.mrf.mxu1  ;;  %1873 = vmatprep.subr.mxu0 %v1820_v16  ;;  %v2308_v16 = vld [vmem:[#allocation9 + $0xa0] sm:$0xff] }
 0x240   : > { %v1322_v41 = vadd.f32 %v1321_v18, %v1245_v34  ;;  %v1822_v18 = vld [vmem:[#allocation15 + $0x78] sm:$0xff] }
 0x241   : > { %1944 = vmatprep.subr.mxu1 %v1822_v18  ;;  %v2306_v18 = vld [vmem:[#allocation9 + $0x90] sm:$0xff] }
 0x24a   : > { %v4525_v14 = vpop.eup %4524 }
 0x275   : > { %v1248_v62 = vpop.f32.mrf.mxu0 }
 0x276   : > { %v1249_v30 = vadd.f32 %v1248_v62, %v1169_v26  ;;  %v1803_v62 = vadd.f32 1.0, %v4525_v14  ;;  %v1810_v26 = vld [vmem:[#allocation15 + $0x18] sm:$0xff]  ;;  %v2309_v14 = vld [vmem:[#allocation9 + $0xa8] sm:$0xff] }
 0x277   : > { %v1250_v36 = vpop.f32.mrf.mxu0 }
 0x278   : > { %v1325_v20 = vpop.f32.mrf.mxu1  ;;  %v1251_v35 = vadd.f32 %v1250_v36, %v1173_v29  ;;  %4526 = vrcp.f32 %v1803_v62  ;;  %v1821_v36 = vld [vmem:[#allocation15 + $0x70] sm:$0xff] }
 0x279   : > { %v1326_v38 = vadd.f32 %v1325_v20, %v1249_v30  ;;  %v1818_v20 = vld [vmem:[#allocation15 + $0x58] sm:$0xff] }
 0x27a   : > { %v1327_v25 = vpop.f32.mrf.mxu1  ;;  %v2307_v62 = vld [vmem:[#allocation9 + $0x98] sm:$0xff] }
 0x27b   : > { %v1328_v44 = vadd.f32 %v1327_v25, %v1251_v35  ;;  %v1813_v25 = vld [vmem:[#allocation15 + $0x30] sm:$0xff] }
 0x27c   : > { %v1396_v23 = vpop.f32.mrf.mxu0 }
 0x27d   : > { %v1397_v45 = vadd.f32 %v1396_v23, %v1320_v37  ;;  %v1814_v23 = vld [vmem:[#allocation15 + $0x38] sm:$0xff] }
 0x27e   : > { %v1398_v27 = vpop.f32.mrf.mxu0 }
 0x27f   : > { %v1399_v48 = vadd.f32 %v1398_v27, %v1322_v41  ;;  %v1809_v27 = vld [vmem:[#allocation15 + $0x10] sm:$0xff] }
 0x280   : > { %v1473_v28 = vpop.f32.mrf.mxu1 }
 0x281   : > { %v1474_v51 = vadd.f32 %v1473_v28, %v1397_v45 }
 0x282   : > { %v1402_v31 = vpop.f32.mrf.mxu0  ;;  %v1475_v32 = vpop.f32.mrf.mxu1 }
 0x283   : > { %v1403_v46 = vadd.f32 %v1402_v31, %v1326_v38  ;;  %v1476_v54 = vadd.f32 %v1475_v32, %v1399_v48 }
 0x284   : > { %v1404_v39 = vpop.f32.mrf.mxu0  ;;  %v1479_v40 = vpop.f32.mrf.mxu1 }
 0x285   : > { %v1405_v49 = vadd.f32 %v1404_v39, %v1328_v44  ;;  %v1480_v15 = vadd.f32 %v1479_v40, %v1403_v46  ;;  %v4527_v28 = vpop.eup %4526 }
 0x286   : > { %v1481_v50 = vpop.f32.mrf.mxu1  ;;  %v1806_v29 = vmul.f32 %v4527_v28, %v1799_v12  ;;  %v2311_v12 = vld [vmem:[#allocation9 + $0xb8] sm:$0xff]  ;;  %v2298_v28 = vld [vmem:[#allocation9 + $0x50] sm:$0xff] }
 0x287   : > { %v1482_v55 = vadd.f32 %v1481_v50, %v1405_v49 }
 0x29e   : > { %v1550_v47 = vpop.f32.mrf.mxu0 }
 0x29f   : > { %v1551_v57 = vadd.f32 %v1550_v47, %v1474_v51 }
 0x2a0   : > { %v1552_v56 = vpop.f32.mrf.mxu0 }
 0x2a1   : > { %v1553_v60 = vadd.f32 %v1552_v56, %v1476_v54 }
 0x2a2   : > { %v1556_v53 = vpop.f32.mrf.mxu0 }
 0x2a3   : > { %v1557_v58 = vadd.f32 %v1556_v53, %v1480_v15 }
 0x2a4   : > { %v1558_v59 = vpop.f32.mrf.mxu0 }
 0x2a5   : > { %v1563_v61 = vadd.f32 %v1557_v58, %v1551_v57  ;;  %v1559_v63 = vadd.f32 %v1558_v59, %v1482_v55 }
 0x2a7   : > { %v1564_v1 = vrot.slane %v1563_v61, 4  ;;  %v1570_v2 = vadd.f32 %v1559_v63, %v1553_v60 }
 0x2a9   : > { %v1565_v3 = vadd.f32 %v1564_v1, %v1563_v61  ;;  %v1571_v4 = vrot.slane %v1570_v2, 4  ;;  %v1819_v61 = vld [vmem:[#allocation15 + $0x60] sm:$0xff] }
 0x2aa   : > { %v1815_v1 = vld [vmem:[#allocation15 + $0x40] sm:$0xff] }
 0x2ab   : > { %v1566_v5 = vrot.slane %v1565_v3, 2  ;;  %v1572_v6 = vadd.f32 %v1571_v4, %v1570_v2  ;;  %v1812_v2 = vld [vmem:[#allocation15 + $0x28] sm:$0xff] }
 0x2ac   : > { %v1808_v4 = vld [vmem:[#allocation15 + $0x8] sm:$0xff] }
 0x2ad   : > { %v1567_v0 = vadd.f32 %v1566_v5, %v1565_v3  ;;  %v1573_v7 = vrot.slane %v1572_v6, 2  ;;  %v1811_v3 = vld [vmem:[#allocation15 + $0x20] sm:$0xff] }
 0x2ae   : > { %v1807_v5 = vld [vmem:[#allocation15] sm:$0xff] }
 0x2af   : > { %v1574_v52 = vadd.f32 %v1573_v7, %v1572_v6  ;;  %v1568_v8 = vrot.slane %v1567_v0, 1  ;;  %v2319_v6 = vld [vmem:[#allocation9 + $0xf8] sm:$0xff]  ;;  %v2317_v7 = vld [vmem:[#allocation9 + $0xe8] sm:$0xff] }
 0x2b1   : > { %v1575_v9 = vrot.slane %v1574_v52, 1  ;;  %v1569_v11 = vadd.f32 %v1568_v8, %v1567_v0  ;;  %v2318_v0 = vld [vmem:[#allocation9 + $0xf0] sm:$0xff]  ;;  %v2315_v8 = vld [vmem:[#allocation9 + $0xd8] sm:$0xff] }
 0x2b3   : > { %v1576_v10 = vadd.f32 %v1575_v9, %v1574_v52  ;;  %v2316_v52 = vld [vmem:[#allocation9 + $0xe0] sm:$0xff]  ;;  %v2314_v9 = vld [vmem:[#allocation9 + $0xd0] sm:$0xff] }
 0x2b5   : > { %1641 = vmatprep.mubr.f32.mxu1 %v1576_v10  ;;  %v2313_v10 = vld [vmem:[#allocation9 + $0xc8] sm:$0xff] }
 0x2b6   : > { %1642 = vmatmul.mubr.f32.vlgmr.msra.gmra.mxu1 %v1569_v11  ;;  %v2312_v11 = vld [vmem:[#allocation9 + $0xc0] sm:$0xff] }
 0x2b7   : > { %1984 = vmatprep.mubr.f32.mxu1 %v5097_v43  ;;  %1945 = vmatpush1.msra.mxu1 %v1821_v36  ;;  %v2305_v36 = vld [vmem:[#allocation9 + $0x88] sm:$0xff] }
 0x2b8   : > { %1946 = vmatprep.subr.mxu1 %v1818_v20  ;;  %v2304_v20 = vld [vmem:[#allocation9 + $0x80] sm:$0xff] }
 0x2b9   : > { %1947 = vmatpush1.msra.mxu1 %v1817_v22  ;;  %v2303_v22 = vld [vmem:[#allocation9 + $0x78] sm:$0xff] }
 0x2ba   : > { %1948 = vmatprep.subr.mxu1 %v1814_v23  ;;  %v2302_v23 = vld [vmem:[#allocation9 + $0x70] sm:$0xff] }
 0x2bb   : > { %1949 = vmatpush1.msra.mxu1 %v1813_v25  ;;  %v2301_v25 = vld [vmem:[#allocation9 + $0x68] sm:$0xff] }
 0x2bc   : > { %1950 = vmatprep.subr.mxu1 %v1810_v26  ;;  %v2300_v26 = vld [vmem:[#allocation9 + $0x60] sm:$0xff] }
 0x2bd   : > { %1951 = vmatpush1.msra.mxu1 %v1809_v27  ;;  %v2299_v27 = vld [vmem:[#allocation9 + $0x58] sm:$0xff] }
 0x2be   : > { %4195 = vmatmul.mubr.msk.f32.vlgmr.msra.gmra.mxu1 %vm1845_vm5, %v1806_v29  ;;  %2876 = vmatprep.subr.mxu1 %v2319_v6 }
 0x2bf   : > { %2877 = vmatpush1.msra.mxu1 %v2318_v0 }
 0x2c0   : > { %2878 = vmatprep.subr.mxu1 %v2317_v7  ;;  %v1823_v7 = vld [vmem:[#allocation17] sm:$0xf] }
 0x2c1   : > { %2879 = vmatpush1.msra.mxu1 %v2316_v52  ;;  %v1828_v52 = vrot.slane %v1823_v7, %v5569_v21 }
 0x2c2   : > { %2880 = vmatprep.subr.mxu1 %v2315_v8 }
 0x2c3   : > { %2881 = vmatpush1.msra.mxu1 %v2314_v9  ;;  %v1835_v9 = vsub.s32 2, %v5566_v17 }
 0x2c4   : > { %2882 = vmatprep.subr.mxu1 %v2313_v10 }
 0x2c5   : > { %2883 = vmatpush1.msra.mxu1 %v2312_v11  ;;  %v1832_v11 = vrot.slane %v1823_v7, %v5572_v24 }
 0x2c6   : > { %2884 = vmatprep.subr.mxu1 %v2311_v12 }
 0x2c7   : > { %2885 = vmatpush1.msra.mxu1 %v2310_v13  ;;  %v1561_v13 = vld [vmem:[#allocation18] sm:$0x3] }
 0x2c8   : > { %2886 = vmatprep.subr.mxu1 %v2309_v14  ;;  %v1836_v14 = vrot.slane %v1823_v7, %v1835_v9 }
 0x2c9   : > { %2887 = vmatpush1.msra.mxu1 %v2308_v16  ;;  %v1839_v16 = vsub.s32 3, %v5566_v17 }
 0x2ca   : > { %2888 = vmatprep.subr.mxu1 %v2307_v62  ;;  %v1562_v62 = vld [vmem:[#allocation20] sm:$0x3] }
 0x2cb   : > { %2889 = vmatpush1.msra.mxu1 %v2306_v18 }
 0x2cc   : > { %2890 = vmatprep.subr.mxu1 %v2305_v36 }
 0x2cd   : > { %2891 = vmatpush1.msra.mxu1 %v2304_v20 }
 0x2ce   : > { %2892 = vmatprep.subr.mxu1 %v2303_v22 }
 0x2cf   : > { %2893 = vmatpush1.msra.mxu1 %v2302_v23 }
 0x2d0   : > { %2894 = vmatprep.subr.mxu1 %v2301_v25  ;;  %v1773_v25 = vrot.slane %v1561_v13, %v5569_v21 }
 0x2d1   : > { %2895 = vmatpush1.msra.mxu1 %v2300_v26 }
 0x2d2   : > { %2896 = vmatprep.subr.mxu1 %v2299_v27  ;;  %v1788_v27 = vrot.slane %v1562_v62, %v5569_v21 }
 0x2d3   : > { %2897 = vmatpush1.msra.mxu1 %v2298_v28 }
 0x376   : > { %v1643_v42 = vpop.f32.mrf.mxu1 }
 0x377   : > { %v1648_v30 = vmul.f32 0.001953125, %v1643_v42  ;;  %v2296_v42 = vld [vmem:[#allocation9 + $0x40] sm:$0xff] }
 0x378   : > { %v1645_v31 = vpop.f32.mrf.mxu1 }
 0x379   : > { %v1653_v32 = vrot.slane %v1648_v30, %v5569_v21  ;;  %v1649_v34 = vmul.f32 0.001953125, %v1645_v31  ;;  %v2295_v30 = vld [vmem:[#allocation9 + $0x38] sm:$0xff]  ;;  %v2294_v31 = vld [vmem:[#allocation9 + $0x30] sm:$0xff] }
 0x37b   : > { %v5581_v35 = vsub.f32 %v1551_v57, %v1653_v32  ;;  %v5583_v37 = vsub.f32 %v1557_v58, %v1653_v32  ;;  %v1657_v38 = vrot.slane %v1649_v34, %v5569_v21  ;;  %v2293_v32 = vld [vmem:[#allocation9 + $0x28] sm:$0xff]  ;;  %v2292_v34 = vld [vmem:[#allocation9 + $0x20] sm:$0xff] }
 0x37d   : > { %v1662_v39 = vmul.f32 %v5581_v35, %v5581_v35  ;;  %v1664_v40 = vmul.f32 %v5583_v37, %v5583_v37  ;;  %v5590_v41 = vsub.f32 %v1553_v60, %v1657_v38  ;;  %v5592_v44 = vsub.f32 %v1559_v63, %v1657_v38  ;;  %v1816_v63 = vld [vmem:[#allocation15 + $0x48] sm:$0xff]  ;;  %v2291_v38 = vld [vmem:[#allocation9 + $0x18] sm:$0xff] }
 0x37e   : > { %v1986_v18 = vpop.f32.mrf.mxu1 }
 0x37f   : > { %v1666_v45 = vadd.f32 %v1664_v40, %v1662_v39  ;;  %v1663_v46 = vmul.f32 %v5590_v41, %v5590_v41  ;;  %v1665_v47 = vmul.f32 %v5592_v44, %v5592_v44  ;;  %v2290_v39 = vld [vmem:[#allocation9 + $0x10] sm:$0xff]  ;;  %v2289_v40 = vld [vmem:[#allocation9 + $0x8] sm:$0xff]  ;;  %v1987_v28 = vadd.f32 %v1986_v18, %v1836_v14 }
 0x380   : > { %v2329_v14 = vld [vmem:[#allocation9 + $0x148] sm:$0xff]  ;;  %v2326_v18 = vld [vmem:[#allocation9 + $0x130] sm:$0xff] }
 0x381   : > { %v1667_v48 = vrot.slane %v1666_v45, 4  ;;  %v1673_v49 = vadd.f32 %v1665_v47, %v1663_v46  ;;  %v2351_v46 = vld [vmem:[#allocation9 + $0x1f8] sm:$0xff]  ;;  %v2350_v47 = vld [vmem:[#allocation9 + $0x1f0] sm:$0xff] }
 0x383   : > { %v1668_v50 = vadd.f32 %v1667_v48, %v1666_v45  ;;  %v1674_v56 = vrot.slane %v1673_v49, 4  ;;  %v2288_v45 = vld [vmem:[#allocation9] sm:$0xff]  ;;  %v2349_v48 = vld [vmem:[#allocation9 + $0x1e8] sm:$0xff] }
 0x385   : > { %v1669_v51 = vrot.slane %v1668_v50, 2  ;;  %v1675_v15 = vadd.f32 %v1674_v56, %v1673_v49  ;;  %v2348_v49 = vld [vmem:[#allocation9 + $0x1e0] sm:$0xff]  ;;  %v2346_v56 = vld [vmem:[#allocation9 + $0x1d0] sm:$0xff] }
 0x387   : > { %v1670_v53 = vadd.f32 %v1669_v51, %v1668_v50  ;;  %v1676_v54 = vrot.slane %v1675_v15, 2  ;;  %v2347_v50 = vld [vmem:[#allocation9 + $0x1d8] sm:$0xff]  ;;  %v2345_v51 = vld [vmem:[#allocation9 + $0x1c8] sm:$0xff] }
 0x389   : > { %v1677_v55 = vadd.f32 %v1676_v54, %v1675_v15  ;;  %v1671_v57 = vrot.slane %v1670_v53, 1  ;;  %v2344_v15 = vld [vmem:[#allocation9 + $0x1c0] sm:$0xff]  ;;  %v2342_v54 = vld [vmem:[#allocation9 + $0x1b0] sm:$0xff] }
 0x38b   : > { %v1678_v58 = vrot.slane %v1677_v55, 1  ;;  %v1672_v60 = vadd.f32 %v1671_v57, %v1670_v53  ;;  %v2343_v53 = vld [vmem:[#allocation9 + $0x1b8] sm:$0xff]  ;;  %v2340_v57 = vld [vmem:[#allocation9 + $0x1a0] sm:$0xff] }
 0x38d   : > { %v1679_v59 = vadd.f32 %v1678_v58, %v1677_v55  ;;  %v2341_v55 = vld [vmem:[#allocation9 + $0x1a8] sm:$0xff]  ;;  %v2339_v58 = vld [vmem:[#allocation9 + $0x198] sm:$0xff] }
 0x38f   : > { %1744 = vmatprep.mubr.f32.mxu0 %v1679_v59  ;;  %v2338_v59 = vld [vmem:[#allocation9 + $0x190] sm:$0xff] }
 0x390   : > { %1745 = vmatmul.mubr.f32.vlgmr.msra.gmra.mxu0 %v1672_v60  ;;  %v2337_v60 = vld [vmem:[#allocation9 + $0x188] sm:$0xff] }
 0x391   : > { %1874 = vmatpush1.msra.mxu0 %v1819_v61  ;;  %1913 = vmatprep.mubr.f32.mxu0 %v5097_v43  ;;  %v2336_v61 = vld [vmem:[#allocation9 + $0x180] sm:$0xff] }
 0x392   : > { %1875 = vmatprep.subr.mxu0 %v1816_v63  ;;  %v2335_v63 = vld [vmem:[#allocation9 + $0x178] sm:$0xff] }
 0x393   : > { %1876 = vmatpush1.msra.mxu0 %v1815_v1  ;;  %v2334_v1 = vld [vmem:[#allocation9 + $0x170] sm:$0xff] }
 0x394   : > { %1877 = vmatprep.subr.mxu0 %v1812_v2 }
 0x395   : > { %1878 = vmatpush1.msra.mxu0 %v1811_v3 }
 0x396   : > { %1879 = vmatprep.subr.mxu0 %v1808_v4 }
 0x397   : > { %1880 = vmatpush1.msra.mxu0 %v1807_v5 }
 0x398   : > { %4194 = vmatmul.mubr.msk.f32.vlgmr.msra.gmra.mxu0 %vm1845_vm5, %v1806_v29  ;;  %v2297_v29 = vld [vmem:[#allocation9 + $0x48] sm:$0xff] }
 0x399   : > { %2898 = vmatprep.subr.mxu1 %v2297_v29  ;;  %v1840_v29 = vrot.slane %v1823_v7, %v1839_v16  ;;  %v2328_v16 = vld [vmem:[#allocation9 + $0x140] sm:$0xff] }
 0x39a   : > { %2899 = vmatpush1.msra.mxu1 %v2296_v42 }
 0x39b   : > { %2900 = vmatprep.subr.mxu1 %v2295_v30 }
 0x39c   : > { %2901 = vmatpush1.msra.mxu1 %v2294_v31  ;;  %v1777_v31 = vrot.slane %v1561_v13, %v5572_v24  ;;  %v2330_v13 = vld [vmem:[#allocation9 + $0x150] sm:$0xff] }
 0x39d   : > { %2902 = vmatprep.subr.mxu1 %v2293_v32  ;;  %v1988_v32 = vpop.f32.mrf.mxu1 }
 0x39e   : > { %2903 = vmatpush1.msra.mxu1 %v2292_v34 }
 0x39f   : > { %2904 = vmatprep.subr.mxu1 %v2291_v38  ;;  %v1792_v38 = vrot.slane %v1562_v62, %v5572_v24  ;;  %v2327_v62 = vld [vmem:[#allocation9 + $0x138] sm:$0xff] }
 0x3a0   : > { %2905 = vmatpush1.msra.mxu1 %v2290_v39 }
 0x3a1   : > { %2906 = vmatprep.subr.mxu1 %v2289_v40 }
 0x3a2   : > { %2907 = vmatpush1.msra.mxu1 %v2288_v45 }
 0x3a3   : > { %2908 = vmatprep.subr.mxu1 %v2351_v46 }
 0x3a4   : > { %2909 = vmatpush2.msra.mxu1 %v2350_v47 }
 0x3a5   : > { %2910 = vmatprep.subr.mxu1 %v2349_v48  ;;  %v1989_v48 = vadd.f32 %v1988_v32, %v1840_v29  ;;  %v2320_v29 = vld [vmem:[#allocation9 + $0x100] sm:$0xff] }
 0x3a6   : > { %2911 = vmatpush2.msra.mxu1 %v2348_v49 }
 0x3a7   : > { %2912 = vmatprep.subr.mxu1 %v2347_v50 }
 0x3a8   : > { %2913 = vmatpush2.msra.mxu1 %v2346_v56 }
 0x3a9   : > { %2914 = vmatprep.subr.mxu1 %v2345_v51 }
 0x3aa   : > { %2915 = vmatpush2.msra.mxu1 %v2344_v15 }
 0x3ab   : > { %2916 = vmatprep.subr.mxu1 %v2343_v53 }
 0x3ac   : > { %2917 = vmatpush2.msra.mxu1 %v2342_v54 }
 0x3ad   : > { %2918 = vmatprep.subr.mxu1 %v2341_v55 }
 0x3ae   : > { %2919 = vmatpush2.msra.mxu1 %v2340_v57  ;;  %v2012_v57 = vrot.slane %v1989_v48, %v5569_v21  ;;  %v2376_v48 = vld [vmem:[#allocation9 + $0x2c0] sm:$0xff] }
 0x3af   : > { %2920 = vmatprep.subr.mxu1 %v2339_v58 }
 0x3b0   : > { %2921 = vmatpush2.msra.mxu1 %v2338_v59 }
 0x3b1   : > { %2922 = vmatprep.subr.mxu1 %v2337_v60 }
 0x3b2   : > { %2923 = vmatpush2.msra.mxu1 %v2336_v61 }
 0x3b3   : > { %2924 = vmatprep.subr.mxu1 %v2335_v63 }
 0x3b4   : > { %2925 = vmatpush2.msra.mxu1 %v2334_v1 }
 0x450   : > { %v1746_v2 = vpop.f32.mrf.mxu0 }
 0x451   : > { %v1751_v3 = vmul.f32 0.001953125, %v1746_v2 }
 0x452   : > { %v1748_v4 = vpop.f32.mrf.mxu0 }
 0x453   : > { %v1753_v5 = vadd.f32 1e-05, %v1751_v3  ;;  %v1752_v6 = vmul.f32 0.001953125, %v1748_v4 }
 0x455   : > { %4528 = vrsqrt.f32 %v1753_v5  ;;  %v1754_v0 = vadd.f32 1e-05, %v1752_v6 }
 0x457   : > { %4530 = vrsqrt.f32 %v1754_v0 }
 0x458   : > { %v1915_v8 = vpop.f32.mrf.mxu0 }
 0x459   : > { %v1916_v10 = vadd.f32 %v1915_v8, %v1828_v52 }
 0x45a   : > { %v1917_v12 = vpop.f32.mrf.mxu0 }
 0x45b   : > { %v1991_v20 = vadd.f32 1.0, %v1916_v10  ;;  %v1918_v22 = vadd.f32 %v1917_v12, %v1832_v11  ;;  %v2333_v10 = vld [vmem:[#allocation9 + $0x168] sm:$0xff]  ;;  %v2332_v11 = vld [vmem:[#allocation9 + $0x160] sm:$0xff]  ;;  %v2331_v12 = vld [vmem:[#allocation9 + $0x158] sm:$0xff] }
 0x45c   : > { %2926 = vmatprep.subr.mxu1 %v2333_v10  ;;  %v2411_v10 = vld [vmem:[#allocation9 + $0x3d8] sm:$0xff] }
 0x45d   : > { %v1996_v34 = vrot.slane %v1991_v20, %v5569_v21  ;;  %v1992_v39 = vadd.f32 1.0, %v1918_v22  ;;  %2927 = vmatpush2.msra.mxu1 %v2332_v11  ;;  %v2324_v20 = vld [vmem:[#allocation9 + $0x120] sm:$0xff]  ;;  %v2410_v11 = vld [vmem:[#allocation9 + $0x3d0] sm:$0xff] }
 0x45e   : > { %2928 = vmatprep.subr.mxu1 %v2331_v12  ;;  %v2409_v12 = vld [vmem:[#allocation9 + $0x3c8] sm:$0xff] }
 0x45f   : > { %v2000_v51 = vrot.slane %v1992_v39, %v5569_v21  ;;  %2929 = vmatpush2.msra.mxu1 %v2330_v13  ;;  %v2381_v39 = vld [vmem:[#allocation9 + $0x2e8] sm:$0xff]  ;;  %v2408_v13 = vld [vmem:[#allocation9 + $0x3c0] sm:$0xff] }
 0x460   : > { %2930 = vmatprep.subr.mxu1 %v2329_v14  ;;  %v2407_v14 = vld [vmem:[#allocation9 + $0x3b8] sm:$0xff] }
 0x461   : > { %2931 = vmatpush2.msra.mxu1 %v2328_v16  ;;  %v2406_v16 = vld [vmem:[#allocation9 + $0x3b0] sm:$0xff] }
 0x462   : > { %v4529_v36 = vpop.eup %4528  ;;  %2932 = vmatprep.subr.mxu1 %v2327_v62  ;;  %v2405_v62 = vld [vmem:[#allocation9 + $0x3a8] sm:$0xff] }
 0x463   : > { %v1760_v23 = vrot.slane %v4529_v36, %v5569_v21  ;;  %2933 = vmatpush2.msra.mxu1 %v2326_v18  ;;  %v2325_v36 = vld [vmem:[#allocation9 + $0x128] sm:$0xff]  ;;  %v2404_v18 = vld [vmem:[#allocation9 + $0x3a0] sm:$0xff] }
 0x464   : > { %v4531_v26 = vpop.eup %4530  ;;  %2934 = vmatprep.subr.mxu1 %v2325_v36  ;;  %v2403_v36 = vld [vmem:[#allocation9 + $0x398] sm:$0xff] }
 0x465   : > { %v1765_v42 = vmul.f32 %v1760_v23, %v5581_v35  ;;  %v1767_v30 = vmul.f32 %v1760_v23, %v5583_v37  ;;  %v1764_v17 = vrot.slane %v4531_v26, %v5569_v21  ;;  %v2008_v35 = vrot.slane %v1987_v28, %v5569_v21  ;;  %2935 = vmatpush2.msra.mxu1 %v2324_v20  ;;  %v2323_v23 = vld [vmem:[#allocation9 + $0x118] sm:$0xff]  ;;  %v2321_v28 = vld [vmem:[#allocation9 + $0x108] sm:$0xff]  ;;  %v2402_v20 = vld [vmem:[#allocation9 + $0x390] sm:$0xff] }
 0x466   : > { %2936 = vmatprep.subr.mxu1 %v2323_v23  ;;  %v2400_v23 = vld [vmem:[#allocation9 + $0x380] sm:$0xff] }
 0x467   : > { %v1780_v40 = vmul.f32 %v1773_v25, %v1765_v42  ;;  %v1782_v45 = vmul.f32 %v1773_v25, %v1767_v30  ;;  %v1766_v46 = vmul.f32 %v1764_v17, %v5590_v41  ;;  %v1768_v47 = vmul.f32 %v1764_v17, %v5592_v44  ;;  %v2322_v25 = vld [vmem:[#allocation9 + $0x110] sm:$0xff] }
 0x468   : > { %2937 = vmatpush2.msra.mxu1 %v2322_v25  ;;  %v2399_v25 = vld [vmem:[#allocation9 + $0x378] sm:$0xff] }
 0x469   : > { %v1795_v37 = vadd.f32 %v1788_v27, %v1780_v40  ;;  %v1797_v49 = vadd.f32 %v1788_v27, %v1782_v45  ;;  %v1781_v50 = vmul.f32 %v1777_v31, %v1766_v46  ;;  %v1783_v56 = vmul.f32 %v1777_v31, %v1768_v47  ;;  %2938 = vmatprep.subr.mxu1 %v2321_v28  ;;  %v2380_v40 = vld [vmem:[#allocation9 + $0x2e0] sm:$0xff]  ;;  %v2447_v45 = vld [vmem:[#allocation9 + $0x4f8] sm:$0xff]  ;;  %v2378_v47 = vld [vmem:[#allocation9 + $0x2d0] sm:$0xff] }
 0x46a   : > { %2939 = vmatpush2.msra.mxu1 %v2320_v29  ;;  %v2379_v46 = vld [vmem:[#allocation9 + $0x2d8] sm:$0xff]  ;;  %v2396_v28 = vld [vmem:[#allocation9 + $0x360] sm:$0xff] }
 0x46b   : > { %v2001_v15 = vmul.f32 %v1996_v34, %v1795_v37  ;;  %v2003_v53 = vmul.f32 %v1996_v34, %v1797_v49  ;;  %v1796_v54 = vadd.f32 %v1792_v38, %v1781_v50  ;;  %v1798_v55 = vadd.f32 %v1792_v38, %v1783_v56  ;;  %v2383_v34 = vld [vmem:[#allocation9 + $0x2f8] sm:$0xff]  ;;  %v2382_v38 = vld [vmem:[#allocation9 + $0x2f0] sm:$0xff]  ;;  %3030 = vmatprep.subr.mxu1 %v2447_v45  ;;  %v2373_v50 = vld [vmem:[#allocation9 + $0x2a8] sm:$0xff] }
 0x46c   : > { %2953 = vmatprep.subr.mxu0 %v2383_v34  ;;  %v2375_v37 = vld [vmem:[#allocation9 + $0x2b8] sm:$0xff]  ;;  %v2374_v49 = vld [vmem:[#allocation9 + $0x2b0] sm:$0xff]  ;;  %v2372_v56 = vld [vmem:[#allocation9 + $0x2a0] sm:$0xff] }
 0x46d   : > { %v2002_v58 = vmul.f32 %v2000_v51, %v1796_v54  ;;  %v2004_v59 = vmul.f32 %v2000_v51, %v1798_v55  ;;  %v2013_v41 = vadd.f32 %v2008_v35, %v2001_v15  ;;  %v2015_v60 = vadd.f32 %v2008_v35, %v2003_v53  ;;  %2954 = vmatpush1.msra.mxu0 %v2382_v38  ;;  %v2377_v35 = vld [vmem:[#allocation9 + $0x2c8] sm:$0xff]  ;;  %v2371_v51 = vld [vmem:[#allocation9 + $0x298] sm:$0xff]  ;;  %v2370_v15 = vld [vmem:[#allocation9 + $0x290] sm:$0xff] }
 0x46e   : > { %2955 = vmatprep.subr.mxu0 %v2381_v39  ;;  %v2369_v53 = vld [vmem:[#allocation9 + $0x288] sm:$0xff]  ;;  %v2368_v54 = vld [vmem:[#allocation9 + $0x280] sm:$0xff]  ;;  %v2367_v55 = vld [vmem:[#allocation9 + $0x278] sm:$0xff] }
 0x46f   : > { %v4196_v44 = vmul.f32 -1.442695, %v2013_v41  ;;  %v4198_v61 = vmul.f32 -1.442695, %v2015_v60  ;;  %v2014_v63 = vadd.f32 %v2012_v57, %v2002_v58  ;;  %v2016_v1 = vadd.f32 %v2012_v57, %v2004_v59  ;;  %2956 = vmatpush1.msra.mxu0 %v2380_v40  ;;  %v2366_v57 = vld [vmem:[#allocation9 + $0x270] sm:$0xff]  ;;  %v2365_v58 = vld [vmem:[#allocation9 + $0x268] sm:$0xff] }
 0x470   : > { %2957 = vmatprep.subr.mxu0 %v2379_v46  ;;  %v2364_v59 = vld [vmem:[#allocation9 + $0x260] sm:$0xff]  ;;  %v2395_v29 = vld [vmem:[#allocation9 + $0x358] sm:$0xff]  ;;  %v2389_v34 = vld [vmem:[#allocation9 + $0x328] sm:$0xff] }
 0x471   : > { %4532 = vpow2.f32 %v4196_v44  ;;  %v4197_v2 = vmul.f32 -1.442695, %v2014_v63  ;;  %v4199_v3 = vmul.f32 -1.442695, %v2016_v1  ;;  %2958 = vmatpush1.msra.mxu0 %v2378_v47  ;;  %v2361_v44 = vld [vmem:[#allocation9 + $0x248] sm:$0xff]  ;;  %v2388_v38 = vld [vmem:[#allocation9 + $0x320] sm:$0xff] }
 0x472   : > { %4534 = vpow2.f32 %v4198_v61  ;;  %2959 = vmatprep.subr.mxu0 %v2377_v35  ;;  %v2360_v61 = vld [vmem:[#allocation9 + $0x240] sm:$0xff]  ;;  %v2387_v40 = vld [vmem:[#allocation9 + $0x318] sm:$0xff] }
 0x473   : > { %4536 = vpow2.f32 %v4197_v2  ;;  %2960 = vmatpush1.msra.mxu0 %v2376_v48  ;;  %v2357_v2 = vld [vmem:[#allocation9 + $0x228] sm:$0xff] }
 0x474   : > { %4538 = vpow2.f32 %v4199_v3  ;;  %2961 = vmatprep.subr.mxu0 %v2375_v37  ;;  %v2356_v3 = vld [vmem:[#allocation9 + $0x220] sm:$0xff]  ;;  %v2386_v37 = vld [vmem:[#allocation9 + $0x310] sm:$0xff] }
 0x475   : > { %2962 = vmatpush1.msra.mxu0 %v2374_v49 }
 0x476   : > { %2963 = vmatprep.subr.mxu0 %v2373_v50 }
 0x477   : > { %2964 = vmatpush1.msra.mxu0 %v2372_v56 }
 0x478   : > { %2965 = vmatprep.subr.mxu0 %v2371_v51  ;;  %v2385_v51 = vld [vmem:[#allocation9 + $0x308] sm:$0xff] }
 0x479   : > { %2966 = vmatpush1.msra.mxu0 %v2370_v15  ;;  %v2384_v15 = vld [vmem:[#allocation9 + $0x300] sm:$0xff] }
 0x47a   : > { %2967 = vmatprep.subr.mxu0 %v2369_v53 }
 0x47b   : > { %2968 = vmatpush1.msra.mxu0 %v2368_v54  ;;  %v2511_v54 = vld [vmem:[#allocation9 + $0x6f8] sm:$0xff] }
 0x47c   : > { %2969 = vmatprep.subr.mxu0 %v2367_v55 }
 0x47d   : > { %2970 = vmatpush1.msra.mxu0 %v2366_v57 }
 0x47e   : > { %v4533_v4 = vpop.eup %4532  ;;  %2971 = vmatprep.subr.mxu0 %v2365_v58 }
 0x47f   : > { %v4535_v5 = vpop.eup %4534  ;;  %v2029_v6 = vadd.f32 1.0, %v4533_v4  ;;  %2972 = vmatpush1.msra.mxu0 %v2364_v59  ;;  %v2355_v4 = vld [vmem:[#allocation9 + $0x218] sm:$0xff] }
 0x480   : > { %v4537_v0 = vpop.eup %4536  ;;  %v2031_v7 = vadd.f32 1.0, %v4535_v5  ;;  %v2354_v5 = vld [vmem:[#allocation9 + $0x210] sm:$0xff] }
 0x481   : > { %v4539_v52 = vpop.eup %4538  ;;  %4540 = vrcp.f32 %v2029_v6  ;;  %v2030_v8 = vadd.f32 1.0, %v4537_v0  ;;  %v2353_v6 = vld [vmem:[#allocation9 + $0x208] sm:$0xff]  ;;  %v2352_v0 = vld [vmem:[#allocation9 + $0x200] sm:$0xff] }
 0x482   : > { %4542 = vrcp.f32 %v2031_v7  ;;  %v2032_v9 = vadd.f32 1.0, %v4539_v52  ;;  %v2415_v7 = vld [vmem:[#allocation9 + $0x3f8] sm:$0xff]  ;;  %v2414_v52 = vld [vmem:[#allocation9 + $0x3f0] sm:$0xff] }
 0x483   : > { %4544 = vrcp.f32 %v2030_v8  ;;  %v2413_v8 = vld [vmem:[#allocation9 + $0x3e8] sm:$0xff] }
 0x484   : > { %4546 = vrcp.f32 %v2032_v9  ;;  %v2412_v9 = vld [vmem:[#allocation9 + $0x3e0] sm:$0xff] }
 0x48e   : > { %v4541_v22 = vpop.eup %4540 }
 0x48f   : > { %v4543_v26 = vpop.eup %4542  ;;  %v2041_v27 = vmul.f32 %v4541_v22, %v2013_v41  ;;  %v2363_v41 = vld [vmem:[#allocation9 + $0x258] sm:$0xff]  ;;  %v2401_v22 = vld [vmem:[#allocation9 + $0x388] sm:$0xff] }
 0x490   : > { %v4545_v42 = vpop.eup %4544  ;;  %v2043_v31 = vmul.f32 %v4543_v26, %v2015_v60  ;;  %v2362_v60 = vld [vmem:[#allocation9 + $0x250] sm:$0xff]  ;;  %2973 = vmatprep.subr.mxu0 %v2363_v41 }
 0x491   : > { %2049 = vrot.lane.b32.xlu0 %v2041_v27, %s5098_s23  ;;  %v2042_v30 = vmul.f32 %v4545_v42, %v2014_v63  ;;  %v4547_v17 = vpop.eup %4546  ;;  %2974 = vmatpush1.msra.mxu0 %v2362_v60  ;;  %v2359_v63 = vld [vmem:[#allocation9 + $0x238] sm:$0xff]  ;;  %v2398_v26 = vld [vmem:[#allocation9 + $0x370] sm:$0xff]  ;;  %v2397_v27 = vld [vmem:[#allocation9 + $0x368] sm:$0xff] }
 0x492   : > { %v2044_v32 = vmul.f32 %v4547_v17, %v2016_v1  ;;  %2975 = vmatprep.subr.mxu0 %v2361_v44  ;;  %v2358_v1 = vld [vmem:[#allocation9 + $0x230] sm:$0xff]  ;;  %v2392_v17 = vld [vmem:[#allocation9 + $0x340] sm:$0xff] }
 0x493   : > { %2051 = vrot.lane.b32.xlu1 %v2042_v30, %s5098_s23  ;;  %2976 = vmatpush1.msra.mxu0 %v2360_v61  ;;  %v2394_v42 = vld [vmem:[#allocation9 + $0x350] sm:$0xff]  ;;  %v2393_v30 = vld [vmem:[#allocation9 + $0x348] sm:$0xff] }
 0x494   : > { %2977 = vmatprep.subr.mxu0 %v2359_v63 }
 0x495   : > { %2053 = vrot.lane.b32.xlu0 %v2043_v31, %s5098_s23  ;;  %2978 = vmatpush1.msra.mxu0 %v2358_v1  ;;  %v2391_v31 = vld [vmem:[#allocation9 + $0x338] sm:$0xff] }
 0x496   : > { %2979 = vmatprep.subr.mxu0 %v2357_v2 }
 0x497   : > { %2055 = vrot.lane.b32.xlu1 %v2044_v32, %s5098_s23  ;;  %2980 = vmatpush1.msra.mxu0 %v2356_v3  ;;  %v2390_v32 = vld [vmem:[#allocation9 + $0x330] sm:$0xff] }
 0x498   : > { %2981 = vmatprep.subr.mxu0 %v2355_v4 }
 0x499   : > { %2982 = vmatpush1.msra.mxu0 %v2354_v5  ;;  %v2446_v5 = vld [vmem:[#allocation9 + $0x4f0] sm:$0xff] }
 0x49a   : > { %2983 = vmatprep.subr.mxu0 %v2353_v6  ;;  %v2445_v6 = vld [vmem:[#allocation9 + $0x4e8] sm:$0xff] }
 0x49b   : > { %2984 = vmatpush1.msra.mxu0 %v2352_v0  ;;  %v2444_v0 = vld [vmem:[#allocation9 + $0x4e0] sm:$0xff] }
 0x49c   : > { %2985 = vmatprep.subr.mxu0 %v2415_v7 }
 0x49d   : > { %2986 = vmatpush2.msra.mxu0 %v2414_v52  ;;  %v2443_v52 = vld [vmem:[#allocation9 + $0x4d8] sm:$0xff] }
 0x49e   : > { %2987 = vmatprep.subr.mxu0 %v2413_v8  ;;  %v2442_v8 = vld [vmem:[#allocation9 + $0x4d0] sm:$0xff] }
 0x49f   : > { %2988 = vmatpush2.msra.mxu0 %v2412_v9 }
 0x4a0   : > { %2989 = vmatprep.subr.mxu0 %v2411_v10 }
 0x4a1   : > { %2990 = vmatpush2.msra.mxu0 %v2410_v11  ;;  %v2441_v11 = vld [vmem:[#allocation9 + $0x4c8] sm:$0xff] }
 0x4a2   : > { %2991 = vmatprep.subr.mxu0 %v2409_v12 }
 0x4a3   : > { %2992 = vmatpush2.msra.mxu0 %v2408_v13 }
 0x4a4   : > { %2993 = vmatprep.subr.mxu0 %v2407_v14  ;;  %v2440_v14 = vld [vmem:[#allocation9 + $0x4c0] sm:$0xff] }
 0x4a5   : > { %2994 = vmatpush2.msra.mxu0 %v2406_v16  ;;  %v2439_v16 = vld [vmem:[#allocation9 + $0x4b8] sm:$0xff] }
 0x4a6   : > { %2995 = vmatprep.subr.mxu0 %v2405_v62 }
 0x4a7   : > { %2996 = vmatpush2.msra.mxu0 %v2404_v18 }
 0x4a8   : > { %2997 = vmatprep.subr.mxu0 %v2403_v36 }
 0x4a9   : > { %2998 = vmatpush2.msra.mxu0 %v2402_v20 }
 0x4aa   : > { %2999 = vmatprep.subr.mxu0 %v2401_v22 }
 0x4ab   : > { %3000 = vmatpush2.msra.mxu0 %v2400_v23 }
 0x4ac   : > { %3001 = vmatprep.subr.mxu0 %v2399_v25 }
 0x4ad   : > { %3002 = vmatpush2.msra.mxu0 %v2398_v26  ;;  %v2438_v26 = vld [vmem:[#allocation9 + $0x4b0] sm:$0xff] }
 0x4ae   : > { %3003 = vmatprep.subr.mxu0 %v2397_v27 }
 0x4af   : > { %3004 = vmatpush2.msra.mxu0 %v2396_v28 }
 0x4b0   : > { %3005 = vmatprep.subr.mxu0 %v2395_v29 }
 0x4b1   : > { %3006 = vmatpush2.msra.mxu0 %v2394_v42 }
 0x4b2   : > { %3007 = vmatprep.subr.mxu0 %v2393_v30  ;;  %v2437_v30 = vld [vmem:[#allocation9 + $0x4a8] sm:$0xff] }
 0x4b3   : > { %3008 = vmatpush2.msra.mxu0 %v2392_v17  ;;  %v2436_v17 = vld [vmem:[#allocation9 + $0x4a0] sm:$0xff] }
 0x4b4   : > { %3009 = vmatprep.subr.mxu0 %v2391_v31 }
 0x4b5   : > { %3010 = vmatpush2.msra.mxu0 %v2390_v32 }
 0x4b6   : > { %3011 = vmatprep.subr.mxu0 %v2389_v34  ;;  %v2435_v34 = vld [vmem:[#allocation9 + $0x498] sm:$0xff] }
 0x4b7   : > { %3012 = vmatpush2.msra.mxu0 %v2388_v38 }
 0x4b8   : > { %3013 = vmatprep.subr.mxu0 %v2387_v40 }
 0x4b9   : > { %3014 = vmatpush2.msra.mxu0 %v2386_v37 }
 0x4ba   : > { %3015 = vmatprep.subr.mxu0 %v2385_v51 }
 0x4bb   : > { %3016 = vmatpush2.msra.mxu0 %v2384_v15 }
 0x4bc   : > { %3107 = vmatprep.subr.mxu0 %v2511_v54  ;;  %v2429_v54 = vld [vmem:[#allocation9 + $0x468] sm:$0xff] }
 0x503   : > { %v2050_v39 = vpop.permute.xlu0 %2049 }
 0x504   : > { %v2064_v45 = vsel %vm2057_vm6, 0.0, %v2050_v39 }
 0x505   : > { %v2073_v46 = vrot.slane %v2064_v45, 7  ;;  %v2052_v47 = vpop.permute.xlu1 %2051  ;;  %v2434_v45 = vld [vmem:[#allocation9 + $0x490] sm:$0xff] }
 0x506   : > { %v2058_v35 = vsel %vm2057_vm6, %v2050_v39, %v2052_v47  ;;  %v2066_v48 = vsel %vm2057_vm6, %v2052_v47, 0.0 }
 0x507   : > { %2091 = vst [vmem:[#allocation2] sm:$0xfe] %v2073_v46  ;;  %v2074_v49 = vrot.slane %v2058_v35, 7  ;;  %v2075_v50 = vrot.slane %v2066_v48, 7  ;;  %v2054_v56 = vpop.permute.xlu0 %2053  ;;  %v2432_v48 = vld [vmem:[#allocation9 + $0x480] sm:$0xff] }
 0x508   : > { %v2065_v53 = vsel %vm2057_vm6, 0.0, %v2054_v56 }
 0x509   : > { %2092 = vst [vmem:[#allocation2 + $0x8] sm:$0xfe] %v2074_v49  ;;  %2094 = vst.msk [vmem:[#allocation2 + $0x10] sm:$0xfe] %vm2093_vm7, %v2075_v50  ;;  %v2076_v55 = vrot.slane %v2065_v53, 7  ;;  %v2056_v57 = vpop.permute.xlu1 %2055 }
 0x50a   : > { %v2059_v58 = vsel %vm2057_vm6, %v2054_v56, %v2056_v57  ;;  %v2067_v59 = vsel %vm2057_vm6, %v2056_v57, 0.0  ;;  %v2430_v56 = vld [vmem:[#allocation9 + $0x470] sm:$0xff] }
 0x50b   : > { %v5630_v41 = vsel %vm2072_vm8, %v2073_v46, %v2076_v55  ;;  %2098 = vst [vmem:[#allocation2 + $0x30] sm:$0x1] %v2076_v55  ;;  %v2078_v60 = vrot.slane %v2059_v58, 7  ;;  %v2080_v44 = vrot.slane %v2067_v59, 7  ;;  %v2433_v46 = vld [vmem:[#allocation9 + $0x488] sm:$0xff] }
 0x50c   : > { %v2170_v12 = vrot.slane %v5630_v41, 1  ;;  %v2230_v55 = vrot.slane %v5630_v41, 2 }
 0x50d   : > { %v5633_v61 = vsel %vm2072_vm8, %v2074_v49, %v2078_v60  ;;  %v2081_v63 = vsel %vm2072_vm8, %v2075_v50, %v2080_v44  ;;  %2099 = vst [vmem:[#allocation2 + $0x38] sm:$0x1] %v2078_v60  ;;  %2101 = vst.msk [vmem:[#allocation2 + $0x40] sm:$0x1] %vm2100_vm9, %v2080_v44  ;;  %v2431_v50 = vld [vmem:[#allocation9 + $0x478] sm:$0xff]  ;;  %v2428_v60 = vld [vmem:[#allocation9 + $0x460] sm:$0xff] }
 0x50e   : > { %2097 = vst.msk [vmem:[#allocation2 + $0x28] sm:$0xff] %vm1845_vm5, %v2081_v63  ;;  %v5637_v1 = vld [vmem:[#allocation2] sm:$0xff]  ;;  %v2173_v25 = vrot.slane %v5633_v61, 1  ;;  %v2233_v37 = vrot.slane %v5633_v61, 2 }
 0x50f   : > { %2126 = vrot.lane.b32.xlu1 %v5637_v1, %s5096_s28  ;;  %v2169_v10 = vrot.slane %v5637_v1, 1  ;;  %v2229_v15 = vrot.slane %v5637_v1, 2  ;;  %v2427_v44 = vld [vmem:[#allocation9 + $0x458] sm:$0xff] }
 0x510   : > { %v5641_v2 = vld [vmem:[#allocation2 + $0x8] sm:$0xff]  ;;  %v5643_v3 = vld [vmem:[#allocation2 + $0x10] sm:$0xff] }
 0x511   : > { %2940 = vmatprep.mubr.f32.mxu1 %v5641_v2  ;;  %v4454_v4 = vpack.i.bf16 %v5643_v3, %v5641_v2  ;;  %v2172_v20 = vrot.slane %v5641_v2, 1  ;;  %v2184_v22 = vrot.slane %v5643_v3, 1  ;;  %v5674_v23 = vsel %vm801_vm0, %v2169_v10, %v2170_v12  ;;  %v2421_v10 = vld [vmem:[#allocation9 + $0x428] sm:$0xff] }
 0x512   : > { %2941 = vmatmul.mubr.f32.vlgmr.msra.gmra.mxu1 %v5637_v1  ;;  %v5667_v62 = vld [vmem:[#allocation2 + $0x30] sm:$0x3]  ;;  %v2232_v47 = vrot.slane %v5641_v2, 2  ;;  %v5719_v63 = vsel %vm839_vm1, %v2229_v15, %v2230_v55  ;;  %v2426_v2 = vld [vmem:[#allocation9 + $0x450] sm:$0xff] }
 0x513   : > { %2146 = vrot.lane.b32.xlu1 %v5637_v1, %s5099_s27  ;;  %4455 = vrot.lane.b32.xlu0 %v4454_v4, %s5096_s28  ;;  %v2175_v27 = vrot.slane %v5667_v62, 1  ;;  %v5684_v31 = vsel %vm801_vm0, %v2172_v20, %v2173_v25  ;;  %v2478_v20 = vld [vmem:[#allocation9 + $0x5f0] sm:$0xff]  ;;  %v2456_v15 = vld [vmem:[#allocation9 + $0x540] sm:$0xff] }
 0x514   : > { %2946 = vmatprep.mubr.f32.mxu1 %v5633_v61  ;;  %3031 = vmatpush1.msra.mxu1 %v2446_v5  ;;  %v2118_v18 = vld [vmem:[#allocation2 + $0x38] sm:$0x3]  ;;  %v5669_v36 = vld [vmem:[#allocation2 + $0x40] sm:$0x3]  ;;  %v5704_v51 = vsel %vm839_vm1, %v2232_v47, %v2233_v37  ;;  %v2463_v47 = vld [vmem:[#allocation9 + $0x578] sm:$0xff] }
 0x515   : > { %3032 = vmatprep.subr.mxu1 %v2445_v6  ;;  %v5654_v7 = vld [vmem:[#allocation2 + $0x28] sm:$0xff]  ;;  %v2177_v29 = vrot.slane %v2118_v18, 1  ;;  %v2187_v42 = vrot.slane %v5669_v36, 1  ;;  %v5688_v38 = vsel %vm801_vm0, %v2170_v12, %v2175_v27  ;;  %v2237_v49 = vrot.slane %v2118_v18, 2  ;;  %v2425_v6 = vld [vmem:[#allocation9 + $0x448] sm:$0xff]  ;;  %v2474_v27 = vld [vmem:[#allocation9 + $0x5d0] sm:$0xff] }
 0x516   : > { %2947 = vmatmul.mubr.f32.gmra.mxu1 %v5630_v41  ;;  %v4464_v9 = vpack.i.bf16 %v5654_v7, %v5633_v61  ;;  %v2185_v13 = vrot.slane %v5654_v7, 1  ;;  %v4494_v53 = vpack.i.bf16 %v5704_v51, %v5688_v38  ;;  %v2244_v58 = vrot.slane %v5654_v7, 2  ;;  %v2420_v12 = vld [vmem:[#allocation9 + $0x420] sm:$0xff] }
 0x517   : > { %2132 = vrot.lane.b32.xlu1 %v5630_v41, %s5096_s28  ;;  %4460 = vrot.lane.b32.xlu0 %v4454_v4, %s5099_s27  ;;  %v5691_v39 = vsel %vm801_vm0, %v2173_v25, %v2177_v29  ;;  %v5711_v57 = vsel %vm839_vm1, %v2233_v37, %v2237_v49  ;;  %v2246_v59 = vrot.slane %v5669_v36, 2  ;;  %v2235_v61 = vrot.slane %v5667_v62, 2  ;;  %v2416_v18 = vld [vmem:[#allocation9 + $0x400] sm:$0xff]  ;;  %v2479_v36 = vld [vmem:[#allocation9 + $0x5f8] sm:$0xff] }
 0x518   : > { %3033 = vmatpush1.msra.mxu1 %v2444_v0  ;;  %v2186_v28 = vsel %vm801_vm0, %v2184_v22, %v2185_v13  ;;  %v2188_v40 = vsel %vm801_vm0, %v2185_v13, %v2187_v42  ;;  %v4504_v1 = vpack.i.bf16 %v5711_v57, %v5719_v63  ;;  %v2424_v0 = vld [vmem:[#allocation9 + $0x440] sm:$0xff]  ;;  %v2419_v13 = vld [vmem:[#allocation9 + $0x418] sm:$0xff]  ;;  %v2477_v22 = vld [vmem:[#allocation9 + $0x5e8] sm:$0xff] }
 0x519   : > { %3034 = vmatprep.subr.mxu1 %v2443_v52  ;;  %v4474_v32 = vpack.i.bf16 %v2186_v28, %v5684_v31  ;;  %v4479_v35 = vpack.i.bf16 %v2188_v40, %v5691_v39  ;;  %v2247_v4 = vsel %vm839_vm1, %v2244_v58, %v2246_v59  ;;  %v5729_v7 = vsel %vm839_vm1, %v2230_v55, %v2235_v61  ;;  %v2476_v25 = vld [vmem:[#allocation9 + $0x5e0] sm:$0xff]  ;;  %v2473_v28 = vld [vmem:[#allocation9 + $0x5c8] sm:$0xff]  ;;  %v2471_v42 = vld [vmem:[#allocation9 + $0x5b8] sm:$0xff] }
 0x51a   : > { %3035 = vmatpush1.msra.mxu1 %v2442_v8  ;;  %v2423_v8 = vld [vmem:[#allocation9 + $0x438] sm:$0xff]  ;;  %v4519_v62 = vpack.i.bf16 %v2247_v4, %v5711_v57  ;;  %v2472_v29 = vld [vmem:[#allocation9 + $0x5c0] sm:$0xff]  ;;  %v2466_v40 = vld [vmem:[#allocation9 + $0x590] sm:$0xff] }
 0x51b   : > { %2152 = vrot.lane.b32.xlu1 %v5630_v41, %s5099_s27  ;;  %4465 = vrot.lane.b32.xlu0 %v4464_v9, %s5096_s28  ;;  %v2243_v41 = vrot.slane %v5643_v3, 2  ;;  %v4514_v3 = vpack.i.bf16 %v5729_v7, %v2247_v4  ;;  %v2460_v37 = vld [vmem:[#allocation9 + $0x560] sm:$0xff]  ;;  %v2459_v49 = vld [vmem:[#allocation9 + $0x558] sm:$0xff]  ;;  %v2453_v55 = vld [vmem:[#allocation9 + $0x528] sm:$0xff] }
 0x51c   : > { %3036 = vmatprep.subr.mxu1 %v2441_v11  ;;  %v2451_v59 = vld [vmem:[#allocation9 + $0x518] sm:$0xff]  ;;  %v2448_v61 = vld [vmem:[#allocation9 + $0x500] sm:$0xff] }
 0x51d   : > { %3037 = vmatpush1.msra.mxu1 %v2440_v14  ;;  %v2245_v5 = vsel %vm839_vm1, %v2243_v41, %v2244_v58  ;;  %v2418_v14 = vld [vmem:[#allocation9 + $0x410] sm:$0xff]  ;;  %v2452_v58 = vld [vmem:[#allocation9 + $0x520] sm:$0xff]  ;;  %v2575_v41 = vld [vmem:[#allocation9 + $0x8f8] sm:$0xff] }
 0x51e   : > { %3038 = vmatprep.subr.mxu1 %v2439_v16  ;;  %v4499_v52 = vpack.i.bf16 %v2245_v5, %v5704_v51  ;;  %v4509_v11 = vpack.i.bf16 %v5719_v63, %v2245_v5  ;;  %v2417_v16 = vld [vmem:[#allocation9 + $0x408] sm:$0xff] }
 0x51f   : > { %2189 = vrot.lane.b32.xlu1 %v5674_v23, %s5096_s28  ;;  %4470 = vrot.lane.b32.xlu0 %v4464_v9, %s5099_s27  ;;  %v2422_v9 = vld [vmem:[#allocation9 + $0x430] sm:$0xff] }
 0x520   : > { %3039 = vmatpush1.msra.mxu1 %v2438_v26  ;;  %v2475_v26 = vld [vmem:[#allocation9 + $0x5d8] sm:$0xff] }
 0x521   : > { %3040 = vmatprep.subr.mxu1 %v2437_v30  ;;  %v2470_v30 = vld [vmem:[#allocation9 + $0x5b0] sm:$0xff] }
 0x522   : > { %3041 = vmatpush1.msra.mxu1 %v2436_v17  ;;  %v2469_v17 = vld [vmem:[#allocation9 + $0x5a8] sm:$0xff] }
 0x523   : > { %2195 = vrot.lane.b32.xlu1 %v5688_v38, %s5096_s28  ;;  %4475 = vrot.lane.b32.xlu0 %v4474_v32, %s5096_s28 }
 0x524   : > { %3042 = vmatprep.subr.mxu1 %v2435_v34  ;;  %v2467_v34 = vld [vmem:[#allocation9 + $0x598] sm:$0xff] }
 0x525   : > { %3043 = vmatpush1.msra.mxu1 %v2434_v45  ;;  %v2465_v45 = vld [vmem:[#allocation9 + $0x588] sm:$0xff] }
 0x526   : > { %3044 = vmatprep.subr.mxu1 %v2433_v46  ;;  %v2464_v46 = vld [vmem:[#allocation9 + $0x580] sm:$0xff] }
 0x527   : > { %2209 = vrot.lane.b32.xlu1 %v5674_v23, %s5099_s27  ;;  %4480 = vrot.lane.b32.xlu0 %v4479_v35, %s5096_s28 }
 0x528   : > { %3045 = vmatpush1.msra.mxu1 %v2432_v48  ;;  %v2461_v48 = vld [vmem:[#allocation9 + $0x568] sm:$0xff] }
 0x529   : > { %3046 = vmatprep.subr.mxu1 %v2431_v50  ;;  %v2458_v50 = vld [vmem:[#allocation9 + $0x550] sm:$0xff] }
 0x52a   : > { %3047 = vmatpush1.msra.mxu1 %v2430_v56  ;;  %v2457_v56 = vld [vmem:[#allocation9 + $0x548] sm:$0xff] }
 0x52b   : > { %4495 = vrot.lane.b32.xlu1 %v4494_v53, %s5099_s27  ;;  %4485 = vrot.lane.b32.xlu0 %v4474_v32, %s5099_s27  ;;  %v2468_v32 = vld [vmem:[#allocation9 + $0x5a0] sm:$0xff]  ;;  %v2455_v53 = vld [vmem:[#allocation9 + $0x538] sm:$0xff] }
 0x52c   : > { %3048 = vmatprep.subr.mxu1 %v2429_v54  ;;  %v2454_v54 = vld [vmem:[#allocation9 + $0x530] sm:$0xff] }
 0x52d   : > { %3049 = vmatpush1.msra.mxu1 %v2428_v60  ;;  %v2450_v60 = vld [vmem:[#allocation9 + $0x510] sm:$0xff] }
 0x52e   : > { %3050 = vmatprep.subr.mxu1 %v2427_v44  ;;  %v2449_v44 = vld [vmem:[#allocation9 + $0x508] sm:$0xff] }
 0x52f   : > { %4505 = vrot.lane.b32.xlu1 %v4504_v1, %s5096_s28  ;;  %4490 = vrot.lane.b32.xlu0 %v4479_v35, %s5099_s27  ;;  %v2462_v35 = vld [vmem:[#allocation9 + $0x570] sm:$0xff] }
 0x530   : > { %3051 = vmatpush1.msra.mxu1 %v2426_v2 }
 0x531   : > { %3052 = vmatprep.subr.mxu1 %v2425_v6 }
 0x532   : > { %3053 = vmatpush1.msra.mxu1 %v2424_v0 }
 0x533   : > { %4515 = vrot.lane.b32.xlu1 %v4514_v3, %s5096_s28  ;;  %4500 = vrot.lane.b32.xlu0 %v4499_v52, %s5096_s28  ;;  %v2510_v3 = vld [vmem:[#allocation9 + $0x6f0] sm:$0xff] }
 0x534   : > { %3054 = vmatprep.subr.mxu1 %v2423_v8 }
 0x535   : > { %3055 = vmatpush1.msra.mxu1 %v2422_v9  ;;  %v2509_v9 = vld [vmem:[#allocation9 + $0x6e8] sm:$0xff] }
 0x536   : > { %3056 = vmatprep.subr.mxu1 %v2421_v10 }
 0x537   : > { %2274 = vrot.lane.b32.xlu1 %v5729_v7, %s5099_s27  ;;  %4510 = vrot.lane.b32.xlu0 %v4509_v11, %s5099_s27 }
 0x538   : > { %3057 = vmatpush1.msra.mxu1 %v2420_v12  ;;  %v2508_v12 = vld [vmem:[#allocation9 + $0x6e0] sm:$0xff] }
 0x539   : > { %3058 = vmatprep.subr.mxu1 %v2419_v13  ;;  %v2507_v13 = vld [vmem:[#allocation9 + $0x6d8] sm:$0xff] }
 0x53a   : > { %3059 = vmatpush1.msra.mxu1 %v2418_v14 }
 0x53b   : > { %4520 = vrot.lane.b32.xlu0 %v4519_v62, %s5099_s27  ;;  %3060 = vmatprep.subr.mxu1 %v2417_v16  ;;  %v2506_v62 = vld [vmem:[#allocation9 + $0x6d0] sm:$0xff] }
 0x53c   : > { %3061 = vmatpush1.msra.mxu1 %v2416_v18  ;;  %v2574_v18 = vld [vmem:[#allocation9 + $0x8f0] sm:$0xff] }
 0x53d   : > { %3062 = vmatprep.subr.mxu1 %v2479_v36 }
 0x53e   : > { %3063 = vmatpush2.msra.mxu1 %v2478_v20  ;;  %v2505_v20 = vld [vmem:[#allocation9 + $0x6c8] sm:$0xff] }
 0x53f   : > { %3064 = vmatprep.subr.mxu1 %v2477_v22  ;;  %v2573_v22 = vld [vmem:[#allocation9 + $0x8e8] sm:$0xff] }
 0x540   : > { %3065 = vmatpush2.msra.mxu1 %v2476_v25 }
 0x541   : > { %3066 = vmatprep.subr.mxu1 %v2475_v26 }
 0x542   : > { %3067 = vmatpush2.msra.mxu1 %v2474_v27  ;;  %v2504_v27 = vld [vmem:[#allocation9 + $0x6c0] sm:$0xff] }
 0x543   : > { %3068 = vmatprep.subr.mxu1 %v2473_v28  ;;  %v2572_v28 = vld [vmem:[#allocation9 + $0x8e0] sm:$0xff] }
 0x544   : > { %3069 = vmatpush2.msra.mxu1 %v2472_v29 }
 0x545   : > { %3070 = vmatprep.subr.mxu1 %v2471_v42  ;;  %v2503_v42 = vld [vmem:[#allocation9 + $0x6b8] sm:$0xff] }
 0x546   : > { %3071 = vmatpush2.msra.mxu1 %v2470_v30 }
 0x547   : > { %3072 = vmatprep.subr.mxu1 %v2469_v17  ;;  %v2571_v17 = vld [vmem:[#allocation9 + $0x8d8] sm:$0xff] }
 0x548   : > { %3073 = vmatpush2.msra.mxu1 %v2468_v32 }
 0x549   : > { %3074 = vmatprep.subr.mxu1 %v2467_v34 }
 0x54a   : > { %3075 = vmatpush2.msra.mxu1 %v2466_v40  ;;  %v2502_v40 = vld [vmem:[#allocation9 + $0x6b0] sm:$0xff] }
 0x54b   : > { %3076 = vmatprep.subr.mxu1 %v2465_v45  ;;  %v2570_v45 = vld [vmem:[#allocation9 + $0x8d0] sm:$0xff] }
 0x54c   : > { %3077 = vmatpush2.msra.mxu1 %v2464_v46 }
 0x54d   : > { %3078 = vmatprep.subr.mxu1 %v2463_v47 }
 0x54e   : > { %3079 = vmatpush2.msra.mxu1 %v2462_v35  ;;  %v2501_v35 = vld [vmem:[#allocation9 + $0x6a8] sm:$0xff] }
 0x54f   : > { %3080 = vmatprep.subr.mxu1 %v2461_v48  ;;  %v2569_v48 = vld [vmem:[#allocation9 + $0x8c8] sm:$0xff] }
 0x550   : > { %3081 = vmatpush2.msra.mxu1 %v2460_v37  ;;  %v2500_v37 = vld [vmem:[#allocation9 + $0x6a0] sm:$0xff] }
 0x551   : > { %3082 = vmatprep.subr.mxu1 %v2459_v49  ;;  %v2568_v49 = vld [vmem:[#allocation9 + $0x8c0] sm:$0xff] }
 0x552   : > { %3083 = vmatpush2.msra.mxu1 %v2458_v50 }
 0x553   : > { %3084 = vmatprep.subr.mxu1 %v2457_v56 }
 0x554   : > { %3085 = vmatpush2.msra.mxu1 %v2456_v15 }
 0x555   : > { %3086 = vmatprep.subr.mxu1 %v2455_v53  ;;  %v2499_v53 = vld [vmem:[#allocation9 + $0x698] sm:$0xff] }
 0x556   : > { %3087 = vmatpush2.msra.mxu1 %v2454_v54  ;;  %v2567_v54 = vld [vmem:[#allocation9 + $0x8b8] sm:$0xff] }
 0x557   : > { %3088 = vmatprep.subr.mxu1 %v2453_v55 }
 0x558   : > { %3089 = vmatpush2.msra.mxu1 %v2452_v58 }
 0x559   : > { %3090 = vmatprep.subr.mxu1 %v2451_v59 }
 0x55a   : > { %3091 = vmatpush2.msra.mxu1 %v2450_v60  ;;  %v2498_v60 = vld [vmem:[#allocation9 + $0x690] sm:$0xff] }
 0x55b   : > { %3092 = vmatprep.subr.mxu1 %v2449_v44  ;;  %v2566_v44 = vld [vmem:[#allocation9 + $0x8b0] sm:$0xff] }
 0x55c   : > { %3093 = vmatpush2.msra.mxu1 %v2448_v61  ;;  %v2497_v61 = vld [vmem:[#allocation9 + $0x688] sm:$0xff] }
 0x55d   : > { %3184 = vmatprep.subr.mxu1 %v2575_v41  ;;  %v2496_v41 = vld [vmem:[#allocation9 + $0x680] sm:$0xff] }
 0x581   : > { %v2127_v1 = vpop.permute.xlu1 %2126 }
 0x585   : > { %v4456_v2 = vpop.permute.xlu0 %4455  ;;  %v2147_v52 = vpop.permute.xlu1 %2146 }
 0x586   : > { %v4458_v4 = vunpack.i.h.bf16 %v4456_v2  ;;  %v4457_v5 = vunpack.i.l.bf16 %v4456_v2  ;;  %v2495_v2 = vld [vmem:[#allocation9 + $0x678] sm:$0xff] }
 0x588   : > { %v2139_v6 = vsel %vm795_vm4, %v4457_v5, %v4458_v4  ;;  %v2138_v0 = vsel %vm795_vm4, %v2127_v1, %v4457_v5  ;;  %v2564_v1 = vld [vmem:[#allocation9 + $0x8a0] sm:$0xff]  ;;  %v2563_v4 = vld [vmem:[#allocation9 + $0x898] sm:$0xff] }
 0x589   : > { %v4461_v8 = vpop.permute.xlu0 %4460  ;;  %3017 = vmatprep.mubr.f32.mxu0 %v2139_v6  ;;  %v2133_v29 = vpop.permute.xlu1 %2132  ;;  %v2494_v6 = vld [vmem:[#allocation9 + $0x670] sm:$0xff] }
 0x58a   : > { %v4463_v10 = vunpack.i.h.bf16 %v4461_v8  ;;  %v4462_v11 = vunpack.i.l.bf16 %v4461_v8  ;;  %3018 = vmatmul.mubr.f32.vlgmr.msra.gmra.mxu0 %v2138_v0  ;;  %v2562_v0 = vld [vmem:[#allocation9 + $0x890] sm:$0xff]  ;;  %v2492_v8 = vld [vmem:[#allocation9 + $0x660] sm:$0xff] }
 0x58b   : > { %3108 = vmatpush1.msra.mxu0 %v2510_v3  ;;  %v2493_v3 = vld [vmem:[#allocation9 + $0x668] sm:$0xff] }
 0x58c   : > { %3109 = vmatprep.subr.mxu0 %v2509_v9  ;;  %v2160_v14 = vsel %vm2158_vm10, %v4462_v11, %v4463_v10  ;;  %v2159_v16 = vsel %vm2158_vm10, %v2147_v52, %v4462_v11  ;;  %v2561_v52 = vld [vmem:[#allocation9 + $0x888] sm:$0xff]  ;;  %v2560_v9 = vld [vmem:[#allocation9 + $0x880] sm:$0xff]  ;;  %v2491_v10 = vld [vmem:[#allocation9 + $0x658] sm:$0xff] }
 0x58d   : > { %3110 = vmatpush1.msra.mxu0 %v2508_v12  ;;  %v4466_v36 = vpop.permute.xlu0 %4465  ;;  %3094 = vmatprep.mubr.f32.mxu1 %v2160_v14  ;;  %v2153_v56 = vpop.permute.xlu1 %2152  ;;  %v2559_v11 = vld [vmem:[#allocation9 + $0x878] sm:$0xff]  ;;  %v2490_v12 = vld [vmem:[#allocation9 + $0x650] sm:$0xff]  ;;  %v2489_v14 = vld [vmem:[#allocation9 + $0x648] sm:$0xff] }
 0x58e   : > { %v4468_v25 = vunpack.i.h.bf16 %v4466_v36  ;;  %v4467_v26 = vunpack.i.l.bf16 %v4466_v36  ;;  %3111 = vmatprep.subr.mxu0 %v2507_v13  ;;  %3095 = vmatmul.mubr.f32.vlgmr.msra.gmra.mxu1 %v2159_v16  ;;  %v2558_v13 = vld [vmem:[#allocation9 + $0x870] sm:$0xff]  ;;  %v2557_v16 = vld [vmem:[#allocation9 + $0x868] sm:$0xff]  ;;  %v2487_v36 = vld [vmem:[#allocation9 + $0x638] sm:$0xff] }
 0x58f   : > { %3112 = vmatpush1.msra.mxu0 %v2506_v62  ;;  %3185 = vmatpush1.msra.mxu1 %v2574_v18  ;;  %v2488_v62 = vld [vmem:[#allocation9 + $0x640] sm:$0xff] }
 0x590   : > { %3113 = vmatprep.subr.mxu0 %v2505_v20  ;;  %3186 = vmatprep.subr.mxu1 %v2573_v22  ;;  %v2141_v30 = vsel %vm795_vm4, %v4467_v26, %v4468_v25  ;;  %v2140_v32 = vsel %vm795_vm4, %v2133_v29, %v4467_v26  ;;  %v2556_v18 = vld [vmem:[#allocation9 + $0x860] sm:$0xff]  ;;  %v2555_v20 = vld [vmem:[#allocation9 + $0x858] sm:$0xff]  ;;  %v2486_v22 = vld [vmem:[#allocation9 + $0x630] sm:$0xff] }
 0x591   : > { %3114 = vmatpush1.msra.mxu0 %v2504_v27  ;;  %3187 = vmatpush1.msra.mxu1 %v2572_v28  ;;  %v4471_v34 = vpop.permute.xlu0 %4470  ;;  %v2554_v25 = vld [vmem:[#allocation9 + $0x850] sm:$0xff]  ;;  %v2485_v26 = vld [vmem:[#allocation9 + $0x628] sm:$0xff]  ;;  %v2484_v28 = vld [vmem:[#allocation9 + $0x620] sm:$0xff] }
 0x592   : > { %v4473_v46 = vunpack.i.h.bf16 %v4471_v34  ;;  %v4472_v47 = vunpack.i.l.bf16 %v4471_v34  ;;  %3023 = vmatprep.mubr.f32.mxu0 %v2141_v30  ;;  %3115 = vmatprep.subr.mxu0 %v2503_v42  ;;  %v2553_v27 = vld [vmem:[#allocation9 + $0x848] sm:$0xff]  ;;  %v2552_v29 = vld [vmem:[#allocation9 + $0x840] sm:$0xff]  ;;  %v2483_v42 = vld [vmem:[#allocation9 + $0x618] sm:$0xff] }
 0x593   : > { %3188 = vmatprep.subr.mxu1 %v2571_v17  ;;  %3024 = vmatmul.mubr.f32.gmra.mxu0 %v2140_v32  ;;  %v2551_v30 = vld [vmem:[#allocation9 + $0x838] sm:$0xff]  ;;  %v2482_v17 = vld [vmem:[#allocation9 + $0x610] sm:$0xff]  ;;  %v2481_v34 = vld [vmem:[#allocation9 + $0x608] sm:$0xff] }
 0x594   : > { %3116 = vmatpush1.msra.mxu0 %v2502_v40  ;;  %3189 = vmatpush1.msra.mxu1 %v2570_v45  ;;  %v2162_v50 = vsel %vm2158_vm10, %v4472_v47, %v4473_v46  ;;  %v2161_v59 = vsel %vm2158_vm10, %v2153_v56, %v4472_v47  ;;  %v2550_v32 = vld [vmem:[#allocation9 + $0x830] sm:$0xff]  ;;  %v2549_v40 = vld [vmem:[#allocation9 + $0x828] sm:$0xff]  ;;  %v2480_v45 = vld [vmem:[#allocation9 + $0x600] sm:$0xff] }
 0x595   : > { %3117 = vmatprep.subr.mxu0 %v2501_v35  ;;  %3171 = vmatprep.mubr.f32.mxu0 %v5684_v31  ;;  %v5749_v15 = vpop.permute.xlu0 %4475  ;;  %v2565_v31 = vld [vmem:[#allocation9 + $0x8a8] sm:$0xff]  ;;  %v2548_v46 = vld [vmem:[#allocation9 + $0x820] sm:$0xff]  ;;  %v2543_v47 = vld [vmem:[#allocation9 + $0x7f8] sm:$0xff] }
 0x596   : > { %3190 = vmatprep.subr.mxu1 %v2569_v48  ;;  %3118 = vmatpush1.msra.mxu0 %v2500_v37  ;;  %v4478_v55 = vunpack.i.h.bf16 %v5749_v15  ;;  %v4477_v58 = vunpack.i.l.bf16 %v5749_v15  ;;  %v2547_v35 = vld [vmem:[#allocation9 + $0x818] sm:$0xff]  ;;  %v2542_v48 = vld [vmem:[#allocation9 + $0x7f0] sm:$0xff]  ;;  %v2540_v56 = vld [vmem:[#allocation9 + $0x7e0] sm:$0xff] }
 0x597   : > { %3191 = vmatpush1.msra.mxu1 %v2568_v49  ;;  %3100 = vmatprep.mubr.f32.mxu1 %v2162_v50  ;;  %v2546_v37 = vld [vmem:[#allocation9 + $0x810] sm:$0xff]  ;;  %v2541_v49 = vld [vmem:[#allocation9 + $0x7e8] sm:$0xff]  ;;  %v2632_v15 = vld [vmem:[#allocation9 + $0xac0] sm:$0xff] }
 0x598   : > { %3119 = vmatprep.subr.mxu0 %v2499_v53  ;;  %3192 = vmatprep.subr.mxu1 %v2567_v54  ;;  %v2202_v5 = vsel %vm795_vm4, %v4477_v58, %v4478_v55  ;;  %v2545_v50 = vld [vmem:[#allocation9 + $0x808] sm:$0xff]  ;;  %v2544_v53 = vld [vmem:[#allocation9 + $0x800] sm:$0xff]  ;;  %v2539_v54 = vld [vmem:[#allocation9 + $0x7d8] sm:$0xff] }
 0x599   : > { %3101 = vmatmul.mubr.f32.gmra.mxu1 %v2161_v59  ;;  %3120 = vmatpush1.msra.mxu0 %v2498_v60  ;;  %v2607_v55 = vld [vmem:[#allocation9 + $0x9f8] sm:$0xff]  ;;  %v2538_v59 = vld [vmem:[#allocation9 + $0x7d0] sm:$0xff] }
 0x59a   : > { %3193 = vmatpush1.msra.mxu1 %v2566_v44  ;;  %3121 = vmatprep.subr.mxu0 %v2497_v61  ;;  %v2606_v60 = vld [vmem:[#allocation9 + $0x9f0] sm:$0xff]  ;;  %v2537_v44 = vld [vmem:[#allocation9 + $0x7c8] sm:$0xff] }
 0x59b   : > { %3194 = vmatprep.subr.mxu1 %v2565_v31  ;;  %3122 = vmatpush1.msra.mxu0 %v2496_v41  ;;  %v2605_v61 = vld [vmem:[#allocation9 + $0x9e8] sm:$0xff]  ;;  %v2536_v31 = vld [vmem:[#allocation9 + $0x7c0] sm:$0xff] }
 0x59c   : > { %3195 = vmatpush1.msra.mxu1 %v2564_v1  ;;  %3123 = vmatprep.subr.mxu0 %v2495_v2  ;;  %v2604_v41 = vld [vmem:[#allocation9 + $0x9e0] sm:$0xff]  ;;  %v2535_v1 = vld [vmem:[#allocation9 + $0x7b8] sm:$0xff] }
 0x59d   : > { %3196 = vmatprep.subr.mxu1 %v2563_v4  ;;  %3248 = vmatprep.mubr.f32.mxu1 %v2202_v5  ;;  %v2603_v2 = vld [vmem:[#allocation9 + $0x9d8] sm:$0xff]  ;;  %v2534_v4 = vld [vmem:[#allocation9 + $0x7b0] sm:$0xff] }
 0x59e   : > { %3124 = vmatpush1.msra.mxu0 %v2494_v6  ;;  %3197 = vmatpush1.msra.mxu1 %v2562_v0  ;;  %v2602_v5 = vld [vmem:[#allocation9 + $0x9d0] sm:$0xff]  ;;  %v2533_v6 = vld [vmem:[#allocation9 + $0x7a8] sm:$0xff] }
 0x59f   : > { %3125 = vmatprep.subr.mxu0 %v2493_v3  ;;  %3198 = vmatprep.subr.mxu1 %v2561_v52  ;;  %v2601_v0 = vld [vmem:[#allocation9 + $0x9c8] sm:$0xff]  ;;  %v2532_v3 = vld [vmem:[#allocation9 + $0x7a0] sm:$0xff] }
 0x5a0   : > { %3126 = vmatpush1.msra.mxu0 %v2492_v8  ;;  %3199 = vmatpush1.msra.mxu1 %v2560_v9  ;;  %v2600_v52 = vld [vmem:[#allocation9 + $0x9c0] sm:$0xff]  ;;  %v2531_v8 = vld [vmem:[#allocation9 + $0x798] sm:$0xff] }
 0x5a1   : > { %3127 = vmatprep.subr.mxu0 %v2491_v10  ;;  %3200 = vmatprep.subr.mxu1 %v2559_v11  ;;  %v2599_v9 = vld [vmem:[#allocation9 + $0x9b8] sm:$0xff]  ;;  %v2530_v10 = vld [vmem:[#allocation9 + $0x790] sm:$0xff] }
 0x5a2   : > { %3128 = vmatpush1.msra.mxu0 %v2490_v12  ;;  %3201 = vmatpush1.msra.mxu1 %v2558_v13  ;;  %v2598_v11 = vld [vmem:[#allocation9 + $0x9b0] sm:$0xff]  ;;  %v2529_v12 = vld [vmem:[#allocation9 + $0x788] sm:$0xff] }
 0x5a3   : > { %3129 = vmatprep.subr.mxu0 %v2489_v14  ;;  %3202 = vmatprep.subr.mxu1 %v2557_v16  ;;  %v2597_v13 = vld [vmem:[#allocation9 + $0x9a8] sm:$0xff]  ;;  %v2528_v14 = vld [vmem:[#allocation9 + $0x780] sm:$0xff] }
 0x5a4   : > { %3130 = vmatpush1.msra.mxu0 %v2488_v62  ;;  %3203 = vmatpush1.msra.mxu1 %v2556_v18  ;;  %v2596_v16 = vld [vmem:[#allocation9 + $0x9a0] sm:$0xff]  ;;  %v2527_v62 = vld [vmem:[#allocation9 + $0x778] sm:$0xff] }
 0x5a5   : > { %3131 = vmatprep.subr.mxu0 %v2487_v36  ;;  %3204 = vmatprep.subr.mxu1 %v2555_v20  ;;  %v2595_v18 = vld [vmem:[#allocation9 + $0x998] sm:$0xff]  ;;  %v2526_v36 = vld [vmem:[#allocation9 + $0x770] sm:$0xff] }
 0x5a6   : > { %3132 = vmatpush1.msra.mxu0 %v2486_v22  ;;  %3205 = vmatpush1.msra.mxu1 %v2554_v25  ;;  %v2594_v20 = vld [vmem:[#allocation9 + $0x990] sm:$0xff]  ;;  %v2525_v22 = vld [vmem:[#allocation9 + $0x768] sm:$0xff] }
 0x5a7   : > { %3133 = vmatprep.subr.mxu0 %v2485_v26  ;;  %3206 = vmatprep.subr.mxu1 %v2553_v27  ;;  %v2593_v25 = vld [vmem:[#allocation9 + $0x988] sm:$0xff]  ;;  %v2524_v26 = vld [vmem:[#allocation9 + $0x760] sm:$0xff] }
 0x5a8   : > { %3134 = vmatpush1.msra.mxu0 %v2484_v28  ;;  %3207 = vmatpush1.msra.mxu1 %v2552_v29  ;;  %v2592_v27 = vld [vmem:[#allocation9 + $0x980] sm:$0xff]  ;;  %v2523_v28 = vld [vmem:[#allocation9 + $0x758] sm:$0xff] }
 0x5a9   : > { %3135 = vmatprep.subr.mxu0 %v2483_v42  ;;  %3208 = vmatprep.subr.mxu1 %v2551_v30  ;;  %v2591_v29 = vld [vmem:[#allocation9 + $0x978] sm:$0xff]  ;;  %v2522_v42 = vld [vmem:[#allocation9 + $0x750] sm:$0xff] }
 0x5aa   : > { %3136 = vmatpush1.msra.mxu0 %v2482_v17  ;;  %3209 = vmatpush1.msra.mxu1 %v2550_v32  ;;  %v2590_v30 = vld [vmem:[#allocation9 + $0x970] sm:$0xff]  ;;  %v2521_v17 = vld [vmem:[#allocation9 + $0x748] sm:$0xff] }
 0x5ab   : > { %3137 = vmatprep.subr.mxu0 %v2481_v34  ;;  %3210 = vmatprep.subr.mxu1 %v2549_v40  ;;  %v2589_v32 = vld [vmem:[#allocation9 + $0x968] sm:$0xff]  ;;  %v2520_v34 = vld [vmem:[#allocation9 + $0x740] sm:$0xff] }
 0x5ac   : > { %3138 = vmatpush1.msra.mxu0 %v2480_v45  ;;  %3211 = vmatpush1.msra.mxu1 %v2548_v46  ;;  %v2588_v40 = vld [vmem:[#allocation9 + $0x960] sm:$0xff]  ;;  %v2519_v45 = vld [vmem:[#allocation9 + $0x738] sm:$0xff] }
 0x5ad   : > { %3139 = vmatprep.subr.mxu0 %v2543_v47  ;;  %3212 = vmatprep.subr.mxu1 %v2547_v35  ;;  %v2587_v46 = vld [vmem:[#allocation9 + $0x958] sm:$0xff]  ;;  %v2518_v47 = vld [vmem:[#allocation9 + $0x730] sm:$0xff] }
 0x5ae   : > { %3140 = vmatpush2.msra.mxu0 %v2542_v48  ;;  %3213 = vmatpush1.msra.mxu1 %v2546_v37  ;;  %v2586_v35 = vld [vmem:[#allocation9 + $0x950] sm:$0xff]  ;;  %v2517_v48 = vld [vmem:[#allocation9 + $0x728] sm:$0xff] }
 0x5af   : > { %3141 = vmatprep.subr.mxu0 %v2541_v49  ;;  %3214 = vmatprep.subr.mxu1 %v2545_v50  ;;  %v2585_v37 = vld [vmem:[#allocation9 + $0x948] sm:$0xff]  ;;  %v2516_v49 = vld [vmem:[#allocation9 + $0x720] sm:$0xff] }
 0x5b0   : > { %3142 = vmatpush2.msra.mxu0 %v2540_v56  ;;  %3215 = vmatpush1.msra.mxu1 %v2544_v53  ;;  %v2584_v50 = vld [vmem:[#allocation9 + $0x940] sm:$0xff]  ;;  %v2515_v56 = vld [vmem:[#allocation9 + $0x718] sm:$0xff] }
 0x5b1   : > { %3143 = vmatprep.subr.mxu0 %v2539_v54  ;;  %3216 = vmatprep.subr.mxu1 %v2607_v55  ;;  %v2583_v53 = vld [vmem:[#allocation9 + $0x938] sm:$0xff]  ;;  %v5757_v54 = vpop.permute.xlu0 %4480  ;;  %v2514_v55 = vld [vmem:[#allocation9 + $0x710] sm:$0xff] }
 0x5b2   : > { %3144 = vmatpush2.msra.mxu0 %v2538_v59  ;;  %3217 = vmatpush2.msra.mxu1 %v2606_v60  ;;  %v2582_v59 = vld [vmem:[#allocation9 + $0x930] sm:$0xff]  ;;  %v2513_v60 = vld [vmem:[#allocation9 + $0x708] sm:$0xff] }
 0x5b3   : > { %3145 = vmatprep.subr.mxu0 %v2537_v44  ;;  %3218 = vmatprep.subr.mxu1 %v2605_v61  ;;  %v2581_v44 = vld [vmem:[#allocation9 + $0x928] sm:$0xff]  ;;  %v2512_v61 = vld [vmem:[#allocation9 + $0x700] sm:$0xff] }
 0x5b4   : > { %3146 = vmatpush2.msra.mxu0 %v2536_v31  ;;  %3219 = vmatpush2.msra.mxu1 %v2604_v41  ;;  %v2580_v31 = vld [vmem:[#allocation9 + $0x920] sm:$0xff]  ;;  %v2579_v41 = vld [vmem:[#allocation9 + $0x918] sm:$0xff] }
 0x5b5   : > { %3147 = vmatprep.subr.mxu0 %v2535_v1  ;;  %3220 = vmatprep.subr.mxu1 %v2603_v2  ;;  %v2639_v1 = vld [vmem:[#allocation9 + $0xaf8] sm:$0xff]  ;;  %v2578_v2 = vld [vmem:[#allocation9 + $0x910] sm:$0xff] }
 0x5b6   : > { %3148 = vmatpush2.msra.mxu0 %v2534_v4  ;;  %3221 = vmatpush2.msra.mxu1 %v2602_v5  ;;  %v2638_v4 = vld [vmem:[#allocation9 + $0xaf0] sm:$0xff]  ;;  %v5759_v5 = vpop.permute.xlu0 %4485 }
 0x5b7   : > { %3149 = vmatprep.subr.mxu0 %v2533_v6  ;;  %3222 = vmatprep.subr.mxu1 %v2601_v0  ;;  %v2577_v6 = vld [vmem:[#allocation9 + $0x908] sm:$0xff] }
 0x5b8   : > { %3150 = vmatpush2.msra.mxu0 %v2532_v3  ;;  %3223 = vmatpush2.msra.mxu1 %v2600_v52  ;;  %v2637_v0 = vld [vmem:[#allocation9 + $0xae8] sm:$0xff]  ;;  %v2576_v3 = vld [vmem:[#allocation9 + $0x900] sm:$0xff] }
 0x5b9   : > { %3151 = vmatprep.subr.mxu0 %v2531_v8  ;;  %3224 = vmatprep.subr.mxu1 %v2599_v9  ;;  %v2636_v52 = vld [vmem:[#allocation9 + $0xae0] sm:$0xff]  ;;  %v4483_v8 = vunpack.i.h.bf16 %v5757_v54  ;;  %v4482_v9 = vunpack.i.l.bf16 %v5757_v54 }
 0x5ba   : > { %3152 = vmatpush2.msra.mxu0 %v2530_v10  ;;  %3225 = vmatpush2.msra.mxu1 %v2598_v11  ;;  %v2190_v10 = vpop.permute.xlu1 %2189  ;;  %v4488_v11 = vunpack.i.h.bf16 %v5759_v5  ;;  %v2620_v54 = vld [vmem:[#allocation9 + $0xa60] sm:$0xff] }
 0x5bb   : > { %3153 = vmatprep.subr.mxu0 %v2529_v12  ;;  %3226 = vmatprep.subr.mxu1 %v2597_v13  ;;  %v4487_v12 = vunpack.i.l.bf16 %v5759_v5  ;;  %v2703_v13 = vld [vmem:[#allocation9 + $0xcf8] sm:$0xff] }
 0x5bc   : > { %3154 = vmatpush2.msra.mxu0 %v2528_v14  ;;  %3227 = vmatpush2.msra.mxu1 %v2596_v16  ;;  %v2634_v14 = vld [vmem:[#allocation9 + $0xad0] sm:$0xff] }
 0x5bd   : > { %3155 = vmatprep.subr.mxu0 %v2527_v62  ;;  %3228 = vmatprep.subr.mxu1 %v2595_v18  ;;  %v2702_v16 = vld [vmem:[#allocation9 + $0xcf0] sm:$0xff]  ;;  %v2204_v62 = vsel %vm795_vm4, %v4482_v9, %v4483_v8  ;;  %v2633_v18 = vld [vmem:[#allocation9 + $0xac8] sm:$0xff] }
 0x5be   : > { %3156 = vmatpush2.msra.mxu0 %v2526_v36  ;;  %3229 = vmatpush2.msra.mxu1 %v2594_v20  ;;  %v2701_v36 = vld [vmem:[#allocation9 + $0xce8] sm:$0xff]  ;;  %v2222_v20 = vsel %vm2158_vm10, %v4487_v12, %v4488_v11  ;;  %v2611_v11 = vld [vmem:[#allocation9 + $0xa18] sm:$0xff] }
 0x5bf   : > { %3157 = vmatprep.subr.mxu0 %v2525_v22  ;;  %3230 = vmatprep.subr.mxu1 %v2593_v25  ;;  %v2700_v22 = vld [vmem:[#allocation9 + $0xce0] sm:$0xff]  ;;  %v2699_v25 = vld [vmem:[#allocation9 + $0xcd8] sm:$0xff]  ;;  %v2681_v8 = vld [vmem:[#allocation9 + $0xc48] sm:$0xff] }
 0x5c0   : > { %3158 = vmatpush2.msra.mxu0 %v2524_v26  ;;  %3231 = vmatpush2.msra.mxu1 %v2592_v27  ;;  %v2630_v26 = vld [vmem:[#allocation9 + $0xab0] sm:$0xff] }
 0x5c1   : > { %3159 = vmatprep.subr.mxu0 %v2523_v28  ;;  %3232 = vmatprep.subr.mxu1 %v2591_v29  ;;  %v2698_v28 = vld [vmem:[#allocation9 + $0xcd0] sm:$0xff]  ;;  %v2629_v29 = vld [vmem:[#allocation9 + $0xaa8] sm:$0xff] }
 0x5c2   : > { %3160 = vmatpush2.msra.mxu0 %v2522_v42  ;;  %3233 = vmatpush2.msra.mxu1 %v2590_v30  ;;  %v2697_v42 = vld [vmem:[#allocation9 + $0xcc8] sm:$0xff]  ;;  %v2628_v30 = vld [vmem:[#allocation9 + $0xaa0] sm:$0xff] }
 0x5c3   : > { %3161 = vmatprep.subr.mxu0 %v2521_v17  ;;  %3234 = vmatprep.subr.mxu1 %v2589_v32  ;;  %v2696_v17 = vld [vmem:[#allocation9 + $0xcc0] sm:$0xff]  ;;  %v2627_v32 = vld [vmem:[#allocation9 + $0xa98] sm:$0xff] }
 0x5c4   : > { %3162 = vmatpush2.msra.mxu0 %v2520_v34  ;;  %3235 = vmatpush2.msra.mxu1 %v2588_v40  ;;  %v2695_v34 = vld [vmem:[#allocation9 + $0xcb8] sm:$0xff]  ;;  %v2626_v40 = vld [vmem:[#allocation9 + $0xa90] sm:$0xff] }
 0x5c5   : > { %3163 = vmatprep.subr.mxu0 %v2519_v45  ;;  %3236 = vmatprep.subr.mxu1 %v2587_v46  ;;  %v2694_v45 = vld [vmem:[#allocation9 + $0xcb0] sm:$0xff]  ;;  %v2625_v46 = vld [vmem:[#allocation9 + $0xa88] sm:$0xff] }
 0x5c6   : > { %3164 = vmatpush2.msra.mxu0 %v2518_v47  ;;  %3237 = vmatpush2.msra.mxu1 %v2586_v35  ;;  %v2693_v47 = vld [vmem:[#allocation9 + $0xca8] sm:$0xff]  ;;  %v2624_v35 = vld [vmem:[#allocation9 + $0xa80] sm:$0xff] }
 0x5c7   : > { %3165 = vmatprep.subr.mxu0 %v2517_v48  ;;  %3238 = vmatprep.subr.mxu1 %v2585_v37  ;;  %v2692_v48 = vld [vmem:[#allocation9 + $0xca0] sm:$0xff]  ;;  %v2623_v37 = vld [vmem:[#allocation9 + $0xa78] sm:$0xff] }
 0x5c8   : > { %3166 = vmatpush2.msra.mxu0 %v2516_v49  ;;  %3239 = vmatpush2.msra.mxu1 %v2584_v50  ;;  %v2691_v49 = vld [vmem:[#allocation9 + $0xc98] sm:$0xff]  ;;  %v2690_v50 = vld [vmem:[#allocation9 + $0xc90] sm:$0xff] }
 0x5c9   : > { %3167 = vmatprep.subr.mxu0 %v2515_v56  ;;  %3240 = vmatprep.subr.mxu1 %v2583_v53  ;;  %v2621_v56 = vld [vmem:[#allocation9 + $0xa68] sm:$0xff] }
 0x5ca   : > { %3168 = vmatpush2.msra.mxu0 %v2514_v55  ;;  %3241 = vmatpush2.msra.mxu1 %v2582_v59  ;;  %v2689_v53 = vld [vmem:[#allocation9 + $0xc88] sm:$0xff]  ;;  %v2688_v55 = vld [vmem:[#allocation9 + $0xc80] sm:$0xff]  ;;  %v2619_v59 = vld [vmem:[#allocation9 + $0xa58] sm:$0xff] }
 0x5cb   : > { %3169 = vmatprep.subr.mxu0 %v2513_v60  ;;  %3242 = vmatprep.subr.mxu1 %v2581_v44  ;;  %v2687_v60 = vld [vmem:[#allocation9 + $0xc78] sm:$0xff]  ;;  %v2618_v44 = vld [vmem:[#allocation9 + $0xa50] sm:$0xff] }
 0x5cc   : > { %3170 = vmatpush2.msra.mxu0 %v2512_v61  ;;  %3243 = vmatpush2.msra.mxu1 %v2580_v31  ;;  %v2686_v61 = vld [vmem:[#allocation9 + $0xc70] sm:$0xff]  ;;  %v2617_v31 = vld [vmem:[#allocation9 + $0xa48] sm:$0xff] }
 0x5cd   : > { %3172 = vmatmul.mubr.f32.vlgmr.msra.gmra.mxu0 %v5674_v23  ;;  %3244 = vmatprep.subr.mxu1 %v2579_v41  ;;  %v2635_v23 = vld [vmem:[#allocation9 + $0xad8] sm:$0xff]  ;;  %v2685_v41 = vld [vmem:[#allocation9 + $0xc68] sm:$0xff] }
 0x5ce   : > { %3261 = vmatprep.subr.mxu0 %v2639_v1  ;;  %3177 = vmatprep.mubr.f32.mxu0 %v5691_v39  ;;  %v2201_v39 = vsel %vm795_vm4, %v2190_v10, %v4477_v58  ;;  %v2631_v58 = vld [vmem:[#allocation9 + $0xab8] sm:$0xff]  ;;  %v2616_v1 = vld [vmem:[#allocation9 + $0xa40] sm:$0xff] }
 0x5cf   : > { %3245 = vmatpush2.msra.mxu1 %v2578_v2  ;;  %3262 = vmatpush1.msra.mxu0 %v2638_v4  ;;  %v2684_v2 = vld [vmem:[#allocation9 + $0xc60] sm:$0xff]  ;;  %v2615_v4 = vld [vmem:[#allocation9 + $0xa38] sm:$0xff] }
 0x5d0   : > { %3246 = vmatprep.subr.mxu1 %v2577_v6  ;;  %3263 = vmatprep.subr.mxu0 %v2637_v0  ;;  %v2683_v6 = vld [vmem:[#allocation9 + $0xc58] sm:$0xff]  ;;  %v2614_v0 = vld [vmem:[#allocation9 + $0xa30] sm:$0xff]  ;;  %v2680_v10 = vld [vmem:[#allocation9 + $0xc40] sm:$0xff] }
 0x5d1   : > { %3247 = vmatpush2.msra.mxu1 %v2576_v3  ;;  %3264 = vmatpush1.msra.mxu0 %v2636_v52  ;;  %v2682_v3 = vld [vmem:[#allocation9 + $0xc50] sm:$0xff]  ;;  %v2613_v52 = vld [vmem:[#allocation9 + $0xa28] sm:$0xff] }
 0x5d2   : > { %3178 = vmatmul.mubr.f32.gmra.mxu0 %v5688_v38  ;;  %3249 = vmatmul.mubr.f32.vlgmr.msra.gmra.mxu1 %v2201_v39  ;;  %v2196_v38 = vpop.permute.xlu1 %2195  ;;  %v2678_v39 = vld [vmem:[#allocation9 + $0xc30] sm:$0xff] }
 0x5d3   : > { %3265 = vmatprep.subr.mxu0 %v2635_v23  ;;  %3338 = vmatprep.subr.mxu1 %v2703_v13  ;;  %v2203_v27 = vsel %vm795_vm4, %v2196_v38, %v4482_v9  ;;  %v2612_v9 = vld [vmem:[#allocation9 + $0xa20] sm:$0xff]  ;;  %v2679_v23 = vld [vmem:[#allocation9 + $0xc38] sm:$0xff]  ;;  %v2610_v13 = vld [vmem:[#allocation9 + $0xa10] sm:$0xff] }
 0x5d4   : > { %3254 = vmatprep.mubr.f32.mxu1 %v2204_v62  ;;  %3266 = vmatpush1.msra.mxu0 %v2634_v14  ;;  %v2609_v14 = vld [vmem:[#allocation9 + $0xa08] sm:$0xff]  ;;  %v2608_v62 = vld [vmem:[#allocation9 + $0xa00] sm:$0xff] }
 0x5d5   : > { %3325 = vmatprep.mubr.f32.mxu0 %v2222_v20  ;;  %3339 = vmatpush1.msra.mxu1 %v2702_v16  ;;  %v2677_v16 = vld [vmem:[#allocation9 + $0xc28] sm:$0xff]  ;;  %v2675_v20 = vld [vmem:[#allocation9 + $0xc18] sm:$0xff] }
 0x5d6   : > { %3267 = vmatprep.subr.mxu0 %v2633_v18  ;;  %3340 = vmatprep.subr.mxu1 %v2701_v36  ;;  %v2676_v18 = vld [vmem:[#allocation9 + $0xc20] sm:$0xff]  ;;  %v2671_v36 = vld [vmem:[#allocation9 + $0xbf8] sm:$0xff]  ;;  %v2673_v38 = vld [vmem:[#allocation9 + $0xc08] sm:$0xff] }
 0x5d7   : > { %3268 = vmatpush1.msra.mxu0 %v2632_v15  ;;  %3341 = vmatpush1.msra.mxu1 %v2700_v22  ;;  %v2670_v15 = vld [vmem:[#allocation9 + $0xbf0] sm:$0xff] }
 0x5d8   : > { %3255 = vmatmul.mubr.f32.gmra.mxu1 %v2203_v27  ;;  %3269 = vmatprep.subr.mxu0 %v2631_v58  ;;  %v2674_v22 = vld [vmem:[#allocation9 + $0xc10] sm:$0xff]  ;;  %v2669_v58 = vld [vmem:[#allocation9 + $0xbe8] sm:$0xff]  ;;  %v2667_v27 = vld [vmem:[#allocation9 + $0xbd8] sm:$0xff] }
 0x5d9   : > { %3342 = vmatprep.subr.mxu1 %v2699_v25  ;;  %3270 = vmatpush1.msra.mxu0 %v2630_v26  ;;  %v2668_v25 = vld [vmem:[#allocation9 + $0xbe0] sm:$0xff] }
 0x5da   : > { %3343 = vmatpush1.msra.mxu1 %v2698_v28  ;;  %3402 = vmatprep.mubr.f32.mxu1 %v5704_v51  ;;  %v2622_v51 = vld [vmem:[#allocation9 + $0xa70] sm:$0xff]  ;;  %v2672_v26 = vld [vmem:[#allocation9 + $0xc00] sm:$0xff]  ;;  %v2735_v28 = vld [vmem:[#allocation9 + $0xdf8] sm:$0xff] }
 0x5db   : > { %3271 = vmatprep.subr.mxu0 %v2629_v29  ;;  %3344 = vmatprep.subr.mxu1 %v2697_v42  ;;  %v2666_v29 = vld [vmem:[#allocation9 + $0xbd0] sm:$0xff] }
 0x5dc   : > { %3272 = vmatpush1.msra.mxu0 %v2628_v30  ;;  %3345 = vmatpush1.msra.mxu1 %v2696_v17  ;;  %v2734_v42 = vld [vmem:[#allocation9 + $0xdf0] sm:$0xff]  ;;  %v2665_v30 = vld [vmem:[#allocation9 + $0xbc8] sm:$0xff] }
 0x5dd   : > { %3273 = vmatprep.subr.mxu0 %v2627_v32  ;;  %3346 = vmatprep.subr.mxu1 %v2695_v34  ;;  %v2733_v17 = vld [vmem:[#allocation9 + $0xde8] sm:$0xff]  ;;  %v2664_v32 = vld [vmem:[#allocation9 + $0xbc0] sm:$0xff] }
 0x5de   : > { %3274 = vmatpush1.msra.mxu0 %v2626_v40  ;;  %3347 = vmatpush1.msra.mxu1 %v2694_v45  ;;  %v2732_v34 = vld [vmem:[#allocation9 + $0xde0] sm:$0xff]  ;;  %v2663_v40 = vld [vmem:[#allocation9 + $0xbb8] sm:$0xff] }
 0x5df   : > { %3275 = vmatprep.subr.mxu0 %v2625_v46  ;;  %3348 = vmatprep.subr.mxu1 %v2693_v47  ;;  %v2731_v45 = vld [vmem:[#allocation9 + $0xdd8] sm:$0xff]  ;;  %v2662_v46 = vld [vmem:[#allocation9 + $0xbb0] sm:$0xff] }
 0x5e0   : > { %3276 = vmatpush1.msra.mxu0 %v2624_v35  ;;  %3349 = vmatpush1.msra.mxu1 %v2692_v48  ;;  %v2730_v47 = vld [vmem:[#allocation9 + $0xdd0] sm:$0xff]  ;;  %v2661_v35 = vld [vmem:[#allocation9 + $0xba8] sm:$0xff] }
 0x5e1   : > { %3277 = vmatprep.subr.mxu0 %v2623_v37  ;;  %3350 = vmatprep.subr.mxu1 %v2691_v49  ;;  %v2729_v48 = vld [vmem:[#allocation9 + $0xdc8] sm:$0xff]  ;;  %v2660_v37 = vld [vmem:[#allocation9 + $0xba0] sm:$0xff] }
 0x5e2   : > { %3278 = vmatpush1.msra.mxu0 %v2622_v51  ;;  %3351 = vmatpush1.msra.mxu1 %v2690_v50  ;;  %v2728_v49 = vld [vmem:[#allocation9 + $0xdc0] sm:$0xff]  ;;  %v2659_v51 = vld [vmem:[#allocation9 + $0xb98] sm:$0xff] }
 0x5e3   : > { %3279 = vmatprep.subr.mxu0 %v2621_v56  ;;  %3352 = vmatprep.subr.mxu1 %v2689_v53  ;;  %v2727_v50 = vld [vmem:[#allocation9 + $0xdb8] sm:$0xff]  ;;  %v2658_v56 = vld [vmem:[#allocation9 + $0xb90] sm:$0xff] }
 0x5e4   : > { %3280 = vmatpush1.msra.mxu0 %v2620_v54  ;;  %3353 = vmatpush1.msra.mxu1 %v2688_v55  ;;  %v2726_v53 = vld [vmem:[#allocation9 + $0xdb0] sm:$0xff]  ;;  %v2657_v54 = vld [vmem:[#allocation9 + $0xb88] sm:$0xff] }
 0x5e5   : > { %3281 = vmatprep.subr.mxu0 %v2619_v59  ;;  %3354 = vmatprep.subr.mxu1 %v2687_v60  ;;  %v2725_v55 = vld [vmem:[#allocation9 + $0xda8] sm:$0xff]  ;;  %v2656_v59 = vld [vmem:[#allocation9 + $0xb80] sm:$0xff] }
 0x5e6   : > { %3282 = vmatpush1.msra.mxu0 %v2618_v44  ;;  %3355 = vmatpush1.msra.mxu1 %v2686_v61  ;;  %v2724_v60 = vld [vmem:[#allocation9 + $0xda0] sm:$0xff]  ;;  %v2655_v44 = vld [vmem:[#allocation9 + $0xb78] sm:$0xff] }
 0x5e7   : > { %3283 = vmatprep.subr.mxu0 %v2617_v31  ;;  %3356 = vmatprep.subr.mxu1 %v2685_v41  ;;  %v2723_v61 = vld [vmem:[#allocation9 + $0xd98] sm:$0xff]  ;;  %v2654_v31 = vld [vmem:[#allocation9 + $0xb70] sm:$0xff] }
 0x5e8   : > { %3284 = vmatpush1.msra.mxu0 %v2616_v1  ;;  %3357 = vmatpush1.msra.mxu1 %v2684_v2  ;;  %v2722_v41 = vld [vmem:[#allocation9 + $0xd90] sm:$0xff]  ;;  %v2653_v1 = vld [vmem:[#allocation9 + $0xb68] sm:$0xff] }
 0x5e9   : > { %3285 = vmatprep.subr.mxu0 %v2615_v4  ;;  %3358 = vmatprep.subr.mxu1 %v2683_v6  ;;  %v2721_v2 = vld [vmem:[#allocation9 + $0xd88] sm:$0xff]  ;;  %v2652_v4 = vld [vmem:[#allocation9 + $0xb60] sm:$0xff] }
 0x5ea   : > { %3286 = vmatpush1.msra.mxu0 %v2614_v0  ;;  %3359 = vmatpush1.msra.mxu1 %v2682_v3  ;;  %v2720_v6 = vld [vmem:[#allocation9 + $0xd80] sm:$0xff]  ;;  %v2651_v0 = vld [vmem:[#allocation9 + $0xb58] sm:$0xff] }
 0x5eb   : > { %3287 = vmatprep.subr.mxu0 %v2613_v52  ;;  %3360 = vmatprep.subr.mxu1 %v2681_v8  ;;  %v2719_v3 = vld [vmem:[#allocation9 + $0xd78] sm:$0xff]  ;;  %v2650_v52 = vld [vmem:[#allocation9 + $0xb50] sm:$0xff] }
 0x5ec   : > { %3288 = vmatpush1.msra.mxu0 %v2612_v9  ;;  %3361 = vmatpush1.msra.mxu1 %v2680_v10  ;;  %v2718_v8 = vld [vmem:[#allocation9 + $0xd70] sm:$0xff]  ;;  %v2649_v9 = vld [vmem:[#allocation9 + $0xb48] sm:$0xff] }
 0x5ed   : > { %3289 = vmatprep.subr.mxu0 %v2611_v11  ;;  %3362 = vmatprep.subr.mxu1 %v2679_v23  ;;  %v2717_v10 = vld [vmem:[#allocation9 + $0xd68] sm:$0xff]  ;;  %v2648_v11 = vld [vmem:[#allocation9 + $0xb40] sm:$0xff] }
 0x5ee   : > { %3290 = vmatpush1.msra.mxu0 %v2610_v13  ;;  %3363 = vmatpush1.msra.mxu1 %v2678_v39  ;;  %v2716_v23 = vld [vmem:[#allocation9 + $0xd60] sm:$0xff]  ;;  %v2647_v13 = vld [vmem:[#allocation9 + $0xb38] sm:$0xff] }
 0x5ef   : > { %3291 = vmatprep.subr.mxu0 %v2609_v14  ;;  %3364 = vmatprep.subr.mxu1 %v2677_v16  ;;  %v2715_v39 = vld [vmem:[#allocation9 + $0xd58] sm:$0xff]  ;;  %v2646_v14 = vld [vmem:[#allocation9 + $0xb30] sm:$0xff] }
 0x5f0   : > { %3292 = vmatpush1.msra.mxu0 %v2608_v62  ;;  %3365 = vmatpush1.msra.mxu1 %v2676_v18  ;;  %v2714_v16 = vld [vmem:[#allocation9 + $0xd50] sm:$0xff]  ;;  %v2645_v62 = vld [vmem:[#allocation9 + $0xb28] sm:$0xff] }
 0x5f1   : > { %3293 = vmatprep.subr.mxu0 %v2671_v36  ;;  %3366 = vmatprep.subr.mxu1 %v2675_v20  ;;  %v2713_v18 = vld [vmem:[#allocation9 + $0xd48] sm:$0xff]  ;;  %v2644_v36 = vld [vmem:[#allocation9 + $0xb20] sm:$0xff] }
 0x5f2   : > { %3294 = vmatpush2.msra.mxu0 %v2670_v15  ;;  %3367 = vmatpush1.msra.mxu1 %v2674_v22  ;;  %v2712_v20 = vld [vmem:[#allocation9 + $0xd40] sm:$0xff]  ;;  %v2210_v15 = vpop.permute.xlu1 %2209  ;;  %v4491_v22 = vpop.permute.xlu0 %4490 }
 0x5f3   : > { %3295 = vmatprep.subr.mxu0 %v2669_v58  ;;  %3368 = vmatprep.subr.mxu1 %v2673_v38  ;;  %v2643_v58 = vld [vmem:[#allocation9 + $0xb18] sm:$0xff] }
 0x5f4   : > { %3296 = vmatpush2.msra.mxu0 %v2668_v25  ;;  %3369 = vmatpush1.msra.mxu1 %v2672_v26  ;;  %v2711_v38 = vld [vmem:[#allocation9 + $0xd38] sm:$0xff]  ;;  %v2642_v25 = vld [vmem:[#allocation9 + $0xb10] sm:$0xff] }
 0x5f5   : > { %3297 = vmatprep.subr.mxu0 %v2667_v27  ;;  %3370 = vmatprep.subr.mxu1 %v2735_v28  ;;  %v2710_v26 = vld [vmem:[#allocation9 + $0xd30] sm:$0xff]  ;;  %v2641_v27 = vld [vmem:[#allocation9 + $0xb08] sm:$0xff] }
 0x5f6   : > { %3298 = vmatpush2.msra.mxu0 %v2666_v29  ;;  %3371 = vmatpush2.msra.mxu1 %v2734_v42  ;;  %v2709_v28 = vld [vmem:[#allocation9 + $0xd28] sm:$0xff]  ;;  %v4493_v29 = vunpack.i.h.bf16 %v4491_v22  ;;  %v4492_v42 = vunpack.i.l.bf16 %v4491_v22  ;;  %v2818_v22 = vld [vmem:[#allocation9 + $0x1090] sm:$0xff] }
 0x5f7   : > { %3299 = vmatprep.subr.mxu0 %v2665_v30  ;;  %3372 = vmatprep.subr.mxu1 %v2733_v17  ;;  %v2640_v30 = vld [vmem:[#allocation9 + $0xb00] sm:$0xff] }
 0x5f8   : > { %3300 = vmatpush2.msra.mxu0 %v2664_v32  ;;  %3373 = vmatpush2.msra.mxu1 %v2732_v34  ;;  %v2708_v17 = vld [vmem:[#allocation9 + $0xd20] sm:$0xff]  ;;  %v2707_v32 = vld [vmem:[#allocation9 + $0xd18] sm:$0xff] }
 0x5f9   : > { %3301 = vmatprep.subr.mxu0 %v2663_v40  ;;  %3374 = vmatprep.subr.mxu1 %v2731_v45  ;;  %v2767_v34 = vld [vmem:[#allocation9 + $0xef8] sm:$0xff]  ;;  %v5777_v40 = vpop.permute.xlu1 %4495  ;;  %v5779_v45 = vpop.permute.xlu0 %4500 }
 0x5fa   : > { %3302 = vmatpush2.msra.mxu0 %v2662_v46  ;;  %3375 = vmatpush2.msra.mxu1 %v2730_v47  ;;  %v2221_v46 = vsel %vm2158_vm10, %v2210_v15, %v4487_v12  ;;  %v2706_v47 = vld [vmem:[#allocation9 + $0xd10] sm:$0xff]  ;;  %v4503_v5 = vunpack.i.h.bf16 %v5779_v45  ;;  %v4502_v12 = vunpack.i.l.bf16 %v5779_v45 }
 0x5fb   : > { %3303 = vmatprep.subr.mxu0 %v2661_v35  ;;  %3376 = vmatprep.subr.mxu1 %v2729_v48  ;;  %v2766_v35 = vld [vmem:[#allocation9 + $0xef0] sm:$0xff]  ;;  %v2224_v48 = vsel %vm2158_vm10, %v4492_v42, %v4493_v29 }
 0x5fc   : > { %3304 = vmatpush2.msra.mxu0 %v2660_v37  ;;  %3377 = vmatpush2.msra.mxu1 %v2728_v49  ;;  %v2705_v37 = vld [vmem:[#allocation9 + $0xd08] sm:$0xff]  ;;  %v2750_v15 = vld [vmem:[#allocation9 + $0xe70] sm:$0xff] }
 0x5fd   : > { %3305 = vmatprep.subr.mxu0 %v2659_v51  ;;  %3378 = vmatprep.subr.mxu1 %v2727_v50  ;;  %v2765_v49 = vld [vmem:[#allocation9 + $0xee8] sm:$0xff]  ;;  %v2704_v51 = vld [vmem:[#allocation9 + $0xd00] sm:$0xff]  ;;  %v2746_v29 = vld [vmem:[#allocation9 + $0xe50] sm:$0xff] }
 0x5fe   : > { %3306 = vmatpush2.msra.mxu0 %v2658_v56  ;;  %3379 = vmatpush2.msra.mxu1 %v2726_v53  ;;  %v2764_v50 = vld [vmem:[#allocation9 + $0xee0] sm:$0xff]  ;;  %v4497_v56 = vunpack.i.l.bf16 %v5777_v40  ;;  %v2763_v53 = vld [vmem:[#allocation9 + $0xed8] sm:$0xff] }
 0x5ff   : > { %3307 = vmatprep.subr.mxu0 %v2657_v54  ;;  %3380 = vmatprep.subr.mxu1 %v2725_v55  ;;  %v2831_v54 = vld [vmem:[#allocation9 + $0x10f8] sm:$0xff] }
 0x600   : > { %3308 = vmatpush2.msra.mxu0 %v2656_v59  ;;  %3381 = vmatpush2.msra.mxu1 %v2724_v60  ;;  %v2223_v55 = vsel %vm2158_vm10, %v4497_v56, %v4492_v42  ;;  %v2762_v59 = vld [vmem:[#allocation9 + $0xed0] sm:$0xff]  ;;  %v5789_v60 = vpop.permute.xlu0 %4510  ;;  %v2739_v56 = vld [vmem:[#allocation9 + $0xe18] sm:$0xff] }
 0x601   : > { %3309 = vmatprep.subr.mxu0 %v2655_v44  ;;  %3382 = vmatprep.subr.mxu1 %v2723_v61  ;;  %v2830_v44 = vld [vmem:[#allocation9 + $0x10f0] sm:$0xff]  ;;  %v2761_v61 = vld [vmem:[#allocation9 + $0xec8] sm:$0xff] }
 0x602   : > { %3310 = vmatpush2.msra.mxu0 %v2654_v31  ;;  %3383 = vmatpush2.msra.mxu1 %v2722_v41  ;;  %v2829_v31 = vld [vmem:[#allocation9 + $0x10e8] sm:$0xff]  ;;  %v2261_v41 = vsel %vm795_vm4, %v4502_v12, %v4503_v5  ;;  %v2814_v42 = vld [vmem:[#allocation9 + $0x1070] sm:$0xff]  ;;  %v2807_v5 = vld [vmem:[#allocation9 + $0x1038] sm:$0xff] }
 0x603   : > { %3311 = vmatprep.subr.mxu0 %v2653_v1  ;;  %3384 = vmatprep.subr.mxu1 %v2721_v2  ;;  %v2760_v1 = vld [vmem:[#allocation9 + $0xec0] sm:$0xff] }
 0x604   : > { %3312 = vmatpush2.msra.mxu0 %v2652_v4  ;;  %3385 = vmatpush2.msra.mxu1 %v2720_v6  ;;  %v2828_v2 = vld [vmem:[#allocation9 + $0x10e0] sm:$0xff]  ;;  %v4512_v4 = vunpack.i.l.bf16 %v5789_v60  ;;  %v2759_v6 = vld [vmem:[#allocation9 + $0xeb8] sm:$0xff] }
 0x605   : > { %3313 = vmatprep.subr.mxu0 %v2651_v0  ;;  %3386 = vmatprep.subr.mxu1 %v2719_v3  ;;  %v2758_v0 = vld [vmem:[#allocation9 + $0xeb0] sm:$0xff]  ;;  %v4498_v3 = vunpack.i.h.bf16 %v5777_v40  ;;  %v4558_v40 = vld [vmem:[#allocation24 + $0xd0] sm:$0xff] }
 0x606   : > { %3314 = vmatpush2.msra.mxu0 %v2650_v52  ;;  %3387 = vmatpush2.msra.mxu1 %v2718_v8  ;;  %v2757_v52 = vld [vmem:[#allocation9 + $0xea8] sm:$0xff] }
 0x607   : > { %3315 = vmatprep.subr.mxu0 %v2649_v9  ;;  %3388 = vmatprep.subr.mxu1 %v2717_v10  ;;  %v2825_v8 = vld [vmem:[#allocation9 + $0x10c8] sm:$0xff]  ;;  %v2281_v9 = vsel %vm2158_vm10, %v4498_v3, %v4512_v4  ;;  %v2756_v10 = vld [vmem:[#allocation9 + $0xea0] sm:$0xff] }
 0x608   : > { %3316 = vmatpush2.msra.mxu0 %v2648_v11  ;;  %3389 = vmatpush2.msra.mxu1 %v2716_v23  ;;  %v2824_v11 = vld [vmem:[#allocation9 + $0x10c0] sm:$0xff]  ;;  %v2755_v23 = vld [vmem:[#allocation9 + $0xe98] sm:$0xff]  ;;  %v2797_v4 = vld [vmem:[#allocation9 + $0xfe8] sm:$0xff] }
 0x609   : > { %3317 = vmatprep.subr.mxu0 %v2647_v13  ;;  %3390 = vmatprep.subr.mxu1 %v2715_v39  ;;  %v2823_v13 = vld [vmem:[#allocation9 + $0x10b8] sm:$0xff]  ;;  %v2754_v39 = vld [vmem:[#allocation9 + $0xe90] sm:$0xff] }
 0x60a   : > { %3318 = vmatpush2.msra.mxu0 %v2646_v14  ;;  %3391 = vmatpush2.msra.mxu1 %v2714_v16  ;;  %v2822_v14 = vld [vmem:[#allocation9 + $0x10b0] sm:$0xff]  ;;  %v2821_v16 = vld [vmem:[#allocation9 + $0x10a8] sm:$0xff] }
 0x60b   : > { %3319 = vmatprep.subr.mxu0 %v2645_v62  ;;  %3392 = vmatprep.subr.mxu1 %v2713_v18  ;;  %v2752_v62 = vld [vmem:[#allocation9 + $0xe80] sm:$0xff] }
 0x60c   : > { %3320 = vmatpush2.msra.mxu0 %v2644_v36  ;;  %3393 = vmatpush2.msra.mxu1 %v2712_v20  ;;  %v2820_v18 = vld [vmem:[#allocation9 + $0x10a0] sm:$0xff]  ;;  %v2751_v36 = vld [vmem:[#allocation9 + $0xe78] sm:$0xff] }
 0x60d   : > { %3321 = vmatprep.subr.mxu0 %v2643_v58  ;;  %3394 = vmatprep.subr.mxu1 %v2711_v38  ;;  %v2819_v20 = vld [vmem:[#allocation9 + $0x1098] sm:$0xff]  ;;  %v2749_v58 = vld [vmem:[#allocation9 + $0xe68] sm:$0xff] }
 0x60e   : > { %3322 = vmatpush2.msra.mxu0 %v2642_v25  ;;  %3395 = vmatpush2.msra.mxu1 %v2710_v26  ;;  %v2817_v38 = vld [vmem:[#allocation9 + $0x1088] sm:$0xff]  ;;  %v2748_v25 = vld [vmem:[#allocation9 + $0xe60] sm:$0xff] }
 0x60f   : > { %3323 = vmatprep.subr.mxu0 %v2641_v27  ;;  %3396 = vmatprep.subr.mxu1 %v2709_v28  ;;  %v2816_v26 = vld [vmem:[#allocation9 + $0x1080] sm:$0xff]  ;;  %v2747_v27 = vld [vmem:[#allocation9 + $0xe58] sm:$0xff] }
 0x610   : > { %3324 = vmatpush2.msra.mxu0 %v2640_v30  ;;  %3397 = vmatpush2.msra.mxu1 %v2708_v17  ;;  %v2815_v28 = vld [vmem:[#allocation9 + $0x1078] sm:$0xff]  ;;  %v2745_v30 = vld [vmem:[#allocation9 + $0xe48] sm:$0xff] }
 0x611   : > { %3326 = vmatmul.mubr.f32.vlgmr.msra.gmra.mxu0 %v2221_v46  ;;  %3398 = vmatprep.subr.mxu1 %v2707_v32  ;;  %v2813_v17 = vld [vmem:[#allocation9 + $0x1068] sm:$0xff]  ;;  %v2744_v32 = vld [vmem:[#allocation9 + $0xe40] sm:$0xff]  ;;  %v2743_v46 = vld [vmem:[#allocation9 + $0xe38] sm:$0xff] }
 0x612   : > { %3415 = vmatprep.subr.mxu0 %v2767_v34  ;;  %3331 = vmatprep.mubr.f32.mxu0 %v2224_v48  ;;  %v2812_v34 = vld [vmem:[#allocation9 + $0x1060] sm:$0xff]  ;;  %v2810_v48 = vld [vmem:[#allocation9 + $0x1050] sm:$0xff] }
 0x613   : > { %3399 = vmatpush2.msra.mxu1 %v2706_v47  ;;  %3416 = vmatpush1.msra.mxu0 %v2766_v35  ;;  %v2811_v47 = vld [vmem:[#allocation9 + $0x1058] sm:$0xff]  ;;  %v2742_v35 = vld [vmem:[#allocation9 + $0xe30] sm:$0xff] }
 0x614   : > { %3400 = vmatprep.subr.mxu1 %v2705_v37  ;;  %3417 = vmatprep.subr.mxu0 %v2765_v49  ;;  %v2741_v37 = vld [vmem:[#allocation9 + $0xe28] sm:$0xff] }
 0x615   : > { %3401 = vmatpush2.msra.mxu1 %v2704_v51  ;;  %3418 = vmatpush1.msra.mxu0 %v2764_v50  ;;  %v2809_v49 = vld [vmem:[#allocation9 + $0x1048] sm:$0xff]  ;;  %v2740_v51 = vld [vmem:[#allocation9 + $0xe20] sm:$0xff] }
 0x616   : > { %3332 = vmatmul.mubr.f32.gmra.mxu0 %v2223_v55  ;;  %3403 = vmatmul.mubr.f32.vlgmr.msra.gmra.mxu1 %v5719_v63  ;;  %v2827_v63 = vld [vmem:[#allocation9 + $0x10d8] sm:$0xff]  ;;  %v2808_v50 = vld [vmem:[#allocation9 + $0x1040] sm:$0xff]  ;;  %v2737_v55 = vld [vmem:[#allocation9 + $0xe08] sm:$0xff] }
 0x617   : > { %3419 = vmatprep.subr.mxu0 %v2763_v53  ;;  %3492 = vmatprep.subr.mxu1 %v2831_v54  ;;  %v2738_v53 = vld [vmem:[#allocation9 + $0xe10] sm:$0xff] }
 0x618   : > { %3408 = vmatprep.mubr.f32.mxu1 %v5711_v57  ;;  %3420 = vmatpush1.msra.mxu0 %v2762_v59  ;;  %v2826_v57 = vld [vmem:[#allocation9 + $0x10d0] sm:$0xff]  ;;  %v2805_v59 = vld [vmem:[#allocation9 + $0x1028] sm:$0xff] }
 0x619   : > { %3479 = vmatprep.mubr.f32.mxu0 %v2261_v41  ;;  %3493 = vmatpush1.msra.mxu1 %v2830_v44  ;;  %v2806_v54 = vld [vmem:[#allocation9 + $0x1030] sm:$0xff]  ;;  %v2736_v44 = vld [vmem:[#allocation9 + $0xe00] sm:$0xff]  ;;  %v2803_v41 = vld [vmem:[#allocation9 + $0x1018] sm:$0xff] }
 0x61a   : > { %3421 = vmatprep.subr.mxu0 %v2761_v61  ;;  %3494 = vmatprep.subr.mxu1 %v2829_v31  ;;  %v2804_v61 = vld [vmem:[#allocation9 + $0x1020] sm:$0xff]  ;;  %v2799_v31 = vld [vmem:[#allocation9 + $0xff8] sm:$0xff] }
 0x61b   : > { %3422 = vmatpush1.msra.mxu0 %v2760_v1  ;;  %3495 = vmatpush1.msra.mxu1 %v2828_v2  ;;  %v2798_v1 = vld [vmem:[#allocation9 + $0xff0] sm:$0xff] }
 0x61c   : > { %3409 = vmatmul.mubr.f32.gmra.mxu1 %v5729_v7  ;;  %3423 = vmatprep.subr.mxu0 %v2759_v6  ;;  %v2753_v7 = vld [vmem:[#allocation9 + $0xe88] sm:$0xff]  ;;  %v2802_v2 = vld [vmem:[#allocation9 + $0x1010] sm:$0xff] }
 0x61d   : > { %3496 = vmatprep.subr.mxu1 %v2827_v63  ;;  %3424 = vmatpush1.msra.mxu0 %v2758_v0  ;;  %v2801_v6 = vld [vmem:[#allocation9 + $0x1008] sm:$0xff]  ;;  %v2796_v63 = vld [vmem:[#allocation9 + $0xfe0] sm:$0xff] }
 0x61e   : > { %3497 = vmatpush1.msra.mxu1 %v2826_v57  ;;  %3556 = vmatprep.mubr.f32.mxu1 %v2281_v9  ;;  %v2800_v0 = vld [vmem:[#allocation9 + $0x1000] sm:$0xff]  ;;  %v2795_v57 = vld [vmem:[#allocation9 + $0xfd8] sm:$0xff]  ;;  %v2862_v9 = vld [vmem:[#allocation9 + $0x11f0] sm:$0xff] }
 0x61f   : > { %3425 = vmatprep.subr.mxu0 %v2757_v52  ;;  %3498 = vmatprep.subr.mxu1 %v2825_v8  ;;  %v2863_v52 = vld [vmem:[#allocation9 + $0x11f8] sm:$0xff]  ;;  %v2794_v8 = vld [vmem:[#allocation9 + $0xfd0] sm:$0xff] }
 0x620   : > { %3426 = vmatpush1.msra.mxu0 %v2756_v10  ;;  %3499 = vmatpush1.msra.mxu1 %v2824_v11  ;;  %v2793_v10 = vld [vmem:[#allocation9 + $0xfc8] sm:$0xff] }
 0x621   : > { %3427 = vmatprep.subr.mxu0 %v2755_v23  ;;  %3500 = vmatprep.subr.mxu1 %v2823_v13  ;;  %v2861_v11 = vld [vmem:[#allocation9 + $0x11e8] sm:$0xff]  ;;  %v2792_v23 = vld [vmem:[#allocation9 + $0xfc0] sm:$0xff] }
 0x622   : > { %3428 = vmatpush1.msra.mxu0 %v2754_v39  ;;  %3501 = vmatpush1.msra.mxu1 %v2822_v14  ;;  %v2860_v13 = vld [vmem:[#allocation9 + $0x11e0] sm:$0xff]  ;;  %v2791_v39 = vld [vmem:[#allocation9 + $0xfb8] sm:$0xff] }
 0x623   : > { %3429 = vmatprep.subr.mxu0 %v2753_v7  ;;  %3502 = vmatprep.subr.mxu1 %v2821_v16  ;;  %v2859_v14 = vld [vmem:[#allocation9 + $0x11d8] sm:$0xff]  ;;  %v2790_v7 = vld [vmem:[#allocation9 + $0xfb0] sm:$0xff] }
 0x624   : > { %3430 = vmatpush1.msra.mxu0 %v2752_v62  ;;  %3503 = vmatpush1.msra.mxu1 %v2820_v18  ;;  %v2858_v16 = vld [vmem:[#allocation9 + $0x11d0] sm:$0xff]  ;;  %v2789_v62 = vld [vmem:[#allocation9 + $0xfa8] sm:$0xff] }
 0x625   : > { %3431 = vmatprep.subr.mxu0 %v2751_v36  ;;  %3504 = vmatprep.subr.mxu1 %v2819_v20  ;;  %v2857_v18 = vld [vmem:[#allocation9 + $0x11c8] sm:$0xff]  ;;  %v2788_v36 = vld [vmem:[#allocation9 + $0xfa0] sm:$0xff] }
 0x626   : > { %3432 = vmatpush1.msra.mxu0 %v2750_v15  ;;  %3505 = vmatpush1.msra.mxu1 %v2818_v22  ;;  %v2856_v20 = vld [vmem:[#allocation9 + $0x11c0] sm:$0xff]  ;;  %v2787_v15 = vld [vmem:[#allocation9 + $0xf98] sm:$0xff] }
 0x627   : > { %3433 = vmatprep.subr.mxu0 %v2749_v58  ;;  %3506 = vmatprep.subr.mxu1 %v2817_v38  ;;  %v2855_v22 = vld [vmem:[#allocation9 + $0x11b8] sm:$0xff]  ;;  %v2786_v58 = vld [vmem:[#allocation9 + $0xf90] sm:$0xff] }
 0x628   : > { %3434 = vmatpush1.msra.mxu0 %v2748_v25  ;;  %3507 = vmatpush1.msra.mxu1 %v2816_v26  ;;  %v2854_v38 = vld [vmem:[#allocation9 + $0x11b0] sm:$0xff]  ;;  %v2785_v25 = vld [vmem:[#allocation9 + $0xf88] sm:$0xff] }
 0x629   : > { %3435 = vmatprep.subr.mxu0 %v2747_v27  ;;  %3508 = vmatprep.subr.mxu1 %v2815_v28  ;;  %v2853_v26 = vld [vmem:[#allocation9 + $0x11a8] sm:$0xff]  ;;  %v2784_v27 = vld [vmem:[#allocation9 + $0xf80] sm:$0xff] }
 0x62a   : > { %3436 = vmatpush1.msra.mxu0 %v2746_v29  ;;  %3509 = vmatpush1.msra.mxu1 %v2814_v42  ;;  %v2852_v28 = vld [vmem:[#allocation9 + $0x11a0] sm:$0xff]  ;;  %v2783_v29 = vld [vmem:[#allocation9 + $0xf78] sm:$0xff] }
 0x62b   : > { %3437 = vmatprep.subr.mxu0 %v2745_v30  ;;  %3510 = vmatprep.subr.mxu1 %v2813_v17  ;;  %v2851_v42 = vld [vmem:[#allocation9 + $0x1198] sm:$0xff]  ;;  %v2782_v30 = vld [vmem:[#allocation9 + $0xf70] sm:$0xff] }
 0x62c   : > { %3438 = vmatpush1.msra.mxu0 %v2744_v32  ;;  %3511 = vmatpush1.msra.mxu1 %v2812_v34  ;;  %v2850_v17 = vld [vmem:[#allocation9 + $0x1190] sm:$0xff]  ;;  %v2781_v32 = vld [vmem:[#allocation9 + $0xf68] sm:$0xff] }
 0x62d   : > { %3439 = vmatprep.subr.mxu0 %v2743_v46  ;;  %3512 = vmatprep.subr.mxu1 %v2811_v47  ;;  %v2849_v34 = vld [vmem:[#allocation9 + $0x1188] sm:$0xff]  ;;  %v2780_v46 = vld [vmem:[#allocation9 + $0xf60] sm:$0xff] }
 0x62e   : > { %3440 = vmatpush1.msra.mxu0 %v2742_v35  ;;  %3513 = vmatpush1.msra.mxu1 %v2810_v48  ;;  %v2848_v47 = vld [vmem:[#allocation9 + $0x1180] sm:$0xff]  ;;  %v2779_v35 = vld [vmem:[#allocation9 + $0xf58] sm:$0xff] }
 0x62f   : > { %3441 = vmatprep.subr.mxu0 %v2741_v37  ;;  %3514 = vmatprep.subr.mxu1 %v2809_v49  ;;  %v2847_v48 = vld [vmem:[#allocation9 + $0x1178] sm:$0xff]  ;;  %v2778_v37 = vld [vmem:[#allocation9 + $0xf50] sm:$0xff] }
 0x630   : > { %3442 = vmatpush1.msra.mxu0 %v2740_v51  ;;  %3515 = vmatpush1.msra.mxu1 %v2808_v50  ;;  %v2846_v49 = vld [vmem:[#allocation9 + $0x1170] sm:$0xff]  ;;  %v5802_v51 = vpop.permute.xlu1 %4505  ;;  %v2777_v50 = vld [vmem:[#allocation9 + $0xf48] sm:$0xff] }
 0x631   : > { %3443 = vmatprep.subr.mxu0 %v2739_v56  ;;  %3516 = vmatprep.subr.mxu1 %v2807_v5  ;;  %v2845_v56 = vld [vmem:[#allocation9 + $0x1168] sm:$0xff]  ;;  %v2776_v5 = vld [vmem:[#allocation9 + $0xf40] sm:$0xff] }
 0x632   : > { %3444 = vmatpush1.msra.mxu0 %v2738_v53  ;;  %3517 = vmatpush1.msra.mxu1 %v2806_v54  ;;  %v2844_v53 = vld [vmem:[#allocation9 + $0x1160] sm:$0xff]  ;;  %v2775_v54 = vld [vmem:[#allocation9 + $0xf38] sm:$0xff] }
 0x633   : > { %3445 = vmatprep.subr.mxu0 %v2737_v55  ;;  %3518 = vmatprep.subr.mxu1 %v2805_v59  ;;  %v2843_v55 = vld [vmem:[#allocation9 + $0x1158] sm:$0xff]  ;;  %v2774_v59 = vld [vmem:[#allocation9 + $0xf30] sm:$0xff] }
 0x634   : > { %3446 = vmatpush1.msra.mxu0 %v2736_v44  ;;  %3519 = vmatpush1.msra.mxu1 %v2804_v61  ;;  %v2842_v44 = vld [vmem:[#allocation9 + $0x1150] sm:$0xff]  ;;  %v2773_v61 = vld [vmem:[#allocation9 + $0xf28] sm:$0xff] }
 0x635   : > { %3447 = vmatprep.subr.mxu0 %v2799_v31  ;;  %3520 = vmatprep.subr.mxu1 %v2803_v41  ;;  %v2841_v31 = vld [vmem:[#allocation9 + $0x1148] sm:$0xff]  ;;  %v2772_v41 = vld [vmem:[#allocation9 + $0xf20] sm:$0xff] }
 0x636   : > { %3448 = vmatpush2.msra.mxu0 %v2798_v1  ;;  %3521 = vmatpush1.msra.mxu1 %v2802_v2  ;;  %v2840_v1 = vld [vmem:[#allocation9 + $0x1140] sm:$0xff]  ;;  %v4516_v2 = vpop.permute.xlu1 %4515 }
 0x637   : > { %3449 = vmatprep.subr.mxu0 %v2797_v4  ;;  %3522 = vmatprep.subr.mxu1 %v2801_v6  ;;  %v2771_v4 = vld [vmem:[#allocation9 + $0xf18] sm:$0xff] }
 0x638   : > { %3450 = vmatpush2.msra.mxu0 %v2796_v63  ;;  %3523 = vmatpush1.msra.mxu1 %v2800_v0  ;;  %v2839_v6 = vld [vmem:[#allocation9 + $0x1138] sm:$0xff]  ;;  %v2770_v63 = vld [vmem:[#allocation9 + $0xf10] sm:$0xff] }
 0x639   : > { %3451 = vmatprep.subr.mxu0 %v2795_v57  ;;  %3524 = vmatprep.subr.mxu1 %v2863_v52  ;;  %v2838_v0 = vld [vmem:[#allocation9 + $0x1130] sm:$0xff]  ;;  %v2769_v57 = vld [vmem:[#allocation9 + $0xf08] sm:$0xff] }
 0x63a   : > { %3452 = vmatpush2.msra.mxu0 %v2794_v8  ;;  %3525 = vmatpush2.msra.mxu1 %v2862_v9  ;;  %v2837_v52 = vld [vmem:[#allocation9 + $0x1128] sm:$0xff]  ;;  %v4517_v8 = vunpack.i.l.bf16 %v4516_v2  ;;  %v2768_v9 = vld [vmem:[#allocation9 + $0xf00] sm:$0xff] }
 0x63b   : > { %3453 = vmatprep.subr.mxu0 %v2793_v10  ;;  %3526 = vmatprep.subr.mxu1 %v2861_v11  ;;  %v2836_v10 = vld [vmem:[#allocation9 + $0x1120] sm:$0xff]  ;;  %v4507_v11 = vunpack.i.l.bf16 %v5802_v51 }
 0x63c   : > { %3454 = vmatpush2.msra.mxu0 %v2792_v23  ;;  %3527 = vmatpush2.msra.mxu1 %v2860_v13  ;;  %v4521_v23 = vpop.permute.xlu0 %4520  ;;  %v2835_v13 = vld [vmem:[#allocation9 + $0x1118] sm:$0xff] }
 0x63d   : > { %3455 = vmatprep.subr.mxu0 %v2791_v39  ;;  %3528 = vmatprep.subr.mxu1 %v2859_v14  ;;  %v4508_v39 = vunpack.i.h.bf16 %v5802_v51  ;;  %v2834_v14 = vld [vmem:[#allocation9 + $0x1110] sm:$0xff]  ;;  %v4571_v51 = vld [vmem:[#allocation24 + $0x68] sm:$0xff] }
 0x63e   : > { %3456 = vmatpush2.msra.mxu0 %v2790_v7  ;;  %3529 = vmatpush2.msra.mxu1 %v2858_v16  ;;  %v4518_v7 = vunpack.i.h.bf16 %v4516_v2  ;;  %v4513_v16 = vunpack.i.h.bf16 %v5789_v60  ;;  %v4584_v2 = vld [vmem:[#allocation24] sm:$0xff] }
 0x63f   : > { %3457 = vmatprep.subr.mxu0 %v2789_v62  ;;  %3530 = vmatprep.subr.mxu1 %v2857_v18  ;;  %v2260_v62 = vsel %vm795_vm4, %v4507_v11, %v4502_v12  ;;  %v2833_v18 = vld [vmem:[#allocation9 + $0x1108] sm:$0xff]  ;;  %v4554_v12 = vld [vmem:[#allocation24 + $0xf0] sm:$0xff] }
 0x640   : > { %3458 = vmatpush2.msra.mxu0 %v2788_v36  ;;  %3531 = vmatpush2.msra.mxu1 %v2856_v20  ;;  %v4523_v36 = vunpack.i.h.bf16 %v4521_v23  ;;  %v4522_v20 = vunpack.i.l.bf16 %v4521_v23  ;;  %v2262_v60 = vsel %vm795_vm4, %v4518_v7, %v4508_v39  ;;  %v2280_v45 = vsel %vm2158_vm10, %v4513_v16, %v4498_v3  ;;  %v4559_v3 = vld [vmem:[#allocation24 + $0xc8] sm:$0xff]  ;;  %v4594_v11 = vld [vmem:[#allocation24 + $0x1b0] sm:$0xff]  ;;  %v4600_v16 = vld [vmem:[#allocation24 + $0x180] sm:$0xff] }
 0x641   : > { %3459 = vmatprep.subr.mxu0 %v2787_v15  ;;  %3532 = vmatprep.subr.mxu1 %v2855_v22  ;;  %v2263_v15 = vsel %vm795_vm4, %v4508_v39, %v4517_v8  ;;  %v2832_v22 = vld [vmem:[#allocation9 + $0x1100] sm:$0xff]  ;;  %v4591_v8 = vld [vmem:[#allocation24 + $0x1c8] sm:$0xff]  ;;  %v4597_v39 = vld [vmem:[#allocation24 + $0x198] sm:$0xff] }
 0x642   : > { %3460 = vmatpush2.msra.mxu0 %v2786_v58  ;;  %3533 = vmatpush2.msra.mxu1 %v2854_v38  ;;  %v4553_v58 = vld [vmem:[#allocation24 + $0xf8] sm:$0xff]  ;;  %v2283_v38 = vsel %vm2158_vm10, %v4522_v20, %v4523_v36  ;;  %v4595_v23 = vld [vmem:[#allocation24 + $0x1a8] sm:$0xff] }
 0x643   : > { %3461 = vmatprep.subr.mxu0 %v2785_v25  ;;  %3534 = vmatprep.subr.mxu1 %v2853_v26  ;;  %v4555_v25 = vld [vmem:[#allocation24 + $0xe8] sm:$0xff]  ;;  %v2275_v26 = vpop.permute.xlu1 %2274 }
 0x644   : > { %3462 = vmatpush2.msra.mxu0 %v2784_v27  ;;  %3535 = vmatpush2.msra.mxu1 %v2852_v28  ;;  %v4556_v27 = vld [vmem:[#allocation24 + $0xe0] sm:$0xff]  ;;  %v2282_v28 = vsel %vm2158_vm10, %v2275_v26, %v4522_v20  ;;  %v4599_v7 = vld [vmem:[#allocation24 + $0x188] sm:$0xff]  ;;  %v4613_v26 = vld [vmem:[#allocation24 + $0x118] sm:$0xff] }
 0x645   : > { %3463 = vmatprep.subr.mxu0 %v2783_v29  ;;  %3536 = vmatprep.subr.mxu1 %v2851_v42  ;;  %v4557_v29 = vld [vmem:[#allocation24 + $0xd8] sm:$0xff]  ;;  %v4560_v42 = vld [vmem:[#allocation24 + $0xc0] sm:$0xff]  ;;  %v4603_v36 = vld [vmem:[#allocation24 + $0x168] sm:$0xff] }
 0x646   : > { %3464 = vmatpush2.msra.mxu0 %v2782_v30  ;;  %3537 = vmatpush2.msra.mxu1 %v2850_v17  ;;  %v4561_v30 = vld [vmem:[#allocation24 + $0xb8] sm:$0xff]  ;;  %v4562_v17 = vld [vmem:[#allocation24 + $0xb0] sm:$0xff]  ;;  %v4604_v20 = vld [vmem:[#allocation24 + $0x160] sm:$0xff] }
 0x647   : > { %3465 = vmatprep.subr.mxu0 %v2781_v32  ;;  %3538 = vmatprep.subr.mxu1 %v2849_v34  ;;  %v4563_v32 = vld [vmem:[#allocation24 + $0xa8] sm:$0xff]  ;;  %v4564_v34 = vld [vmem:[#allocation24 + $0xa0] sm:$0xff] }
 0x648   : > { %3466 = vmatpush2.msra.mxu0 %v2780_v46  ;;  %3539 = vmatpush2.msra.mxu1 %v2848_v47  ;;  %v4565_v46 = vld [vmem:[#allocation24 + $0x98] sm:$0xff]  ;;  %v4566_v47 = vld [vmem:[#allocation24 + $0x90] sm:$0xff] }
 0x649   : > { %3467 = vmatprep.subr.mxu0 %v2779_v35  ;;  %3540 = vmatprep.subr.mxu1 %v2847_v48  ;;  %v4567_v35 = vld [vmem:[#allocation24 + $0x88] sm:$0xff]  ;;  %v4568_v48 = vld [vmem:[#allocation24 + $0x80] sm:$0xff] }
 0x64a   : > { %3468 = vmatpush2.msra.mxu0 %v2778_v37  ;;  %3541 = vmatpush2.msra.mxu1 %v2846_v49  ;;  %v4569_v37 = vld [vmem:[#allocation24 + $0x78] sm:$0xff]  ;;  %v4570_v49 = vld [vmem:[#allocation24 + $0x70] sm:$0xff] }
 0x64b   : > { %3469 = vmatprep.subr.mxu0 %v2777_v50  ;;  %3542 = vmatprep.subr.mxu1 %v2845_v56  ;;  %v4572_v50 = vld [vmem:[#allocation24 + $0x60] sm:$0xff]  ;;  %v4573_v56 = vld [vmem:[#allocation24 + $0x58] sm:$0xff] }
 0x64c   : > { %3470 = vmatpush2.msra.mxu0 %v2776_v5  ;;  %3543 = vmatpush2.msra.mxu1 %v2844_v53  ;;  %v4574_v5 = vld [vmem:[#allocation24 + $0x50] sm:$0xff]  ;;  %v4575_v53 = vld [vmem:[#allocation24 + $0x48] sm:$0xff] }
 0x64d   : > { %3471 = vmatprep.subr.mxu0 %v2775_v54  ;;  %3544 = vmatprep.subr.mxu1 %v2843_v55  ;;  %v4576_v54 = vld [vmem:[#allocation24 + $0x40] sm:$0xff]  ;;  %v4577_v55 = vld [vmem:[#allocation24 + $0x38] sm:$0xff] }
 0x64e   : > { %3472 = vmatpush2.msra.mxu0 %v2774_v59  ;;  %3545 = vmatpush2.msra.mxu1 %v2842_v44  ;;  %v4578_v59 = vld [vmem:[#allocation24 + $0x30] sm:$0xff]  ;;  %v4579_v44 = vld [vmem:[#allocation24 + $0x28] sm:$0xff] }
 0x64f   : > { %3473 = vmatprep.subr.mxu0 %v2773_v61  ;;  %3546 = vmatprep.subr.mxu1 %v2841_v31  ;;  %v4580_v61 = vld [vmem:[#allocation24 + $0x20] sm:$0xff]  ;;  %v4581_v31 = vld [vmem:[#allocation24 + $0x18] sm:$0xff] }
 0x650   : > { %3474 = vmatpush2.msra.mxu0 %v2772_v41  ;;  %3547 = vmatpush2.msra.mxu1 %v2840_v1  ;;  %v4582_v41 = vld [vmem:[#allocation24 + $0x10] sm:$0xff]  ;;  %v4583_v1 = vld [vmem:[#allocation24 + $0x8] sm:$0xff] }
 0x651   : > { %3475 = vmatprep.subr.mxu0 %v2771_v4  ;;  %3548 = vmatprep.subr.mxu1 %v2839_v6  ;;  %v4585_v4 = vld [vmem:[#allocation24 + $0x1f8] sm:$0xff]  ;;  %v4586_v6 = vld [vmem:[#allocation24 + $0x1f0] sm:$0xff] }
 0x652   : > { %3476 = vmatpush2.msra.mxu0 %v2770_v63  ;;  %3549 = vmatpush2.msra.mxu1 %v2838_v0  ;;  %v4587_v63 = vld [vmem:[#allocation24 + $0x1e8] sm:$0xff]  ;;  %v4588_v0 = vld [vmem:[#allocation24 + $0x1e0] sm:$0xff] }
 0x653   : > { %3477 = vmatprep.subr.mxu0 %v2769_v57  ;;  %3550 = vmatprep.subr.mxu1 %v2837_v52  ;;  %v4589_v57 = vld [vmem:[#allocation24 + $0x1d8] sm:$0xff]  ;;  %v4590_v52 = vld [vmem:[#allocation24 + $0x1d0] sm:$0xff] }
 0x654   : > { %3478 = vmatpush2.msra.mxu0 %v2768_v9  ;;  %3551 = vmatpush2.msra.mxu1 %v2836_v10  ;;  %v4592_v9 = vld [vmem:[#allocation24 + $0x1c0] sm:$0xff]  ;;  %v4593_v10 = vld [vmem:[#allocation24 + $0x1b8] sm:$0xff] }
 0x655   : > { %3480 = vmatmul.mubr.f32.vlgmr.msra.gmra.mxu0 %v2260_v62  ;;  %3552 = vmatprep.subr.mxu1 %v2835_v13  ;;  %v4596_v13 = vld [vmem:[#allocation24 + $0x1a0] sm:$0xff]  ;;  %v4601_v62 = vld [vmem:[#allocation24 + $0x178] sm:$0xff] }
 0x656   : > { %3485 = vmatprep.mubr.f32.mxu0 %v2263_v15  ;;  %3553 = vmatpush2.msra.mxu1 %v2834_v14  ;;  %v4598_v14 = vld [vmem:[#allocation24 + $0x190] sm:$0xff]  ;;  %v4605_v15 = vld [vmem:[#allocation24 + $0x158] sm:$0xff] }
 0x657   : > { %3554 = vmatprep.subr.mxu1 %v2833_v18  ;;  %3585 = vmatprep.subr.mxu0 %v4553_v58  ;;  %v4602_v18 = vld [vmem:[#allocation24 + $0x170] sm:$0xff] }
 0x658   : > { %3555 = vmatpush2.msra.mxu1 %v2832_v22  ;;  %3586 = vmatpush1.msra.mxu0 %v4554_v12  ;;  %v4606_v22 = vld [vmem:[#allocation24 + $0x150] sm:$0xff] }
 0x659   : > { %3486 = vmatmul.mubr.f32.gmra.mxu0 %v2262_v60  ;;  %3557 = vmatmul.mubr.f32.vlgmr.msra.gmra.mxu1 %v2280_v45  ;;  %v4608_v60 = vld [vmem:[#allocation24 + $0x140] sm:$0xff]  ;;  %v4609_v45 = vld [vmem:[#allocation24 + $0x138] sm:$0xff] }
 0x65a   : > { %3562 = vmatprep.mubr.f32.mxu1 %v2283_v38  ;;  %3587 = vmatprep.subr.mxu0 %v4555_v25  ;;  %v4611_v38 = vld [vmem:[#allocation24 + $0x128] sm:$0xff] }
 0x65b   : > { %3588 = vmatpush1.msra.mxu0 %v4556_v27  ;;  %3688 = vmatprep.subr.mxu1 %v4553_v58  ;;  %v4607_v58 = vld [vmem:[#allocation24 + $0x148] sm:$0xff] }
 0x65c   : > { %3589 = vmatprep.subr.mxu0 %v4557_v29  ;;  %3689 = vmatpush1.msra.mxu1 %v4554_v12  ;;  %v4610_v12 = vld [vmem:[#allocation24 + $0x130] sm:$0xff] }
 0x65d   : > { %3563 = vmatmul.mubr.f32.gmra.mxu1 %v2282_v28  ;;  %3590 = vmatpush1.msra.mxu0 %v4558_v40  ;;  %v4615_v28 = vld [vmem:[#allocation24 + $0x108] sm:$0xff] }
 0x65e   : > { %3591 = vmatprep.subr.mxu0 %v4559_v3  ;;  %3690 = vmatprep.subr.mxu1 %v4555_v25  ;;  %v4612_v25 = vld [vmem:[#allocation24 + $0x120] sm:$0xff] }
 0x65f   : > { %3592 = vmatpush1.msra.mxu0 %v4560_v42  ;;  %3691 = vmatpush1.msra.mxu1 %v4556_v27  ;;  %v4614_v27 = vld [vmem:[#allocation24 + $0x110] sm:$0xff] }
 0x660   : > { %3593 = vmatprep.subr.mxu0 %v4561_v30  ;;  %3692 = vmatprep.subr.mxu1 %v4557_v29  ;;  %v4616_v29 = vld [vmem:[#allocation24 + $0x100] sm:$0xff] }
 0x661   : > { %3594 = vmatpush1.msra.mxu0 %v4562_v17  ;;  %3693 = vmatpush1.msra.mxu1 %v4558_v40  ;;  %v3842_v40 = vld [vmem:[#allocation12 + $0xf8] sm:$0xff] }
 0x662   : > { %3595 = vmatprep.subr.mxu0 %v4563_v32  ;;  %3694 = vmatprep.subr.mxu1 %v4559_v3  ;;  %v2942_v3 = vpop.f32.mrf.mxu1 }
 0x663   : > { %3596 = vmatpush1.msra.mxu0 %v4564_v34  ;;  %3695 = vmatpush1.msra.mxu1 %v4560_v42 }
 0x664   : > { %3597 = vmatprep.subr.mxu0 %v4565_v46  ;;  %3696 = vmatprep.subr.mxu1 %v4561_v30  ;;  %v2944_v42 = vpop.f32.mrf.mxu1 }
 0x665   : > { %3598 = vmatpush1.msra.mxu0 %v4566_v47  ;;  %3697 = vmatpush1.msra.mxu1 %v4562_v17  ;;  %v3019_v17 = vpop.f32.mrf.mxu0 }
 0x666   : > { %3599 = vmatprep.subr.mxu0 %v4567_v35  ;;  %3698 = vmatprep.subr.mxu1 %v4563_v32  ;;  %v2948_v30 = vpop.f32.mrf.mxu1 }
 0x667   : > { %3600 = vmatpush1.msra.mxu0 %v4568_v48  ;;  %3699 = vmatpush1.msra.mxu1 %v4564_v34  ;;  %v3021_v34 = vpop.f32.mrf.mxu0 }
 0x668   : > { %3601 = vmatprep.subr.mxu0 %v4569_v37  ;;  %3700 = vmatprep.subr.mxu1 %v4565_v46  ;;  %v2950_v32 = vpop.f32.mrf.mxu1 }
 0x669   : > { %3602 = vmatpush1.msra.mxu0 %v4570_v49  ;;  %3701 = vmatpush1.msra.mxu1 %v4566_v47  ;;  %v3025_v47 = vpop.f32.mrf.mxu0 }
 0x66a   : > { %3603 = vmatprep.subr.mxu0 %v4571_v51  ;;  %3702 = vmatprep.subr.mxu1 %v4567_v35  ;;  %v3096_v46 = vpop.f32.mrf.mxu1 }
 0x66b   : > { %3604 = vmatpush1.msra.mxu0 %v4572_v50  ;;  %3703 = vmatpush1.msra.mxu1 %v4568_v48  ;;  %v3027_v48 = vpop.f32.mrf.mxu0 }
 0x66c   : > { %3605 = vmatprep.subr.mxu0 %v4573_v56  ;;  %3704 = vmatprep.subr.mxu1 %v4569_v37  ;;  %v3098_v35 = vpop.f32.mrf.mxu1 }
 0x66d   : > { %3606 = vmatpush1.msra.mxu0 %v4574_v5  ;;  %3705 = vmatpush1.msra.mxu1 %v4570_v49 }
 0x66e   : > { %3607 = vmatprep.subr.mxu0 %v4575_v53  ;;  %3706 = vmatprep.subr.mxu1 %v4571_v51  ;;  %v3102_v37 = vpop.f32.mrf.mxu1 }
 0x66f   : > { %3608 = vmatpush1.msra.mxu0 %v4576_v54  ;;  %3707 = vmatpush1.msra.mxu1 %v4572_v50 }
 0x670   : > { %3609 = vmatprep.subr.mxu0 %v4577_v55  ;;  %3708 = vmatprep.subr.mxu1 %v4573_v56  ;;  %v3104_v51 = vpop.f32.mrf.mxu1 }
 0x671   : > { %3610 = vmatpush1.msra.mxu0 %v4578_v59  ;;  %3709 = vmatpush1.msra.mxu1 %v4574_v5 }
 0x672   : > { %3611 = vmatprep.subr.mxu0 %v4579_v44  ;;  %3710 = vmatprep.subr.mxu1 %v4575_v53 }
 0x673   : > { %3612 = vmatpush1.msra.mxu0 %v4580_v61  ;;  %3711 = vmatpush1.msra.mxu1 %v4576_v54 }
 0x674   : > { %3613 = vmatprep.subr.mxu0 %v4581_v31  ;;  %3712 = vmatprep.subr.mxu1 %v4577_v55 }
 0x675   : > { %3614 = vmatpush1.msra.mxu0 %v4582_v41  ;;  %3713 = vmatpush1.msra.mxu1 %v4578_v59  ;;  %v2864_v59 = vld [vmem:[#allocation11] sm:$0x3] }
 0x676   : > { %3615 = vmatprep.subr.mxu0 %v4583_v1  ;;  %3714 = vmatprep.subr.mxu1 %v4579_v44 }
 0x677   : > { %3616 = vmatpush1.msra.mxu0 %v4584_v2  ;;  %3715 = vmatpush1.msra.mxu1 %v4580_v61 }
 0x678   : > { %3617 = vmatprep.subr.mxu0 %v4585_v4  ;;  %3716 = vmatprep.subr.mxu1 %v4581_v31  ;;  %v2869_v31 = vrot.slane %v2864_v59, %v5569_v21 }
 0x679   : > { %3618 = vmatpush2.msra.mxu0 %v4586_v6  ;;  %3717 = vmatpush1.msra.mxu1 %v4582_v41 }
 0x67a   : > { %3619 = vmatprep.subr.mxu0 %v4587_v63  ;;  %3718 = vmatprep.subr.mxu1 %v4583_v1 }
 0x67b   : > { %3620 = vmatpush2.msra.mxu0 %v4588_v0  ;;  %3719 = vmatpush1.msra.mxu1 %v4584_v2  ;;  %v2873_v2 = vrot.slane %v2864_v59, %v5572_v24 }
 0x67c   : > { %3621 = vmatprep.subr.mxu0 %v4589_v57  ;;  %3720 = vmatprep.subr.mxu1 %v4585_v4  ;;  %v2943_v4 = vadd.f32 %v2942_v3, %v2869_v31 }
 0x67d   : > { %3622 = vmatpush2.msra.mxu0 %v4590_v52  ;;  %3721 = vmatpush2.msra.mxu1 %v4586_v6  ;;  %v2949_v6 = vadd.f32 %v2948_v30, %v2869_v31 }
 0x67e   : > { %3623 = vmatprep.subr.mxu0 %v4591_v8  ;;  %3722 = vmatprep.subr.mxu1 %v4587_v63 }
 0x67f   : > { %3624 = vmatpush2.msra.mxu0 %v4592_v9  ;;  %3723 = vmatpush2.msra.mxu1 %v4588_v0 }
 0x680   : > { %3625 = vmatprep.subr.mxu0 %v4593_v10  ;;  %3724 = vmatprep.subr.mxu1 %v4589_v57  ;;  %v2945_v57 = vadd.f32 %v2944_v42, %v2873_v2 }
 0x681   : > { %3626 = vmatpush2.msra.mxu0 %v4594_v11  ;;  %3725 = vmatpush2.msra.mxu1 %v4590_v52  ;;  %v2951_v52 = vadd.f32 %v2950_v32, %v2873_v2 }
 0x682   : > { %3627 = vmatprep.subr.mxu0 %v4595_v23  ;;  %3726 = vmatprep.subr.mxu1 %v4591_v8  ;;  %v3020_v8 = vadd.f32 %v3019_v17, %v2943_v4 }
 0x683   : > { %3628 = vmatpush2.msra.mxu0 %v4596_v13  ;;  %3727 = vmatpush2.msra.mxu1 %v4592_v9  ;;  %v3026_v9 = vadd.f32 %v3025_v47, %v2949_v6 }
 0x684   : > { %3629 = vmatprep.subr.mxu0 %v4597_v39  ;;  %3728 = vmatprep.subr.mxu1 %v4593_v10  ;;  %v3022_v10 = vadd.f32 %v3021_v34, %v2945_v57  ;;  %v3841_v57 = vld [vmem:[#allocation12 + $0xf0] sm:$0xff] }
 0x685   : > { %3630 = vmatpush2.msra.mxu0 %v4598_v14  ;;  %3729 = vmatpush2.msra.mxu1 %v4594_v11  ;;  %v3097_v11 = vadd.f32 %v3096_v46, %v3020_v8  ;;  %v3839_v8 = vld [vmem:[#allocation12 + $0xe0] sm:$0xff] }
 0x686   : > { %3631 = vmatprep.subr.mxu0 %v4599_v7  ;;  %3730 = vmatprep.subr.mxu1 %v4595_v23  ;;  %v3028_v23 = vadd.f32 %v3027_v48, %v2951_v52  ;;  %v3840_v52 = vld [vmem:[#allocation12 + $0xe8] sm:$0xff] }
 0x687   : > { %3632 = vmatpush2.msra.mxu0 %v4600_v16  ;;  %3731 = vmatpush2.msra.mxu1 %v4596_v13  ;;  %v3103_v13 = vadd.f32 %v3102_v37, %v3026_v9  ;;  %v3838_v9 = vld [vmem:[#allocation12 + $0xd8] sm:$0xff] }
 0x688   : > { %3633 = vmatprep.subr.mxu0 %v4601_v62  ;;  %3732 = vmatprep.subr.mxu1 %v4597_v39 }
 0x689   : > { %3634 = vmatpush2.msra.mxu0 %v4602_v18  ;;  %3733 = vmatpush2.msra.mxu1 %v4598_v14 }
 0x68a   : > { %3635 = vmatprep.subr.mxu0 %v4603_v36  ;;  %3734 = vmatprep.subr.mxu1 %v4599_v7  ;;  %v3099_v7 = vadd.f32 %v3098_v35, %v3022_v10  ;;  %v3837_v10 = vld [vmem:[#allocation12 + $0xd0] sm:$0xff] }
 0x68b   : > { %3636 = vmatpush2.msra.mxu0 %v4604_v20  ;;  %3735 = vmatpush2.msra.mxu1 %v4600_v16  ;;  %v3105_v16 = vadd.f32 %v3104_v51, %v3028_v23  ;;  %v3835_v23 = vld [vmem:[#allocation12 + $0xc0] sm:$0xff] }
 0x68c   : > { %3637 = vmatprep.subr.mxu0 %v4605_v15  ;;  %3736 = vmatprep.subr.mxu1 %v4601_v62 }
 0x68d   : > { %3638 = vmatpush2.msra.mxu0 %v4606_v22  ;;  %3737 = vmatpush2.msra.mxu1 %v4602_v18  ;;  %v3173_v49 = vpop.f32.mrf.mxu0 }
 0x68e   : > { %3639 = vmatprep.subr.mxu0 %v4607_v58  ;;  %3738 = vmatprep.subr.mxu1 %v4603_v36  ;;  %v3174_v62 = vadd.f32 %v3173_v49, %v3097_v11  ;;  %v3836_v11 = vld [vmem:[#allocation12 + $0xc8] sm:$0xff] }
 0x68f   : > { %3640 = vmatpush2.msra.mxu0 %v4608_v60  ;;  %3739 = vmatpush2.msra.mxu1 %v4604_v20  ;;  %v3175_v50 = vpop.f32.mrf.mxu0 }
 0x690   : > { %3641 = vmatprep.subr.mxu0 %v4609_v45  ;;  %3740 = vmatprep.subr.mxu1 %v4605_v15  ;;  %v3176_v20 = vadd.f32 %v3175_v50, %v3099_v7  ;;  %v3831_v7 = vld [vmem:[#allocation12 + $0xa0] sm:$0xff] }
 0x691   : > { %3642 = vmatpush2.msra.mxu0 %v4610_v12  ;;  %3741 = vmatpush2.msra.mxu1 %v4606_v22 }
 0x692   : > { %3643 = vmatprep.subr.mxu0 %v4611_v38  ;;  %3742 = vmatprep.subr.mxu1 %v4607_v58  ;;  %v3250_v56 = vpop.f32.mrf.mxu1  ;;  %v3179_v5 = vpop.f32.mrf.mxu0 }
 0x693   : > { %3644 = vmatpush2.msra.mxu0 %v4612_v25  ;;  %3743 = vmatpush2.msra.mxu1 %v4608_v60  ;;  %v3180_v18 = vadd.f32 %v3179_v5, %v3103_v13  ;;  %v3251_v15 = vadd.f32 %v3250_v56, %v3174_v62  ;;  %v3834_v13 = vld [vmem:[#allocation12 + $0xb8] sm:$0xff]  ;;  %v3829_v62 = vld [vmem:[#allocation12 + $0x90] sm:$0xff] }
 0x694   : > { %3645 = vmatprep.subr.mxu0 %v4613_v26  ;;  %3744 = vmatprep.subr.mxu1 %v4609_v45  ;;  %v3252_v53 = vpop.f32.mrf.mxu1  ;;  %v3181_v54 = vpop.f32.mrf.mxu0 }
 0x695   : > { %3646 = vmatpush2.msra.mxu0 %v4614_v27  ;;  %3745 = vmatpush2.msra.mxu1 %v4610_v12  ;;  %v3182_v22 = vadd.f32 %v3181_v54, %v3105_v16  ;;  %v3253_v12 = vadd.f32 %v3252_v53, %v3176_v20  ;;  %v3830_v16 = vld [vmem:[#allocation12 + $0x98] sm:$0xff] }
 0x696   : > { %3647 = vmatprep.subr.mxu0 %v4615_v28  ;;  %3746 = vmatprep.subr.mxu1 %v4611_v38  ;;  %v3826_v20 = vld [vmem:[#allocation12 + $0x78] sm:$0xff] }
 0x697   : > { %3648 = vmatpush2.msra.mxu0 %v4616_v29  ;;  %3747 = vmatpush2.msra.mxu1 %v4612_v25 }
 0x698   : > { %3748 = vmatprep.subr.mxu1 %v4613_v26  ;;  %3855 = vmatprep.subr.mxu0 %v3842_v40  ;;  %v3256_v55 = vpop.f32.mrf.mxu1 }
 0x699   : > { %3749 = vmatpush2.msra.mxu1 %v4614_v27  ;;  %v3257_v58 = vadd.f32 %v3256_v55, %v3180_v18  ;;  %v3828_v18 = vld [vmem:[#allocation12 + $0x88] sm:$0xff] }
 0x69a   : > { %3750 = vmatprep.subr.mxu1 %v4615_v28  ;;  %v3258_v61 = vpop.f32.mrf.mxu1 }
 0x69b   : > { %3751 = vmatpush2.msra.mxu1 %v4616_v29  ;;  %v3259_v38 = vadd.f32 %v3258_v61, %v3182_v22  ;;  %v3824_v22 = vld [vmem:[#allocation12 + $0x68] sm:$0xff] }
 0x6d1   : > { %v3327_v44 = vpop.f32.mrf.mxu0 }
 0x6d2   : > { %v3328_v25 = vadd.f32 %v3327_v44, %v3251_v15  ;;  %v3825_v15 = vld [vmem:[#allocation12 + $0x70] sm:$0xff] }
 0x6d3   : > { %v3329_v41 = vpop.f32.mrf.mxu0 }
 0x6d4   : > { %v3330_v29 = vadd.f32 %v3329_v41, %v3253_v12  ;;  %v3820_v12 = vld [vmem:[#allocation12 + $0x48] sm:$0xff] }
 0x6d6   : > { %v3404_v1 = vpop.f32.mrf.mxu1  ;;  %v3333_v63 = vpop.f32.mrf.mxu0 }
 0x6d7   : > { %v3334_v26 = vadd.f32 %v3333_v63, %v3257_v58  ;;  %v3405_v40 = vadd.f32 %v3404_v1, %v3328_v25  ;;  %v3823_v58 = vld [vmem:[#allocation12 + $0x60] sm:$0xff]  ;;  %v3818_v25 = vld [vmem:[#allocation12 + $0x38] sm:$0xff] }
 0x6d8   : > { %v3406_v0 = vpop.f32.mrf.mxu1  ;;  %v3335_v39 = vpop.f32.mrf.mxu0 }
 0x6d9   : > { %v3336_v3 = vadd.f32 %v3335_v39, %v3259_v38  ;;  %v3407_v32 = vadd.f32 %v3406_v0, %v3330_v29  ;;  %v3833_v39 = vld [vmem:[#allocation12 + $0xb0] sm:$0xff]  ;;  %v3819_v38 = vld [vmem:[#allocation12 + $0x40] sm:$0xff]  ;;  %v3814_v29 = vld [vmem:[#allocation12 + $0x18] sm:$0xff] }
 0x6dc   : > { %v3410_v14 = vpop.f32.mrf.mxu1 }
 0x6dd   : > { %v3411_v42 = vadd.f32 %v3410_v14, %v3334_v26  ;;  %v3832_v14 = vld [vmem:[#allocation12 + $0xa8] sm:$0xff]  ;;  %v3817_v26 = vld [vmem:[#allocation12 + $0x30] sm:$0xff] }
 0x6de   : > { %v3412_v60 = vpop.f32.mrf.mxu1 }
 0x6df   : > { %v3413_v34 = vadd.f32 %v3412_v60, %v3336_v3  ;;  %v3822_v60 = vld [vmem:[#allocation12 + $0x58] sm:$0xff]  ;;  %v3812_v3 = vld [vmem:[#allocation12 + $0x8] sm:$0xff] }
 0x715   : > { %v3481_v36 = vpop.f32.mrf.mxu0 }
 0x716   : > { %v3482_v46 = vadd.f32 %v3481_v36, %v3405_v40  ;;  %v3827_v36 = vld [vmem:[#allocation12 + $0x80] sm:$0xff]  ;;  %v3813_v40 = vld [vmem:[#allocation12 + $0x10] sm:$0xff] }
 0x717   : > { %v3483_v45 = vpop.f32.mrf.mxu0 }
 0x718   : > { %v3484_v48 = vadd.f32 %v3483_v45, %v3407_v32  ;;  %v3821_v45 = vld [vmem:[#allocation12 + $0x50] sm:$0xff] }
 0x719   : > { %v3487_v27 = vpop.f32.mrf.mxu0  ;;  %v3558_v28 = vpop.f32.mrf.mxu1 }
 0x71a   : > { %v3488_v47 = vadd.f32 %v3487_v27, %v3411_v42  ;;  %v5819_v37 = vadd.f32 %v3558_v28, %v3482_v46  ;;  %v3816_v27 = vld [vmem:[#allocation12 + $0x28] sm:$0xff]  ;;  %v3815_v28 = vld [vmem:[#allocation12 + $0x20] sm:$0xff] }
 0x71b   : > { %v3489_v30 = vpop.f32.mrf.mxu0  ;;  %v3560_v17 = vpop.f32.mrf.mxu1  ;;  %v3811_v42 = vld [vmem:[#allocation12] sm:$0xff] }
 0x71c   : > { %v3490_v49 = vadd.f32 %v3489_v30, %v3413_v34  ;;  %v5823_v56 = vadd.f32 %v3560_v17, %v3484_v48 }
 0x71d   : > { %v3564_v35 = vpop.f32.mrf.mxu1 }
 0x71e   : > { %v5821_v51 = vadd.f32 %v3564_v35, %v3488_v47 }
 0x71f   : > { %v3566_v50 = vpop.f32.mrf.mxu1 }
 0x720   : > { %v3571_v5 = vadd.f32 %v5821_v51, %v5819_v37  ;;  %v5827_v53 = vadd.f32 %v3566_v50, %v3490_v49 }
 0x722   : > { %v3572_v54 = vrot.slane %v3571_v5, 4  ;;  %v3578_v55 = vadd.f32 %v5827_v53, %v5823_v56 }
 0x724   : > { %v3573_v59 = vadd.f32 %v3572_v54, %v3571_v5  ;;  %v3579_v44 = vrot.slane %v3578_v55, 4 }
 0x726   : > { %v3574_v61 = vrot.slane %v3573_v59, 2  ;;  %v3580_v31 = vadd.f32 %v3579_v44, %v3578_v55 }
 0x728   : > { %v3575_v41 = vadd.f32 %v3574_v61, %v3573_v59  ;;  %v3581_v1 = vrot.slane %v3580_v31, 2 }
 0x72a   : > { %v3582_v2 = vadd.f32 %v3581_v1, %v3580_v31  ;;  %v3576_v4 = vrot.slane %v3575_v41, 1 }
 0x72c   : > { %v3583_v6 = vrot.slane %v3582_v2, 1  ;;  %v3577_v0 = vadd.f32 %v3576_v4, %v3575_v41 }
 0x72e   : > { %v3584_v63 = vadd.f32 %v3583_v6, %v3582_v2 }
 0x730   : > { %3649 = vmatprep.mubr.f32.mxu0 %v3584_v63 }
 0x731   : > { %3650 = vmatmul.mubr.f32.vlgmr.msra.gmra.mxu0 %v3577_v0 }
 0x732   : > { %3856 = vmatpush1.msra.mxu0 %v3841_v57  ;;  %3919 = vmatprep.mubr.f32.mxu0 %v5097_v43 }
 0x733   : > { %3857 = vmatprep.subr.mxu0 %v3840_v52 }
 0x734   : > { %3858 = vmatpush1.msra.mxu0 %v3839_v8 }
 0x735   : > { %3859 = vmatprep.subr.mxu0 %v3838_v9 }
 0x736   : > { %3860 = vmatpush1.msra.mxu0 %v3837_v10  ;;  %v3569_v10 = vld [vmem:[#allocation21] sm:$0x3] }
 0x737   : > { %3861 = vmatprep.subr.mxu0 %v3836_v11 }
 0x738   : > { %3862 = vmatpush1.msra.mxu0 %v3835_v23  ;;  %v3570_v23 = vld [vmem:[#allocation23] sm:$0x3] }
 0x739   : > { %3863 = vmatprep.subr.mxu0 %v3834_v13 }
 0x73a   : > { %3864 = vmatpush1.msra.mxu0 %v3833_v39  ;;  %v3843_v39 = vld [vmem:[#allocation14] sm:$0x3] }
 0x73b   : > { %3865 = vmatprep.subr.mxu0 %v3832_v14 }
 0x73c   : > { %3866 = vmatpush1.msra.mxu0 %v3831_v7  ;;  %v3781_v7 = vrot.slane %v3569_v10, %v5569_v21 }
 0x73d   : > { %3867 = vmatprep.subr.mxu0 %v3830_v16 }
 0x73e   : > { %3868 = vmatpush1.msra.mxu0 %v3829_v62  ;;  %v3796_v62 = vrot.slane %v3570_v23, %v5569_v21 }
 0x73f   : > { %3869 = vmatprep.subr.mxu0 %v3828_v18 }
 0x740   : > { %3870 = vmatpush1.msra.mxu0 %v3827_v36 }
 0x741   : > { %3871 = vmatprep.subr.mxu0 %v3826_v20 }
 0x742   : > { %3872 = vmatpush1.msra.mxu0 %v3825_v15 }
 0x743   : > { %3873 = vmatprep.subr.mxu0 %v3824_v22  ;;  %v3785_v22 = vrot.slane %v3569_v10, %v5572_v24 }
 0x744   : > { %3874 = vmatpush1.msra.mxu0 %v3823_v58  ;;  %v3848_v58 = vrot.slane %v3843_v39, %v5569_v21 }
 0x745   : > { %3875 = vmatprep.subr.mxu0 %v3822_v60  ;;  %v3800_v60 = vrot.slane %v3570_v23, %v5572_v24 }
 0x746   : > { %3876 = vmatpush1.msra.mxu0 %v3821_v45 }
 0x747   : > { %3877 = vmatprep.subr.mxu0 %v3820_v12 }
 0x748   : > { %3878 = vmatpush1.msra.mxu0 %v3819_v38 }
 0x749   : > { %3879 = vmatprep.subr.mxu0 %v3818_v25 }
 0x74a   : > { %3880 = vmatpush1.msra.mxu0 %v3817_v26  ;;  %v3852_v26 = vrot.slane %v3843_v39, %v5572_v24 }
 0x74b   : > { %3881 = vmatprep.subr.mxu0 %v3816_v27 }
 0x74c   : > { %3882 = vmatpush1.msra.mxu0 %v3815_v28 }
 0x74d   : > { %3883 = vmatprep.subr.mxu0 %v3814_v29 }
 0x74e   : > { %3884 = vmatpush1.msra.mxu0 %v3813_v40 }
 0x74f   : > { %3885 = vmatprep.subr.mxu0 %v3812_v3 }
 0x750   : > { %3886 = vmatpush1.msra.mxu0 %v3811_v42 }
 0x751   : > { %3920 = vmatmul.mubr.f32.vlgmr.msra.gmra.mxu0 %v5537_v19 }
 0x752   : > { %3925 = vmatprep.mubr.f32.mxu0 %v5097_v43 }
 0x755   : > { %3926 = vmatmul.mubr.f32.gmra.mxu0 %v5544_v33 }
 0x7f1   : > { %v3651_v30 = vpop.f32.mrf.mxu0 }
 0x7f2   : > { %v3656_v17 = vmul.f32 0.001953125, %v3651_v30 }
 0x7f3   : > { %v3653_v32 = vpop.f32.mrf.mxu0 }
 0x7f4   : > { %v3661_v34 = vrot.slane %v3656_v17, %v5569_v21  ;;  %v3657_v46 = vmul.f32 0.001953125, %v3653_v32 }
 0x7f6   : > { %v3666_v47 = vsub.f32 %v5819_v37, %v3661_v34  ;;  %v3668_v35 = vsub.f32 %v5821_v51, %v3661_v34  ;;  %v3665_v48 = vrot.slane %v3657_v46, %v5569_v21 }
 0x7f8   : > { %v3670_v49 = vmul.f32 %v3666_v47, %v3666_v47  ;;  %v3672_v50 = vmul.f32 %v3668_v35, %v3668_v35  ;;  %v3667_v19 = vsub.f32 %v5823_v56, %v3665_v48  ;;  %v3669_v43 = vsub.f32 %v5827_v53, %v3665_v48 }
 0x7fa   : > { %v3674_v5 = vadd.f32 %v3672_v50, %v3670_v49  ;;  %v3671_v33 = vmul.f32 %v3667_v19, %v3667_v19  ;;  %v3673_v54 = vmul.f32 %v3669_v43, %v3669_v43 }
 0x7fc   : > { %v3675_v55 = vrot.slane %v3674_v5, 4  ;;  %v3681_v59 = vadd.f32 %v3673_v54, %v3671_v33 }
 0x7fe   : > { %v3676_v44 = vadd.f32 %v3675_v55, %v3674_v5  ;;  %v3682_v61 = vrot.slane %v3681_v59, 4 }
 0x800   : > { %v3677_v31 = vrot.slane %v3676_v44, 2  ;;  %v3683_v41 = vadd.f32 %v3682_v61, %v3681_v59 }
 0x802   : > { %v3678_v37 = vadd.f32 %v3677_v31, %v3676_v44  ;;  %v3684_v1 = vrot.slane %v3683_v41, 2 }
 0x804   : > { %v3685_v51 = vadd.f32 %v3684_v1, %v3683_v41  ;;  %v3679_v2 = vrot.slane %v3678_v37, 1 }
 0x806   : > { %v3686_v4 = vrot.slane %v3685_v51, 1  ;;  %v3680_v63 = vadd.f32 %v3679_v2, %v3678_v37 }
 0x808   : > { %v3687_v6 = vadd.f32 %v3686_v4, %v3685_v51 }
 0x80a   : > { %3752 = vmatprep.mubr.f32.mxu1 %v3687_v6 }
 0x80b   : > { %3753 = vmatmul.mubr.f32.vlgmr.msra.gmra.mxu1 %v3680_v63 }
 0x811   : > { %v3921_v9 = vpop.f32.mrf.mxu0 }
 0x812   : > { %v3922_v42 = vadd.f32 %v3921_v9, %v3848_v58 }
 0x813   : > { %v3923_v11 = vpop.f32.mrf.mxu0 }
 0x814   : > { %v3924_v46 = vadd.f32 %v3923_v11, %v3852_v26 }
 0x815   : > { %v3927_v18 = vpop.f32.mrf.mxu0 }
 0x816   : > { %v3928_v30 = vadd.f32 %v3927_v18, %v3848_v58 }
 0x817   : > { %v3929_v27 = vpop.f32.mrf.mxu0 }
 0x8cb   : > { %v3754_v56 = vpop.f32.mrf.mxu1 }
 0x8cc   : > { %v3759_v53 = vmul.f32 0.001953125, %v3754_v56 }
 0x8cd   : > { %v3756_v0 = vpop.f32.mrf.mxu1 }
 0x8ce   : > { %v3761_v57 = vadd.f32 1e-05, %v3759_v53  ;;  %v3760_v52 = vmul.f32 0.001953125, %v3756_v0 }
 0x8d0   : > { %4548 = vrsqrt.f32 %v3761_v57  ;;  %v3762_v8 = vadd.f32 1e-05, %v3760_v52 }
 0x8d2   : > { %4550 = vrsqrt.f32 %v3762_v8 }
 0x8dd   : > { %v4549_v13 = vpop.eup %4548 }
 0x8de   : > { %v3768_v14 = vrot.slane %v4549_v13, %v5569_v21 }
 0x8df   : > { %v4551_v16 = vpop.eup %4550 }
 0x8e0   : > { %v3773_v36 = vmul.f32 %v3768_v14, %v3666_v47  ;;  %v3775_v20 = vmul.f32 %v3768_v14, %v3668_v35  ;;  %v3772_v15 = vrot.slane %v4551_v16, %v5569_v21  ;;  %v3930_v47 = vadd.f32 %v3929_v27, %v3852_v26 }
 0x8e2   : > { %v3788_v45 = vmul.f32 %v3781_v7, %v3773_v36  ;;  %v3790_v12 = vmul.f32 %v3781_v7, %v3775_v20  ;;  %v3774_v38 = vmul.f32 %v3772_v15, %v3667_v19  ;;  %v3776_v25 = vmul.f32 %v3772_v15, %v3669_v43 }
 0x8e4   : > { %v3803_v28 = vadd.f32 %v3796_v62, %v3788_v45  ;;  %v3805_v29 = vadd.f32 %v3796_v62, %v3790_v12  ;;  %v3789_v40 = vmul.f32 %v3785_v22, %v3774_v38  ;;  %v3791_v3 = vmul.f32 %v3785_v22, %v3776_v25 }
 0x8e6   : > { %v3807_v17 = vmax.f32 %v3803_v28, 0.0  ;;  %v3809_v32 = vmax.f32 %v3805_v29, 0.0  ;;  %v3804_v21 = vadd.f32 %v3800_v60, %v3789_v40  ;;  %v3806_v34 = vadd.f32 %v3800_v60, %v3791_v3 }
 0x8e8   : > { %v3932_v35 = vadd.f32 %v3922_v42, %v3807_v17  ;;  %v3934_v24 = vadd.f32 %v3928_v30, %v3809_v32  ;;  %v3808_v48 = vmax.f32 %v3804_v21, 0.0  ;;  %v3810_v49 = vmax.f32 %v3806_v34, 0.0 }
 0x8ea   : > { %v3933_v50 = vadd.f32 %v3924_v46, %v3808_v48  ;;  %v3935_v19 = vadd.f32 %v3930_v47, %v3810_v49  ;;  %3936 = vst [vmem:[%s694_s4] sm:$0xff] %v3932_v35  ;;  %3938 = vst [vmem:[%s694_s4 + $0x10] sm:$0xff] %v3934_v24 }
 0x8ec   : > { %3937 = vst [vmem:[%s694_s4 + $0x8] sm:$0xff] %v3933_v50  ;;  %3939 = vst [vmem:[%s694_s4 + $0x18] sm:$0xff] %v3935_v19 }
 0x8ed   : > { %4996 = shalt.err (!%p4993_p5)
}
 0x8ee   : > { %s4997_s28 = scalar_lea.hbm %s5854_s9, 512  ;;  %s5001_s30 = scalar_lea.hbm %s5968_s8, 1024 }
 0x8ef   : > { %p4998_p8 = scmp.ne.s32.totalorder %s5854_s9, %s4997_s28  ;;  %p5002_p1 = scmp.lt.s32.totalorder %s5854_s9, %s5968_s8 }
 0x8f0   : > { %p5003_p7 = scmp.lt.s32.totalorder %s5001_s30, %s4997_s28 }
 0x8f1   : > { %p4999_p11 = pnand %p4998_p8, %p5969_p9 }
 0x8f2   : > { %p5004_p2 = por %p5003_p7, %p5002_p1 }
 0x8f3   : > { %p5000_p12 = pneg %p4999_p11 }
 0x8f5   : > { %p5005_p6 = pnand %p5004_p2, %p5000_p12 }
 0x8f7   : > { %5008 = shalt.err (!%p5005_p6)
}
 0x8f8   : > { %s5101_s3 = smov 256  }
 0x8f9   : > { %4261 = dma.vmem_to_hbm [thread:$0]  (%p5969_p9), %s5856_s6, 512, %s5854_s9, %s3941_s24, %s5101_s3, %s5101_s3, %s5098_s23  }
 0x8fa PF: > { %s3969_s25 = sand.u32 1, %s5063_s18   ;;  %p5970_p10 = scmp.ne.s32.totalorder %s5949_s17, 0 }
 0x8fb   : > { %p5971_p4 = scmp.ge.s32.totalorder %s5075_s21, 2  ;;  %s3970_s2 = scalar_lea.sflag [#allocation5], %s3969_s25 }
 0x8fd   : > { %p4308_p3 = pnand %p5971_p4, %p5970_p10 }
 0x8ff   : > { %p4309_p13 = pneg %p4308_p3 }
 0x901   : > { %5058 = dma.done.wait (%p4309_p13), %s3970_s2, 512  }
 0x902   : > { %5060 = vsyncadd (%p4309_p13), %s3970_s2, 4294966784  ;;  %p35_p0 = scmp.ge.s32.totalorder %s5346_s16, 4   ;;  %s5972_s18 = smov %s5067_s19 }
 0x903   : > { %s5973_s19 = smov %s5071_s20  ;;  %s5974_s20 = smov %s5358_s26 }
 0x904   : > { %s5975_s21 = smov %s5346_s16  ;;  %37 = sbr.rel (!%p35_p0) target bundleno = 23 (0x17), region = 181 }
 0x909   :  { %3975 = vsyncpa [#allocation4], 1 }
 0x90a   :  { %3977 = vsyncpa [#allocation4 + $0x1], 1 }
 0x90b   :  { %3978 = vsyncpa [#allocation7], 1 }
 0x90c   :  { %3979 = vsyncpa [#allocation10], 1 }
 0x90d   :  { %3980 = vsyncpa [#allocation13], 1 }
 0x90e   :  { %3981 = vsyncpa [#allocation16], 1 }
 0x90f   :  { %3982 = vsyncpa [#allocation19], 1 }
 0x910   :  { %3983 = vsyncpa [#allocation22], 1 }
 0x911   :  { %3984 = vsyncpa [#allocation25], 1 }
 0x912   :  { %3985 = vsyncpa [#allocation5], 1 }
 0x913   :  { %3987 = vsyncpa [#allocation5 + $0x1], 1 }

</bundles_post_ra>
